<compile_context>
chip_gen: v7x
topology: tpu7x:2x2x1
jax: 0.10.0
libtpu: 0.0.40
codegen_flags: <defaults>
</compile_context>

<pallas_src>
import functools

import jax
import jax.numpy as jnp
from jax import lax
from jax.experimental import pallas as pl
from jax.experimental.pallas import tpu as pltpu

LANE = 128       # lane width (last dim tiling)
SUBLANE = 8      # sublane width (second-to-last dim tiling)
_VMEM_LIMIT = 64 * 1024 * 1024


# ------------------------------ small helpers ------------------------------ #

def _round_up(n, m):
    return ((n + m - 1) // m) * m


def _largest_divisor_leq(n, cap):
    cap = max(1, min(n, cap))
    for d in range(cap, 0, -1):
        if n % d == 0:
            return d
    return 1


def _choose_batch_block(bp):
    """Split padded batch across the two v7x TensorCores when it is big enough,
    keeping sublane (8) alignment.  Degenerates to a single block for small batch."""
    if bp >= 16 and (bp // 2) % SUBLANE == 0:
        return bp // 2
    return bp


# ----------------------------- Pallas kernels ------------------------------ #

def _proj_kernel(x_ref, w_ref, b_ref, o_ref):
    """Hoisted input projection: gates_x = x @ W_ih^T + (b_ih + b_hh).

    One large MXU matmul over a chunk of (T * Bp) rows -- no time dependency.
    Accumulation and output are f32; operands are cast to the weight dtype
    (f32 or bf16)."""
    x = x_ref[...].astype(w_ref.dtype)
    o_ref[...] = (
        jnp.dot(x, w_ref[...], preferred_element_type=jnp.float32) + b_ref[...]
    ).astype(o_ref.dtype)


def _lstm_step(s, carry, gx_ref, whh_ref, hp, out_ref=None):
    """One timestep of the recurrence.  h/c stay in vregs (f32); gate math in f32."""
    h, c = carry
    gates = gx_ref[s] + jnp.dot(h.astype(whh_ref.dtype), whh_ref[...],
                                preferred_element_type=jnp.float32)
    i_g = jax.nn.sigmoid(gates[:, 0 * hp:1 * hp])
    f_g = jax.nn.sigmoid(gates[:, 1 * hp:2 * hp])
    g_g = jnp.tanh(gates[:, 2 * hp:3 * hp])
    o_g = jax.nn.sigmoid(gates[:, 3 * hp:4 * hp])
    c = f_g * c + i_g * g_g
    h = o_g * jnp.tanh(c)
    if out_ref is not None:
        out_ref[s] = h.astype(out_ref.dtype)
    return h, c


def _lstm_seq_kernel(gx_ref, whh_ref, out_ref, h_sc, c_sc, *, tc, hp):
    """LSTM recurrence over one time chunk (grid = (batch_blocks, time_chunks)).

    gx_ref  : (tc, bb, 4*hp)  precomputed x@W_ih + b for this chunk
    whh_ref : (hp, 4*hp)      hidden->gates weights (resident, constant index)
    out_ref : (tc, bb, hp)    hidden states for the whole chunk (lane-dense slab)
    h_sc/c_sc : (bb, hp)      carried recurrent state across chunks
    """
    @pl.when(pl.program_id(1) == 0)
    def _():
        h_sc[...] = jnp.zeros_like(h_sc)
        c_sc[...] = jnp.zeros_like(c_sc)

    body = functools.partial(_lstm_step, gx_ref=gx_ref, whh_ref=whh_ref,
                             hp=hp, out_ref=out_ref)
    h, c = lax.fori_loop(0, tc, body, (h_sc[...], c_sc[...]),
                         unroll=True if tc <= 16 else 4)
    h_sc[...] = h
    c_sc[...] = c


def _lstm_final_fc_kernel(gx_ref, whh_ref, wfc_ref, bfc_ref, out_ref, h_sc, c_sc,
                          *, tc, hp):
    """Last LSTM layer fused with the fc: never writes the (T, B, H) sequence;
    only fc(h_T) is written, once, on the last time chunk."""
    @pl.when(pl.program_id(1) == 0)
    def _():
        h_sc[...] = jnp.zeros_like(h_sc)
        c_sc[...] = jnp.zeros_like(c_sc)

    body = functools.partial(_lstm_step, gx_ref=gx_ref, whh_ref=whh_ref, hp=hp)
    h, c = lax.fori_loop(0, tc, body, (h_sc[...], c_sc[...]),
                         unroll=True if tc <= 16 else 4)
    h_sc[...] = h
    c_sc[...] = c

    @pl.when(pl.program_id(1) == pl.num_programs(1) - 1)
    def _():
        out_ref[...] = (
            jnp.dot(h.astype(wfc_ref.dtype), wfc_ref[...],
                    preferred_element_type=jnp.float32) + bfc_ref[...]
        ).astype(out_ref.dtype)


# ------------------------------- wrappers ---------------------------------- #

def input_projection(x_flat, w_t, b):
    """x_flat: (M, K); w_t: (K, 4Hp); b: (1, 4Hp) -> (M, 4Hp) f32."""
    M, _ = x_flat.shape
    K, N = w_t.shape
    bm = _largest_divisor_leq(M, 1024)
    return pl.pallas_call(
        _proj_kernel,
        out_shape=jax.ShapeDtypeStruct((M, N), jnp.float32),
        grid=(M // bm,),
        in_specs=[
            pl.BlockSpec((bm, K), lambda i: (i, 0)),
            pl.BlockSpec((K, N), lambda i: (0, 0)),
            pl.BlockSpec((1, N), lambda i: (0, 0)),
        ],
        out_specs=pl.BlockSpec((bm, N), lambda i: (i, 0)),
        compiler_params=pltpu.CompilerParams(
            dimension_semantics=("parallel",),
            vmem_limit_bytes=_VMEM_LIMIT),
    )(x_flat, w_t, b)


def lstm_layer_pallas(gx, w_hh_t):
    """gx: (T, Bp, 4Hp) f32 precomputed input gates -> (T, Bp, Hp) f32 hidden seq."""
    T, Bp, four_hp = gx.shape
    Hp = four_hp // 4
    bb = _choose_batch_block(Bp)
    tc = _largest_divisor_leq(T, 32)
    grid = (Bp // bb, T // tc)
    return pl.pallas_call(
        functools.partial(_lstm_seq_kernel, tc=tc, hp=Hp),
        out_shape=jax.ShapeDtypeStruct((T, Bp, Hp), jnp.float32),
        grid=grid,
        in_specs=[
            pl.BlockSpec((tc, bb, four_hp), lambda b, t: (t, b, 0)),
            # constant index_map => fetched once, kept resident across the grid
            pl.BlockSpec((Hp, four_hp), lambda b, t: (0, 0)),
        ],
        out_specs=pl.BlockSpec((tc, bb, Hp), lambda b, t: (t, b, 0)),
        scratch_shapes=[
            pltpu.VMEM((bb, Hp), jnp.float32),
            pltpu.VMEM((bb, Hp), jnp.float32),
        ],
        compiler_params=pltpu.CompilerParams(
            dimension_semantics=("parallel", "arbitrary"),
            vmem_limit_bytes=_VMEM_LIMIT),
    )(gx, w_hh_t)


def lstm_final_layer_fc_pallas(gx, w_hh_t, w_fc_t, b_fc):
    """Last layer + fused fc.  Returns fc(h_T): (Bp, Op) f32."""
    T, Bp, four_hp = gx.shape
    Hp = four_hp // 4
    Op = w_fc_t.shape[1]
    bb = _choose_batch_block(Bp)
    tc = _largest_divisor_leq(T, 32)
    grid = (Bp // bb, T // tc)
    return pl.pallas_call(
        functools.partial(_lstm_final_fc_kernel, tc=tc, hp=Hp),
        out_shape=jax.ShapeDtypeStruct((Bp, Op), jnp.float32),
        grid=grid,
        in_specs=[
            pl.BlockSpec((tc, bb, four_hp), lambda b, t: (t, b, 0)),
            pl.BlockSpec((Hp, four_hp), lambda b, t: (0, 0)),
            pl.BlockSpec((Hp, Op), lambda b, t: (0, 0)),
            pl.BlockSpec((1, Op), lambda b, t: (0, 0)),
        ],
        out_specs=pl.BlockSpec((bb, Op), lambda b, t: (b, 0)),
        scratch_shapes=[
            pltpu.VMEM((bb, Hp), jnp.float32),
            pltpu.VMEM((bb, Hp), jnp.float32),
        ],
        compiler_params=pltpu.CompilerParams(
            dimension_semantics=("parallel", "arbitrary"),
            vmem_limit_bytes=_VMEM_LIMIT),
    )(gx, w_hh_t, w_fc_t, b_fc)


@functools.partial(jax.jit, static_argnames=("output_size",))
def lstm_model_forward(x, params, *, output_size):
    """Equivalent of LSTM.forward: multi-layer LSTM (zero init state) + fc on the
    last timestep.  x: (B, T, input_size) -> (B, output_size)."""
    B, T, I = x.shape
    layers = params["layers"]
    Ip = layers[0]["w_ih_t"].shape[0]
    Bp = _round_up(B, SUBLANE)

    # Time-major + pad batch (sublanes) and features (lanes).  Padded feature lanes
    # are zero and provably stay zero through the recurrence (zero weight rows/cols,
    # tanh(0)=0); padded batch rows are sliced away at the end.
    x_tm = jnp.transpose(x, (1, 0, 2))
    x_tm = jnp.pad(x_tm, ((0, 0), (0, Bp - B), (0, Ip - I)))

    h_seq = x_tm                                       # (T, Bp, feat)
    n_layers = len(layers)
    out_p = None
    for l, layer in enumerate(layers):
        feat = h_seq.shape[-1]
        # Hoisted input projection: one big MXU matmul over all T*Bp rows.
        gx = input_projection(h_seq.reshape(T * Bp, feat),
                              layer["w_ih_t"], layer["b"])
        gx = gx.reshape(T, Bp, gx.shape[-1])
        if l < n_layers - 1:
            h_seq = lstm_layer_pallas(gx, layer["w_hh_t"])
        else:
            out_p = lstm_final_layer_fc_pallas(
                gx, layer["w_hh_t"], params["w_fc_t"], params["b_fc"])
    return out_p[:B, :output_size]


# --------------------------- parameter creation ----------------------------- #

def _pack_gate_weight(w, in_pad):
    """(4H, in_dim) PyTorch-layout gate weight -> (in_pad, 4*Hp), transposed and
    padded so every gate block starts on a lane (128) boundary."""
    four_h, in_dim = w.shape
    h = four_h // 4
    hp = _round_up(h, LANE)
    out = jnp.zeros((in_pad, 4 * hp), jnp.float32)
    for g in range(4):
        out = out.at[:in_dim, g * hp:g * hp + h].set(w[g * h:(g + 1) * h, :].T)
    return out


def _pack_gate_bias(b):
    four_h = b.shape[0]
    h = four_h // 4
    hp = _round_up(h, LANE)
    out = jnp.zeros((1, 4 * hp), jnp.float32)
    for g in range(4):
        out = out.at[0, g * hp:g * hp + h].set(b[g * h:(g + 1) * h])
    return out


def init_params(key, input_size, hidden_size, num_layers, output_size,
                dtype=jnp.float32):
    """PyTorch-style init (uniform(-k, k), k=1/sqrt(H)), packed into the padded,
    pre-transposed layouts the kernels expect.  `dtype` controls the matmul-operand
    (weight) storage (f32 or bf16); biases, cell state and gate math stay f32."""
    k = 1.0 / float(hidden_size) ** 0.5
    ip = _round_up(input_size, LANE)
    hp = _round_up(hidden_size, LANE)
    op = _round_up(output_size, LANE)

    layers = []
    for l in range(num_layers):
        in_dim = input_size if l == 0 else hidden_size
        in_pad = ip if l == 0 else hp
        key, k1, k2, k3, k4 = jax.random.split(key, 5)
        w_ih = jax.random.uniform(k1, (4 * hidden_size, in_dim), jnp.float32, -k, k)
        w_hh = jax.random.uniform(k2, (4 * hidden_size, hidden_size), jnp.float32, -k, k)
        b_ih = jax.random.uniform(k3, (4 * hidden_size,), jnp.float32, -k, k)
        b_hh = jax.random.uniform(k4, (4 * hidden_size,), jnp.float32, -k, k)
        layers.append({
            "w_ih_t": _pack_gate_weight(w_ih, in_pad).astype(dtype),   # (in_pad, 4Hp)
            "w_hh_t": _pack_gate_weight(w_hh, hp).astype(dtype),       # (Hp, 4Hp)
            "b": _pack_gate_bias(b_ih + b_hh),                         # (1, 4Hp) f32
            # raw copies for the pure-JAX reference
            "_w_ih": w_ih, "_w_hh": w_hh, "_b_ih": b_ih, "_b_hh": b_hh,
        })

    key, k5, k6 = jax.random.split(key, 3)
    w_fc = jax.random.uniform(k5, (output_size, hidden_size), jnp.float32, -k, k)
    b_fc = jax.random.uniform(k6, (output_size,), jnp.float32, -k, k)
    w_fc_t = jnp.zeros((hp, op), jnp.float32).at[:hidden_size, :output_size].set(w_fc.T)
    b_fc_p = jnp.zeros((1, op), jnp.float32).at[0, :output_size].set(b_fc)
    return {"layers": layers,
            "w_fc_t": w_fc_t.astype(dtype), "b_fc": b_fc_p,
            "_w_fc": w_fc, "_b_fc": b_fc}


# ------------------------------ JAX reference ------------------------------- #

def reference_forward(x, params, hidden_size):
    """Pure-JAX reference reproducing torch.nn.LSTM(batch_first=True) + Linear."""
    B = x.shape[0]
    h_seq = jnp.transpose(x, (1, 0, 2))  # (T, B, I)
    H = hidden_size
    for layer in params["layers"]:
        w_ih, w_hh = layer["_w_ih"], layer["_w_hh"]
        b = layer["_b_ih"] + layer["_b_hh"]

        def step(carry, x_t):
            h, c = carry
            gates = x_t @ w_ih.T + h @ w_hh.T + b
            i = jax.nn.sigmoid(gates[:, 0 * H:1 * H])
            f = jax.nn.sigmoid(gates[:, 1 * H:2 * H])
            g = jnp.tanh(gates[:, 2 * H:3 * H])
            o = jax.nn.sigmoid(gates[:, 3 * H:4 * H])
            c = f * c + i * g
            h = o * jnp.tanh(c)
            return (h, c), h

        init = (jnp.zeros((B, H), jnp.float32), jnp.zeros((B, H), jnp.float32))
        _, h_seq = jax.lax.scan(step, init, h_seq)
    return h_seq[-1] @ params["_w_fc"].T + params["_b_fc"]


# ---------------------------------- main ------------------------------------ #

if __name__ == "__main__":
    # NOTE: the PyTorch module passes h0/c0 of shape (output_size, B, H); for it to run,
    # output_size must equal num_layers.  Since the states are all-zero, semantics are
    # just "zero-initialized num_layers-deep LSTM".
    input_size, hidden_size, num_layers, output_size = 16, 32, 2, 2
    batch, seq = 2, 8

    key = jax.random.PRNGKey(0)
    key, pkey, xkey = jax.random.split(key, 3)
    x = jax.random.normal(xkey, (batch, seq, input_size), jnp.float32)

    # --- f32 weights: bitwise semantics of the PyTorch module, tight tolerance ---
    params = init_params(pkey, input_size, hidden_size, num_layers, output_size,
                         dtype=jnp.float32)
    out = lstm_model_forward(x, params, output_size=output_size)
    out = jax.block_until_ready(out)
    ref = reference_forward(x, params, hidden_size)
    assert out.shape == (batch, output_size), out.shape
    assert jnp.allclose(out, ref, atol=1e-3, rtol=1e-3)

    # --- bf16 weights (matmul operands bf16, f32 accumulation / gate math / state):
    #     halves HBM/VMEM weight traffic and doubles MXU throughput on v6e/v7x.
    #     Looser tolerance because the weights themselves are rounded to bf16.
    params_bf16 = init_params(pkey, input_size, hidden_size, num_layers, output_size,
                              dtype=jnp.bfloat16)
    out_bf16 = jax.block_until_ready(
        lstm_model_forward(x, params_bf16, output_size=output_size))
    assert out_bf16.shape == (batch, output_size), out_bf16.shape
    assert jnp.allclose(out_bf16, ref, atol=1e-1, rtol=1e-1)

    print("KERNEL_OK")
</pallas_src>

<mosaic_0001>
module attributes {stable_mosaic.version = 11 : i64} {
  func.func @_proj_kernel(%arg0: i32, %arg1: memref<64x128xf32, #tpu.memory_space<vmem>>, %arg2: memref<128x512xf32, #tpu.memory_space<vmem>>, %arg3: memref<1x512xf32, #tpu.memory_space<vmem>>, %arg4: memref<64x512xf32, #tpu.memory_space<vmem>>) attributes {dimension_semantics = [#tpu.dimension_semantics<parallel>], iteration_bounds = array<i64: 1>, scalar_prefetch = 0 : i64, scratch_operands = 0 : i64, tpu.core_type = #tpu.core_type<tc>, window_params = [{transform_indices = @transform_0, window_bounds = array<i64: 64, 128>}, {pipeline_mode = #tpu.pipeline_mode<synchronous>, transform_indices = @transform_1, window_bounds = array<i64: 128, 512>}, {pipeline_mode = #tpu.pipeline_mode<synchronous>, transform_indices = @transform_2, window_bounds = array<i64: 1, 512>}, {transform_indices = @transform_3, window_bounds = array<i64: 64, 512>}]} {
    %c0 = arith.constant 0 : index
    %c0_0 = arith.constant 0 : index
    %0 = vector.load %arg1[%c0, %c0_0] : memref<64x128xf32, #tpu.memory_space<vmem>>, vector<64x128xf32>
    %c0_1 = arith.constant 0 : index
    %c0_2 = arith.constant 0 : index
    %1 = vector.load %arg2[%c0_1, %c0_2] : memref<128x512xf32, #tpu.memory_space<vmem>>, vector<128x512xf32>
    %cst = arith.constant dense<0.000000e+00> : vector<64x512xf32>
    %2 = tpu.matmul %0, %1, %cst {dimension_numbers = #tpu.dot_dimension_numbers<[1], [0], [0], [1], [0, 0, 1, 1], [], []>} : vector<64x128xf32>, vector<128x512xf32>, vector<64x512xf32> -> vector<64x512xf32>
    %c0_3 = arith.constant 0 : index
    %c0_4 = arith.constant 0 : index
    %3 = vector.load %arg3[%c0_3, %c0_4] : memref<1x512xf32, #tpu.memory_space<vmem>>, vector<1x512xf32>
    %4 = vector.broadcast %3 : vector<1x512xf32> to vector<64x512xf32>
    %5 = arith.addf %2, %4 : vector<64x512xf32>
    %c0_5 = arith.constant 0 : index
    %c0_6 = arith.constant 0 : index
    %6 = vector.load %arg4[%c0_5, %c0_6] : memref<64x512xf32, #tpu.memory_space<vmem>>, vector<64x512xf32>
    tpu.vector_store %arg4[%c0_5, %c0_6], %5 {strides = array<i32>} : memref<64x512xf32, #tpu.memory_space<vmem>>, vector<64x512xf32>,
    return
  }
  func.func @transform_0(%arg0: i32) -> (i32, i32) {
    %c0_i32 = arith.constant 0 : i32
    %c0_i32_0 = arith.constant 0 : i32
    return %arg0, %c0_i32 : i32, i32
  }
  func.func @transform_1(%arg0: i32) -> (i32, i32) {
    %c0_i32 = arith.constant 0 : i32
    %c0_i32_0 = arith.constant 0 : i32
    %c0_i32_1 = arith.constant 0 : i32
    return %c0_i32, %c0_i32_0 : i32, i32
  }
  func.func @transform_2(%arg0: i32) -> (i32, i32) {
    %c0_i32 = arith.constant 0 : i32
    %c0_i32_0 = arith.constant 0 : i32
    %c0_i32_1 = arith.constant 0 : i32
    return %c0_i32, %c0_i32_0 : i32, i32
  }
  func.func @transform_3(%arg0: i32) -> (i32, i32) {
    %c0_i32 = arith.constant 0 : i32
    %c0_i32_0 = arith.constant 0 : i32
    return %arg0, %c0_i32 : i32, i32
  }
}

module attributes {stable_mosaic.version = 11 : i64} {
  func.func @_lstm_seq_kernel(%arg0: i32, %arg1: i32, %arg2: memref<8x8x512xf32, #tpu.memory_space<vmem>>, %arg3: memref<128x512xf32, #tpu.memory_space<vmem>>, %arg4: memref<8x8x128xf32, #tpu.memory_space<vmem>>, %arg5: memref<8x128xf32, #tpu.memory_space<vmem>>, %arg6: memref<8x128xf32, #tpu.memory_space<vmem>>) attributes {dimension_semantics = [#tpu.dimension_semantics<parallel>, #tpu.dimension_semantics<arbitrary>], iteration_bounds = array<i64: 1, 1>, scalar_prefetch = 0 : i64, scratch_operands = 2 : i64, tpu.core_type = #tpu.core_type<tc>, window_params = [{transform_indices = @transform_0, window_bounds = array<i64: 8, 8, 512>}, {pipeline_mode = #tpu.pipeline_mode<synchronous>, transform_indices = @transform_1, window_bounds = array<i64: 128, 512>}, {transform_indices = @transform_2, window_bounds = array<i64: 8, 8, 128>}]} {
    %c0_i32 = arith.constant 0 : i32
    %0 = arith.cmpi eq, %arg1, %c0_i32 : i32
    %1 = arith.extui %0 : i1 to i32
    %c0_i32_0 = arith.constant 0 : i32
    %2 = arith.cmpi ne, %1, %c0_i32_0 : i32
    scf.if %2 {
      %cst_88 = arith.constant 0.000000e+00 : f32
      %287 = vector.broadcast %cst_88 : f32 to vector<8x128xf32>
      %c0_89 = arith.constant 0 : index
      %c0_90 = arith.constant 0 : index
      %288 = vector.load %arg5[%c0_89, %c0_90] : memref<8x128xf32, #tpu.memory_space<vmem>>, vector<8x128xf32>
      tpu.vector_store %arg5[%c0_89, %c0_90], %287 {strides = array<i32>} : memref<8x128xf32, #tpu.memory_space<vmem>>, vector<8x128xf32>,
      %cst_91 = arith.constant 0.000000e+00 : f32
      %289 = vector.broadcast %cst_91 : f32 to vector<8x128xf32>
      %c0_92 = arith.constant 0 : index
      %c0_93 = arith.constant 0 : index
      %290 = vector.load %arg6[%c0_92, %c0_93] : memref<8x128xf32, #tpu.memory_space<vmem>>, vector<8x128xf32>
      tpu.vector_store %arg6[%c0_92, %c0_93], %289 {strides = array<i32>} : memref<8x128xf32, #tpu.memory_space<vmem>>, vector<8x128xf32>,
    } else {
    }
    %c0 = arith.constant 0 : index
    %c0_1 = arith.constant 0 : index
    %3 = vector.load %arg5[%c0, %c0_1] : memref<8x128xf32, #tpu.memory_space<vmem>>, vector<8x128xf32>
    %c0_2 = arith.constant 0 : index
    %c0_3 = arith.constant 0 : index
    %4 = vector.load %arg6[%c0_2, %c0_3] : memref<8x128xf32, #tpu.memory_space<vmem>>, vector<8x128xf32>
    %c0_i32_4 = arith.constant 0 : i32
    %5 = arith.index_cast %c0_i32_4 : i32 to index
    %c0_5 = arith.constant 0 : index
    %c0_6 = arith.constant 0 : index
    %6 = vector.load %arg2[%5, %c0_5, %c0_6] : memref<8x8x512xf32, #tpu.memory_space<vmem>>, vector<1x8x512xf32>
    %7 = vector.shape_cast %6 : vector<1x8x512xf32> to vector<8x512xf32>
    %c0_7 = arith.constant 0 : index
    %c0_8 = arith.constant 0 : index
    %8 = vector.load %arg3[%c0_7, %c0_8] : memref<128x512xf32, #tpu.memory_space<vmem>>, vector<128x512xf32>
    %cst = arith.constant dense<0.000000e+00> : vector<8x512xf32>
    %9 = tpu.matmul %3, %8, %cst {dimension_numbers = #tpu.dot_dimension_numbers<[1], [0], [0], [1], [0, 0, 1, 1], [], []>} : vector<8x128xf32>, vector<128x512xf32>, vector<8x512xf32> -> vector<8x512xf32>
    %10 = arith.addf %7, %9 : vector<8x512xf32>
    %11 = vector.extract_strided_slice %10 {offsets = [0, 0], sizes = [8, 128], strides = [1, 1]} : vector<8x512xf32> to vector<8x128xf32>
    %12 = arith.negf %11 : vector<8x128xf32>
    %13 = math.exp %12 : vector<8x128xf32>
    %cst_9 = arith.constant 1.000000e+00 : f32
    %14 = vector.broadcast %cst_9 : f32 to vector<8x128xf32>
    %15 = arith.addf %14, %13 : vector<8x128xf32>
    %16 = arith.divf %14, %15 : vector<8x128xf32>
    %17 = vector.extract_strided_slice %10 {offsets = [0, 128], sizes = [8, 128], strides = [1, 1]} : vector<8x512xf32> to vector<8x128xf32>
    %18 = arith.negf %17 : vector<8x128xf32>
    %19 = math.exp %18 : vector<8x128xf32>
    %cst_10 = arith.constant 1.000000e+00 : f32
    %20 = vector.broadcast %cst_10 : f32 to vector<8x128xf32>
    %21 = arith.addf %20, %19 : vector<8x128xf32>
    %22 = arith.divf %20, %21 : vector<8x128xf32>
    %23 = vector.extract_strided_slice %10 {offsets = [0, 256], sizes = [8, 128], strides = [1, 1]} : vector<8x512xf32> to vector<8x128xf32>
    %24 = math.tanh %23 : vector<8x128xf32>
    %25 = vector.extract_strided_slice %10 {offsets = [0, 384], sizes = [8, 128], strides = [1, 1]} : vector<8x512xf32> to vector<8x128xf32>
    %26 = arith.negf %25 : vector<8x128xf32>
    %27 = math.exp %26 : vector<8x128xf32>
    %cst_11 = arith.constant 1.000000e+00 : f32
    %28 = vector.broadcast %cst_11 : f32 to vector<8x128xf32>
    %29 = arith.addf %28, %27 : vector<8x128xf32>
    %30 = arith.divf %28, %29 : vector<8x128xf32>
    %31 = arith.mulf %22, %4 : vector<8x128xf32>
    %32 = arith.mulf %16, %24 : vector<8x128xf32>
    %33 = arith.addf %31, %32 : vector<8x128xf32>
    %34 = math.tanh %33 : vector<8x128xf32>
    %35 = arith.mulf %30, %34 : vector<8x128xf32>
    %36 = arith.index_cast %c0_i32_4 : i32 to index
    %c0_12 = arith.constant 0 : index
    %c0_13 = arith.constant 0 : index
    %37 = vector.load %arg4[%36, %c0_12, %c0_13] : memref<8x8x128xf32, #tpu.memory_space<vmem>>, vector<1x8x128xf32>
    %38 = vector.shape_cast %37 : vector<1x8x128xf32> to vector<8x128xf32>
    %39 = vector.shape_cast %35 : vector<8x128xf32> to vector<1x8x128xf32>
    tpu.vector_store %arg4[%36, %c0_12, %c0_13], %39 {strides = array<i32>} : memref<8x8x128xf32, #tpu.memory_space<vmem>>, vector<1x8x128xf32>,
    %c1_i32 = arith.constant 1 : i32
    %40 = arith.index_cast %c1_i32 : i32 to index
    %c0_14 = arith.constant 0 : index
    %c0_15 = arith.constant 0 : index
    %41 = vector.load %arg2[%40, %c0_14, %c0_15] : memref<8x8x512xf32, #tpu.memory_space<vmem>>, vector<1x8x512xf32>
    %42 = vector.shape_cast %41 : vector<1x8x512xf32> to vector<8x512xf32>
    %c0_16 = arith.constant 0 : index
    %c0_17 = arith.constant 0 : index
    %43 = vector.load %arg3[%c0_16, %c0_17] : memref<128x512xf32, #tpu.memory_space<vmem>>, vector<128x512xf32>
    %cst_18 = arith.constant dense<0.000000e+00> : vector<8x512xf32>
    %44 = tpu.matmul %35, %43, %cst_18 {dimension_numbers = #tpu.dot_dimension_numbers<[1], [0], [0], [1], [0, 0, 1, 1], [], []>} : vector<8x128xf32>, vector<128x512xf32>, vector<8x512xf32> -> vector<8x512xf32>
    %45 = arith.addf %42, %44 : vector<8x512xf32>
    %46 = vector.extract_strided_slice %45 {offsets = [0, 0], sizes = [8, 128], strides = [1, 1]} : vector<8x512xf32> to vector<8x128xf32>
    %47 = arith.negf %46 : vector<8x128xf32>
    %48 = math.exp %47 : vector<8x128xf32>
    %cst_19 = arith.constant 1.000000e+00 : f32
    %49 = vector.broadcast %cst_19 : f32 to vector<8x128xf32>
    %50 = arith.addf %49, %48 : vector<8x128xf32>
    %51 = arith.divf %49, %50 : vector<8x128xf32>
    %52 = vector.extract_strided_slice %45 {offsets = [0, 128], sizes = [8, 128], strides = [1, 1]} : vector<8x512xf32> to vector<8x128xf32>
    %53 = arith.negf %52 : vector<8x128xf32>
    %54 = math.exp %53 : vector<8x128xf32>
    %cst_20 = arith.constant 1.000000e+00 : f32
    %55 = vector.broadcast %cst_20 : f32 to vector<8x128xf32>
    %56 = arith.addf %55, %54 : vector<8x128xf32>
    %57 = arith.divf %55, %56 : vector<8x128xf32>
    %58 = vector.extract_strided_slice %45 {offsets = [0, 256], sizes = [8, 128], strides = [1, 1]} : vector<8x512xf32> to vector<8x128xf32>
    %59 = math.tanh %58 : vector<8x128xf32>
    %60 = vector.extract_strided_slice %45 {offsets = [0, 384], sizes = [8, 128], strides = [1, 1]} : vector<8x512xf32> to vector<8x128xf32>
    %61 = arith.negf %60 : vector<8x128xf32>
    %62 = math.exp %61 : vector<8x128xf32>
    %cst_21 = arith.constant 1.000000e+00 : f32
    %63 = vector.broadcast %cst_21 : f32 to vector<8x128xf32>
    %64 = arith.addf %63, %62 : vector<8x128xf32>
    %65 = arith.divf %63, %64 : vector<8x128xf32>
    %66 = arith.mulf %57, %33 : vector<8x128xf32>
    %67 = arith.mulf %51, %59 : vector<8x128xf32>
    %68 = arith.addf %66, %67 : vector<8x128xf32>
    %69 = math.tanh %68 : vector<8x128xf32>
    %70 = arith.mulf %65, %69 : vector<8x128xf32>
    %71 = arith.index_cast %c1_i32 : i32 to index
    %c0_22 = arith.constant 0 : index
    %c0_23 = arith.constant 0 : index
    %72 = vector.load %arg4[%71, %c0_22, %c0_23] : memref<8x8x128xf32, #tpu.memory_space<vmem>>, vector<1x8x128xf32>
    %73 = vector.shape_cast %72 : vector<1x8x128xf32> to vector<8x128xf32>
    %74 = vector.shape_cast %70 : vector<8x128xf32> to vector<1x8x128xf32>
    tpu.vector_store %arg4[%71, %c0_22, %c0_23], %74 {strides = array<i32>} : memref<8x8x128xf32, #tpu.memory_space<vmem>>, vector<1x8x128xf32>,
    %c2_i32 = arith.constant 2 : i32
    %75 = arith.index_cast %c2_i32 : i32 to index
    %c0_24 = arith.constant 0 : index
    %c0_25 = arith.constant 0 : index
    %76 = vector.load %arg2[%75, %c0_24, %c0_25] : memref<8x8x512xf32, #tpu.memory_space<vmem>>, vector<1x8x512xf32>
    %77 = vector.shape_cast %76 : vector<1x8x512xf32> to vector<8x512xf32>
    %c0_26 = arith.constant 0 : index
    %c0_27 = arith.constant 0 : index
    %78 = vector.load %arg3[%c0_26, %c0_27] : memref<128x512xf32, #tpu.memory_space<vmem>>, vector<128x512xf32>
    %cst_28 = arith.constant dense<0.000000e+00> : vector<8x512xf32>
    %79 = tpu.matmul %70, %78, %cst_28 {dimension_numbers = #tpu.dot_dimension_numbers<[1], [0], [0], [1], [0, 0, 1, 1], [], []>} : vector<8x128xf32>, vector<128x512xf32>, vector<8x512xf32> -> vector<8x512xf32>
    %80 = arith.addf %77, %79 : vector<8x512xf32>
    %81 = vector.extract_strided_slice %80 {offsets = [0, 0], sizes = [8, 128], strides = [1, 1]} : vector<8x512xf32> to vector<8x128xf32>
    %82 = arith.negf %81 : vector<8x128xf32>
    %83 = math.exp %82 : vector<8x128xf32>
    %cst_29 = arith.constant 1.000000e+00 : f32
    %84 = vector.broadcast %cst_29 : f32 to vector<8x128xf32>
    %85 = arith.addf %84, %83 : vector<8x128xf32>
    %86 = arith.divf %84, %85 : vector<8x128xf32>
    %87 = vector.extract_strided_slice %80 {offsets = [0, 128], sizes = [8, 128], strides = [1, 1]} : vector<8x512xf32> to vector<8x128xf32>
    %88 = arith.negf %87 : vector<8x128xf32>
    %89 = math.exp %88 : vector<8x128xf32>
    %cst_30 = arith.constant 1.000000e+00 : f32
    %90 = vector.broadcast %cst_30 : f32 to vector<8x128xf32>
    %91 = arith.addf %90, %89 : vector<8x128xf32>
    %92 = arith.divf %90, %91 : vector<8x128xf32>
    %93 = vector.extract_strided_slice %80 {offsets = [0, 256], sizes = [8, 128], strides = [1, 1]} : vector<8x512xf32> to vector<8x128xf32>
    %94 = math.tanh %93 : vector<8x128xf32>
    %95 = vector.extract_strided_slice %80 {offsets = [0, 384], sizes = [8, 128], strides = [1, 1]} : vector<8x512xf32> to vector<8x128xf32>
    %96 = arith.negf %95 : vector<8x128xf32>
    %97 = math.exp %96 : vector<8x128xf32>
    %cst_31 = arith.constant 1.000000e+00 : f32
    %98 = vector.broadcast %cst_31 : f32 to vector<8x128xf32>
    %99 = arith.addf %98, %97 : vector<8x128xf32>
    %100 = arith.divf %98, %99 : vector<8x128xf32>
    %101 = arith.mulf %92, %68 : vector<8x128xf32>
    %102 = arith.mulf %86, %94 : vector<8x128xf32>
    %103 = arith.addf %101, %102 : vector<8x128xf32>
    %104 = math.tanh %103 : vector<8x128xf32>
    %105 = arith.mulf %100, %104 : vector<8x128xf32>
    %106 = arith.index_cast %c2_i32 : i32 to index
    %c0_32 = arith.constant 0 : index
    %c0_33 = arith.constant 0 : index
    %107 = vector.load %arg4[%106, %c0_32, %c0_33] : memref<8x8x128xf32, #tpu.memory_space<vmem>>, vector<1x8x128xf32>
    %108 = vector.shape_cast %107 : vector<1x8x128xf32> to vector<8x128xf32>
    %109 = vector.shape_cast %105 : vector<8x128xf32> to vector<1x8x128xf32>
    tpu.vector_store %arg4[%106, %c0_32, %c0_33], %109 {strides = array<i32>} : memref<8x8x128xf32, #tpu.memory_space<vmem>>, vector<1x8x128xf32>,
    %c3_i32 = arith.constant 3 : i32
    %110 = arith.index_cast %c3_i32 : i32 to index
    %c0_34 = arith.constant 0 : index
    %c0_35 = arith.constant 0 : index
    %111 = vector.load %arg2[%110, %c0_34, %c0_35] : memref<8x8x512xf32, #tpu.memory_space<vmem>>, vector<1x8x512xf32>
    %112 = vector.shape_cast %111 : vector<1x8x512xf32> to vector<8x512xf32>
    %c0_36 = arith.constant 0 : index
    %c0_37 = arith.constant 0 : index
    %113 = vector.load %arg3[%c0_36, %c0_37] : memref<128x512xf32, #tpu.memory_space<vmem>>, vector<128x512xf32>
    %cst_38 = arith.constant dense<0.000000e+00> : vector<8x512xf32>
    %114 = tpu.matmul %105, %113, %cst_38 {dimension_numbers = #tpu.dot_dimension_numbers<[1], [0], [0], [1], [0, 0, 1, 1], [], []>} : vector<8x128xf32>, vector<128x512xf32>, vector<8x512xf32> -> vector<8x512xf32>
    %115 = arith.addf %112, %114 : vector<8x512xf32>
    %116 = vector.extract_strided_slice %115 {offsets = [0, 0], sizes = [8, 128], strides = [1, 1]} : vector<8x512xf32> to vector<8x128xf32>
    %117 = arith.negf %116 : vector<8x128xf32>
    %118 = math.exp %117 : vector<8x128xf32>
    %cst_39 = arith.constant 1.000000e+00 : f32
    %119 = vector.broadcast %cst_39 : f32 to vector<8x128xf32>
    %120 = arith.addf %119, %118 : vector<8x128xf32>
    %121 = arith.divf %119, %120 : vector<8x128xf32>
    %122 = vector.extract_strided_slice %115 {offsets = [0, 128], sizes = [8, 128], strides = [1, 1]} : vector<8x512xf32> to vector<8x128xf32>
    %123 = arith.negf %122 : vector<8x128xf32>
    %124 = math.exp %123 : vector<8x128xf32>
    %cst_40 = arith.constant 1.000000e+00 : f32
    %125 = vector.broadcast %cst_40 : f32 to vector<8x128xf32>
    %126 = arith.addf %125, %124 : vector<8x128xf32>
    %127 = arith.divf %125, %126 : vector<8x128xf32>
    %128 = vector.extract_strided_slice %115 {offsets = [0, 256], sizes = [8, 128], strides = [1, 1]} : vector<8x512xf32> to vector<8x128xf32>
    %129 = math.tanh %128 : vector<8x128xf32>
    %130 = vector.extract_strided_slice %115 {offsets = [0, 384], sizes = [8, 128], strides = [1, 1]} : vector<8x512xf32> to vector<8x128xf32>
    %131 = arith.negf %130 : vector<8x128xf32>
    %132 = math.exp %131 : vector<8x128xf32>
    %cst_41 = arith.constant 1.000000e+00 : f32
    %133 = vector.broadcast %cst_41 : f32 to vector<8x128xf32>
    %134 = arith.addf %133, %132 : vector<8x128xf32>
    %135 = arith.divf %133, %134 : vector<8x128xf32>
    %136 = arith.mulf %127, %103 : vector<8x128xf32>
    %137 = arith.mulf %121, %129 : vector<8x128xf32>
    %138 = arith.addf %136, %137 : vector<8x128xf32>
    %139 = math.tanh %138 : vector<8x128xf32>
    %140 = arith.mulf %135, %139 : vector<8x128xf32>
    %141 = arith.index_cast %c3_i32 : i32 to index
    %c0_42 = arith.constant 0 : index
    %c0_43 = arith.constant 0 : index
    %142 = vector.load %arg4[%141, %c0_42, %c0_43] : memref<8x8x128xf32, #tpu.memory_space<vmem>>, vector<1x8x128xf32>
    %143 = vector.shape_cast %142 : vector<1x8x128xf32> to vector<8x128xf32>
    %144 = vector.shape_cast %140 : vector<8x128xf32> to vector<1x8x128xf32>
    tpu.vector_store %arg4[%141, %c0_42, %c0_43], %144 {strides = array<i32>} : memref<8x8x128xf32, #tpu.memory_space<vmem>>, vector<1x8x128xf32>,
    %c4_i32 = arith.constant 4 : i32
    %145 = arith.index_cast %c4_i32 : i32 to index
    %c0_44 = arith.constant 0 : index
    %c0_45 = arith.constant 0 : index
    %146 = vector.load %arg2[%145, %c0_44, %c0_45] : memref<8x8x512xf32, #tpu.memory_space<vmem>>, vector<1x8x512xf32>
    %147 = vector.shape_cast %146 : vector<1x8x512xf32> to vector<8x512xf32>
    %c0_46 = arith.constant 0 : index
    %c0_47 = arith.constant 0 : index
    %148 = vector.load %arg3[%c0_46, %c0_47] : memref<128x512xf32, #tpu.memory_space<vmem>>, vector<128x512xf32>
    %cst_48 = arith.constant dense<0.000000e+00> : vector<8x512xf32>
    %149 = tpu.matmul %140, %148, %cst_48 {dimension_numbers = #tpu.dot_dimension_numbers<[1], [0], [0], [1], [0, 0, 1, 1], [], []>} : vector<8x128xf32>, vector<128x512xf32>, vector<8x512xf32> -> vector<8x512xf32>
    %150 = arith.addf %147, %149 : vector<8x512xf32>
    %151 = vector.extract_strided_slice %150 {offsets = [0, 0], sizes = [8, 128], strides = [1, 1]} : vector<8x512xf32> to vector<8x128xf32>
    %152 = arith.negf %151 : vector<8x128xf32>
    %153 = math.exp %152 : vector<8x128xf32>
    %cst_49 = arith.constant 1.000000e+00 : f32
    %154 = vector.broadcast %cst_49 : f32 to vector<8x128xf32>
    %155 = arith.addf %154, %153 : vector<8x128xf32>
    %156 = arith.divf %154, %155 : vector<8x128xf32>
    %157 = vector.extract_strided_slice %150 {offsets = [0, 128], sizes = [8, 128], strides = [1, 1]} : vector<8x512xf32> to vector<8x128xf32>
    %158 = arith.negf %157 : vector<8x128xf32>
    %159 = math.exp %158 : vector<8x128xf32>
    %cst_50 = arith.constant 1.000000e+00 : f32
    %160 = vector.broadcast %cst_50 : f32 to vector<8x128xf32>
    %161 = arith.addf %160, %159 : vector<8x128xf32>
    %162 = arith.divf %160, %161 : vector<8x128xf32>
    %163 = vector.extract_strided_slice %150 {offsets = [0, 256], sizes = [8, 128], strides = [1, 1]} : vector<8x512xf32> to vector<8x128xf32>
    %164 = math.tanh %163 : vector<8x128xf32>
    %165 = vector.extract_strided_slice %150 {offsets = [0, 384], sizes = [8, 128], strides = [1, 1]} : vector<8x512xf32> to vector<8x128xf32>
    %166 = arith.negf %165 : vector<8x128xf32>
    %167 = math.exp %166 : vector<8x128xf32>
    %cst_51 = arith.constant 1.000000e+00 : f32
    %168 = vector.broadcast %cst_51 : f32 to vector<8x128xf32>
    %169 = arith.addf %168, %167 : vector<8x128xf32>
    %170 = arith.divf %168, %169 : vector<8x128xf32>
    %171 = arith.mulf %162, %138 : vector<8x128xf32>
    %172 = arith.mulf %156, %164 : vector<8x128xf32>
    %173 = arith.addf %171, %172 : vector<8x128xf32>
    %174 = math.tanh %173 : vector<8x128xf32>
    %175 = arith.mulf %170, %174 : vector<8x128xf32>
    %176 = arith.index_cast %c4_i32 : i32 to index
    %c0_52 = arith.constant 0 : index
    %c0_53 = arith.constant 0 : index
    %177 = vector.load %arg4[%176, %c0_52, %c0_53] : memref<8x8x128xf32, #tpu.memory_space<vmem>>, vector<1x8x128xf32>
    %178 = vector.shape_cast %177 : vector<1x8x128xf32> to vector<8x128xf32>
    %179 = vector.shape_cast %175 : vector<8x128xf32> to vector<1x8x128xf32>
    tpu.vector_store %arg4[%176, %c0_52, %c0_53], %179 {strides = array<i32>} : memref<8x8x128xf32, #tpu.memory_space<vmem>>, vector<1x8x128xf32>,
    %c5_i32 = arith.constant 5 : i32
    %180 = arith.index_cast %c5_i32 : i32 to index
    %c0_54 = arith.constant 0 : index
    %c0_55 = arith.constant 0 : index
    %181 = vector.load %arg2[%180, %c0_54, %c0_55] : memref<8x8x512xf32, #tpu.memory_space<vmem>>, vector<1x8x512xf32>
    %182 = vector.shape_cast %181 : vector<1x8x512xf32> to vector<8x512xf32>
    %c0_56 = arith.constant 0 : index
    %c0_57 = arith.constant 0 : index
    %183 = vector.load %arg3[%c0_56, %c0_57] : memref<128x512xf32, #tpu.memory_space<vmem>>, vector<128x512xf32>
    %cst_58 = arith.constant dense<0.000000e+00> : vector<8x512xf32>
    %184 = tpu.matmul %175, %183, %cst_58 {dimension_numbers = #tpu.dot_dimension_numbers<[1], [0], [0], [1], [0, 0, 1, 1], [], []>} : vector<8x128xf32>, vector<128x512xf32>, vector<8x512xf32> -> vector<8x512xf32>
    %185 = arith.addf %182, %184 : vector<8x512xf32>
    %186 = vector.extract_strided_slice %185 {offsets = [0, 0], sizes = [8, 128], strides = [1, 1]} : vector<8x512xf32> to vector<8x128xf32>
    %187 = arith.negf %186 : vector<8x128xf32>
    %188 = math.exp %187 : vector<8x128xf32>
    %cst_59 = arith.constant 1.000000e+00 : f32
    %189 = vector.broadcast %cst_59 : f32 to vector<8x128xf32>
    %190 = arith.addf %189, %188 : vector<8x128xf32>
    %191 = arith.divf %189, %190 : vector<8x128xf32>
    %192 = vector.extract_strided_slice %185 {offsets = [0, 128], sizes = [8, 128], strides = [1, 1]} : vector<8x512xf32> to vector<8x128xf32>
    %193 = arith.negf %192 : vector<8x128xf32>
    %194 = math.exp %193 : vector<8x128xf32>
    %cst_60 = arith.constant 1.000000e+00 : f32
    %195 = vector.broadcast %cst_60 : f32 to vector<8x128xf32>
    %196 = arith.addf %195, %194 : vector<8x128xf32>
    %197 = arith.divf %195, %196 : vector<8x128xf32>
    %198 = vector.extract_strided_slice %185 {offsets = [0, 256], sizes = [8, 128], strides = [1, 1]} : vector<8x512xf32> to vector<8x128xf32>
    %199 = math.tanh %198 : vector<8x128xf32>
    %200 = vector.extract_strided_slice %185 {offsets = [0, 384], sizes = [8, 128], strides = [1, 1]} : vector<8x512xf32> to vector<8x128xf32>
    %201 = arith.negf %200 : vector<8x128xf32>
    %202 = math.exp %201 : vector<8x128xf32>
    %cst_61 = arith.constant 1.000000e+00 : f32
    %203 = vector.broadcast %cst_61 : f32 to vector<8x128xf32>
    %204 = arith.addf %203, %202 : vector<8x128xf32>
    %205 = arith.divf %203, %204 : vector<8x128xf32>
    %206 = arith.mulf %197, %173 : vector<8x128xf32>
    %207 = arith.mulf %191, %199 : vector<8x128xf32>
    %208 = arith.addf %206, %207 : vector<8x128xf32>
    %209 = math.tanh %208 : vector<8x128xf32>
    %210 = arith.mulf %205, %209 : vector<8x128xf32>
    %211 = arith.index_cast %c5_i32 : i32 to index
    %c0_62 = arith.constant 0 : index
    %c0_63 = arith.constant 0 : index
    %212 = vector.load %arg4[%211, %c0_62, %c0_63] : memref<8x8x128xf32, #tpu.memory_space<vmem>>, vector<1x8x128xf32>
    %213 = vector.shape_cast %212 : vector<1x8x128xf32> to vector<8x128xf32>
    %214 = vector.shape_cast %210 : vector<8x128xf32> to vector<1x8x128xf32>
    tpu.vector_store %arg4[%211, %c0_62, %c0_63], %214 {strides = array<i32>} : memref<8x8x128xf32, #tpu.memory_space<vmem>>, vector<1x8x128xf32>,
    %c6_i32 = arith.constant 6 : i32
    %215 = arith.index_cast %c6_i32 : i32 to index
    %c0_64 = arith.constant 0 : index
    %c0_65 = arith.constant 0 : index
    %216 = vector.load %arg2[%215, %c0_64, %c0_65] : memref<8x8x512xf32, #tpu.memory_space<vmem>>, vector<1x8x512xf32>
    %217 = vector.shape_cast %216 : vector<1x8x512xf32> to vector<8x512xf32>
    %c0_66 = arith.constant 0 : index
    %c0_67 = arith.constant 0 : index
    %218 = vector.load %arg3[%c0_66, %c0_67] : memref<128x512xf32, #tpu.memory_space<vmem>>, vector<128x512xf32>
    %cst_68 = arith.constant dense<0.000000e+00> : vector<8x512xf32>
    %219 = tpu.matmul %210, %218, %cst_68 {dimension_numbers = #tpu.dot_dimension_numbers<[1], [0], [0], [1], [0, 0, 1, 1], [], []>} : vector<8x128xf32>, vector<128x512xf32>, vector<8x512xf32> -> vector<8x512xf32>
    %220 = arith.addf %217, %219 : vector<8x512xf32>
    %221 = vector.extract_strided_slice %220 {offsets = [0, 0], sizes = [8, 128], strides = [1, 1]} : vector<8x512xf32> to vector<8x128xf32>
    %222 = arith.negf %221 : vector<8x128xf32>
    %223 = math.exp %222 : vector<8x128xf32>
    %cst_69 = arith.constant 1.000000e+00 : f32
    %224 = vector.broadcast %cst_69 : f32 to vector<8x128xf32>
    %225 = arith.addf %224, %223 : vector<8x128xf32>
    %226 = arith.divf %224, %225 : vector<8x128xf32>
    %227 = vector.extract_strided_slice %220 {offsets = [0, 128], sizes = [8, 128], strides = [1, 1]} : vector<8x512xf32> to vector<8x128xf32>
    %228 = arith.negf %227 : vector<8x128xf32>
    %229 = math.exp %228 : vector<8x128xf32>
    %cst_70 = arith.constant 1.000000e+00 : f32
    %230 = vector.broadcast %cst_70 : f32 to vector<8x128xf32>
    %231 = arith.addf %230, %229 : vector<8x128xf32>
    %232 = arith.divf %230, %231 : vector<8x128xf32>
    %233 = vector.extract_strided_slice %220 {offsets = [0, 256], sizes = [8, 128], strides = [1, 1]} : vector<8x512xf32> to vector<8x128xf32>
    %234 = math.tanh %233 : vector<8x128xf32>
    %235 = vector.extract_strided_slice %220 {offsets = [0, 384], sizes = [8, 128], strides = [1, 1]} : vector<8x512xf32> to vector<8x128xf32>
    %236 = arith.negf %235 : vector<8x128xf32>
    %237 = math.exp %236 : vector<8x128xf32>
    %cst_71 = arith.constant 1.000000e+00 : f32
    %238 = vector.broadcast %cst_71 : f32 to vector<8x128xf32>
    %239 = arith.addf %238, %237 : vector<8x128xf32>
    %240 = arith.divf %238, %239 : vector<8x128xf32>
    %241 = arith.mulf %232, %208 : vector<8x128xf32>
    %242 = arith.mulf %226, %234 : vector<8x128xf32>
    %243 = arith.addf %241, %242 : vector<8x128xf32>
    %244 = math.tanh %243 : vector<8x128xf32>
    %245 = arith.mulf %240, %244 : vector<8x128xf32>
    %246 = arith.index_cast %c6_i32 : i32 to index
    %c0_72 = arith.constant 0 : index
    %c0_73 = arith.constant 0 : index
    %247 = vector.load %arg4[%246, %c0_72, %c0_73] : memref<8x8x128xf32, #tpu.memory_space<vmem>>, vector<1x8x128xf32>
    %248 = vector.shape_cast %247 : vector<1x8x128xf32> to vector<8x128xf32>
    %249 = vector.shape_cast %245 : vector<8x128xf32> to vector<1x8x128xf32>
    tpu.vector_store %arg4[%246, %c0_72, %c0_73], %249 {strides = array<i32>} : memref<8x8x128xf32, #tpu.memory_space<vmem>>, vector<1x8x128xf32>,
    %c7_i32 = arith.constant 7 : i32
    %250 = arith.index_cast %c7_i32 : i32 to index
    %c0_74 = arith.constant 0 : index
    %c0_75 = arith.constant 0 : index
    %251 = vector.load %arg2[%250, %c0_74, %c0_75] : memref<8x8x512xf32, #tpu.memory_space<vmem>>, vector<1x8x512xf32>
    %252 = vector.shape_cast %251 : vector<1x8x512xf32> to vector<8x512xf32>
    %c0_76 = arith.constant 0 : index
    %c0_77 = arith.constant 0 : index
    %253 = vector.load %arg3[%c0_76, %c0_77] : memref<128x512xf32, #tpu.memory_space<vmem>>, vector<128x512xf32>
    %cst_78 = arith.constant dense<0.000000e+00> : vector<8x512xf32>
    %254 = tpu.matmul %245, %253, %cst_78 {dimension_numbers = #tpu.dot_dimension_numbers<[1], [0], [0], [1], [0, 0, 1, 1], [], []>} : vector<8x128xf32>, vector<128x512xf32>, vector<8x512xf32> -> vector<8x512xf32>
    %255 = arith.addf %252, %254 : vector<8x512xf32>
    %256 = vector.extract_strided_slice %255 {offsets = [0, 0], sizes = [8, 128], strides = [1, 1]} : vector<8x512xf32> to vector<8x128xf32>
    %257 = arith.negf %256 : vector<8x128xf32>
    %258 = math.exp %257 : vector<8x128xf32>
    %cst_79 = arith.constant 1.000000e+00 : f32
    %259 = vector.broadcast %cst_79 : f32 to vector<8x128xf32>
    %260 = arith.addf %259, %258 : vector<8x128xf32>
    %261 = arith.divf %259, %260 : vector<8x128xf32>
    %262 = vector.extract_strided_slice %255 {offsets = [0, 128], sizes = [8, 128], strides = [1, 1]} : vector<8x512xf32> to vector<8x128xf32>
    %263 = arith.negf %262 : vector<8x128xf32>
    %264 = math.exp %263 : vector<8x128xf32>
    %cst_80 = arith.constant 1.000000e+00 : f32
    %265 = vector.broadcast %cst_80 : f32 to vector<8x128xf32>
    %266 = arith.addf %265, %264 : vector<8x128xf32>
    %267 = arith.divf %265, %266 : vector<8x128xf32>
    %268 = vector.extract_strided_slice %255 {offsets = [0, 256], sizes = [8, 128], strides = [1, 1]} : vector<8x512xf32> to vector<8x128xf32>
    %269 = math.tanh %268 : vector<8x128xf32>
    %270 = vector.extract_strided_slice %255 {offsets = [0, 384], sizes = [8, 128], strides = [1, 1]} : vector<8x512xf32> to vector<8x128xf32>
    %271 = arith.negf %270 : vector<8x128xf32>
    %272 = math.exp %271 : vector<8x128xf32>
    %cst_81 = arith.constant 1.000000e+00 : f32
    %273 = vector.broadcast %cst_81 : f32 to vector<8x128xf32>
    %274 = arith.addf %273, %272 : vector<8x128xf32>
    %275 = arith.divf %273, %274 : vector<8x128xf32>
    %276 = arith.mulf %267, %243 : vector<8x128xf32>
    %277 = arith.mulf %261, %269 : vector<8x128xf32>
    %278 = arith.addf %276, %277 : vector<8x128xf32>
    %279 = math.tanh %278 : vector<8x128xf32>
    %280 = arith.mulf %275, %279 : vector<8x128xf32>
    %281 = arith.index_cast %c7_i32 : i32 to index
    %c0_82 = arith.constant 0 : index
    %c0_83 = arith.constant 0 : index
    %282 = vector.load %arg4[%281, %c0_82, %c0_83] : memref<8x8x128xf32, #tpu.memory_space<vmem>>, vector<1x8x128xf32>
    %283 = vector.shape_cast %282 : vector<1x8x128xf32> to vector<8x128xf32>
    %284 = vector.shape_cast %280 : vector<8x128xf32> to vector<1x8x128xf32>
    tpu.vector_store %arg4[%281, %c0_82, %c0_83], %284 {strides = array<i32>} : memref<8x8x128xf32, #tpu.memory_space<vmem>>, vector<1x8x128xf32>,
    %c8_i32 = arith.constant 8 : i32
    %c0_84 = arith.constant 0 : index
    %c0_85 = arith.constant 0 : index
    %285 = vector.load %arg5[%c0_84, %c0_85] : memref<8x128xf32, #tpu.memory_space<vmem>>, vector<8x128xf32>
    tpu.vector_store %arg5[%c0_84, %c0_85], %280 {strides = array<i32>} : memref<8x128xf32, #tpu.memory_space<vmem>>, vector<8x128xf32>,
    %c0_86 = arith.constant 0 : index
    %c0_87 = arith.constant 0 : index
    %286 = vector.load %arg6[%c0_86, %c0_87] : memref<8x128xf32, #tpu.memory_space<vmem>>, vector<8x128xf32>
    tpu.vector_store %arg6[%c0_86, %c0_87], %278 {strides = array<i32>} : memref<8x128xf32, #tpu.memory_space<vmem>>, vector<8x128xf32>,
    return
  }
  func.func @transform_0(%arg0: i32, %arg1: i32) -> (i32, i32, i32) {
    %c0_i32 = arith.constant 0 : i32
    %c0_i32_0 = arith.constant 0 : i32
    return %arg1, %arg0, %c0_i32 : i32, i32, i32
  }
  func.func @transform_1(%arg0: i32, %arg1: i32) -> (i32, i32) {
    %c0_i32 = arith.constant 0 : i32
    %c0_i32_0 = arith.constant 0 : i32
    %c0_i32_1 = arith.constant 0 : i32
    return %c0_i32, %c0_i32_0 : i32, i32
  }
  func.func @transform_2(%arg0: i32, %arg1: i32) -> (i32, i32, i32) {
    %c0_i32 = arith.constant 0 : i32
    %c0_i32_0 = arith.constant 0 : i32
    return %arg1, %arg0, %c0_i32 : i32, i32, i32
  }
}

module attributes {stable_mosaic.version = 11 : i64} {
  func.func @_lstm_final_fc_kernel(%arg0: i32, %arg1: i32, %arg2: memref<8x8x512xf32, #tpu.memory_space<vmem>>, %arg3: memref<128x512xf32, #tpu.memory_space<vmem>>, %arg4: memref<128x128xf32, #tpu.memory_space<vmem>>, %arg5: memref<1x128xf32, #tpu.memory_space<vmem>>, %arg6: memref<8x128xf32, #tpu.memory_space<vmem>>, %arg7: memref<8x128xf32, #tpu.memory_space<vmem>>, %arg8: memref<8x128xf32, #tpu.memory_space<vmem>>) attributes {dimension_semantics = [#tpu.dimension_semantics<parallel>, #tpu.dimension_semantics<arbitrary>], iteration_bounds = array<i64: 1, 1>, scalar_prefetch = 0 : i64, scratch_operands = 2 : i64, tpu.core_type = #tpu.core_type<tc>, window_params = [{transform_indices = @transform_0, window_bounds = array<i64: 8, 8, 512>}, {pipeline_mode = #tpu.pipeline_mode<synchronous>, transform_indices = @transform_1, window_bounds = array<i64: 128, 512>}, {pipeline_mode = #tpu.pipeline_mode<synchronous>, transform_indices = @transform_2, window_bounds = array<i64: 128, 128>}, {pipeline_mode = #tpu.pipeline_mode<synchronous>, transform_indices = @transform_3, window_bounds = array<i64: 1, 128>}, {transform_indices = @transform_4, window_bounds = array<i64: 8, 128>}]} {
    %c0_i32 = arith.constant 0 : i32
    %0 = arith.cmpi eq, %arg1, %c0_i32 : i32
    %1 = arith.extui %0 : i1 to i32
    %c0_i32_0 = arith.constant 0 : i32
    %2 = arith.cmpi ne, %1, %c0_i32_0 : i32
    scf.if %2 {
      %cst_74 = arith.constant 0.000000e+00 : f32
      %258 = vector.broadcast %cst_74 : f32 to vector<8x128xf32>
      %c0_75 = arith.constant 0 : index
      %c0_76 = arith.constant 0 : index
      %259 = vector.load %arg7[%c0_75, %c0_76] : memref<8x128xf32, #tpu.memory_space<vmem>>, vector<8x128xf32>
      tpu.vector_store %arg7[%c0_75, %c0_76], %258 {strides = array<i32>} : memref<8x128xf32, #tpu.memory_space<vmem>>, vector<8x128xf32>,
      %cst_77 = arith.constant 0.000000e+00 : f32
      %260 = vector.broadcast %cst_77 : f32 to vector<8x128xf32>
      %c0_78 = arith.constant 0 : index
      %c0_79 = arith.constant 0 : index
      %261 = vector.load %arg8[%c0_78, %c0_79] : memref<8x128xf32, #tpu.memory_space<vmem>>, vector<8x128xf32>
      tpu.vector_store %arg8[%c0_78, %c0_79], %260 {strides = array<i32>} : memref<8x128xf32, #tpu.memory_space<vmem>>, vector<8x128xf32>,
    } else {
    }
    %c0 = arith.constant 0 : index
    %c0_1 = arith.constant 0 : index
    %3 = vector.load %arg7[%c0, %c0_1] : memref<8x128xf32, #tpu.memory_space<vmem>>, vector<8x128xf32>
    %c0_2 = arith.constant 0 : index
    %c0_3 = arith.constant 0 : index
    %4 = vector.load %arg8[%c0_2, %c0_3] : memref<8x128xf32, #tpu.memory_space<vmem>>, vector<8x128xf32>
    %c0_i32_4 = arith.constant 0 : i32
    %5 = arith.index_cast %c0_i32_4 : i32 to index
    %c0_5 = arith.constant 0 : index
    %c0_6 = arith.constant 0 : index
    %6 = vector.load %arg2[%5, %c0_5, %c0_6] : memref<8x8x512xf32, #tpu.memory_space<vmem>>, vector<1x8x512xf32>
    %7 = vector.shape_cast %6 : vector<1x8x512xf32> to vector<8x512xf32>
    %c0_7 = arith.constant 0 : index
    %c0_8 = arith.constant 0 : index
    %8 = vector.load %arg3[%c0_7, %c0_8] : memref<128x512xf32, #tpu.memory_space<vmem>>, vector<128x512xf32>
    %cst = arith.constant dense<0.000000e+00> : vector<8x512xf32>
    %9 = tpu.matmul %3, %8, %cst {dimension_numbers = #tpu.dot_dimension_numbers<[1], [0], [0], [1], [0, 0, 1, 1], [], []>} : vector<8x128xf32>, vector<128x512xf32>, vector<8x512xf32> -> vector<8x512xf32>
    %10 = arith.addf %7, %9 : vector<8x512xf32>
    %11 = vector.extract_strided_slice %10 {offsets = [0, 0], sizes = [8, 128], strides = [1, 1]} : vector<8x512xf32> to vector<8x128xf32>
    %12 = arith.negf %11 : vector<8x128xf32>
    %13 = math.exp %12 : vector<8x128xf32>
    %cst_9 = arith.constant 1.000000e+00 : f32
    %14 = vector.broadcast %cst_9 : f32 to vector<8x128xf32>
    %15 = arith.addf %14, %13 : vector<8x128xf32>
    %16 = arith.divf %14, %15 : vector<8x128xf32>
    %17 = vector.extract_strided_slice %10 {offsets = [0, 128], sizes = [8, 128], strides = [1, 1]} : vector<8x512xf32> to vector<8x128xf32>
    %18 = arith.negf %17 : vector<8x128xf32>
    %19 = math.exp %18 : vector<8x128xf32>
    %cst_10 = arith.constant 1.000000e+00 : f32
    %20 = vector.broadcast %cst_10 : f32 to vector<8x128xf32>
    %21 = arith.addf %20, %19 : vector<8x128xf32>
    %22 = arith.divf %20, %21 : vector<8x128xf32>
    %23 = vector.extract_strided_slice %10 {offsets = [0, 256], sizes = [8, 128], strides = [1, 1]} : vector<8x512xf32> to vector<8x128xf32>
    %24 = math.tanh %23 : vector<8x128xf32>
    %25 = vector.extract_strided_slice %10 {offsets = [0, 384], sizes = [8, 128], strides = [1, 1]} : vector<8x512xf32> to vector<8x128xf32>
    %26 = arith.negf %25 : vector<8x128xf32>
    %27 = math.exp %26 : vector<8x128xf32>
    %cst_11 = arith.constant 1.000000e+00 : f32
    %28 = vector.broadcast %cst_11 : f32 to vector<8x128xf32>
    %29 = arith.addf %28, %27 : vector<8x128xf32>
    %30 = arith.divf %28, %29 : vector<8x128xf32>
    %31 = arith.mulf %22, %4 : vector<8x128xf32>
    %32 = arith.mulf %16, %24 : vector<8x128xf32>
    %33 = arith.addf %31, %32 : vector<8x128xf32>
    %34 = math.tanh %33 : vector<8x128xf32>
    %35 = arith.mulf %30, %34 : vector<8x128xf32>
    %c1_i32 = arith.constant 1 : i32
    %36 = arith.index_cast %c1_i32 : i32 to index
    %c0_12 = arith.constant 0 : index
    %c0_13 = arith.constant 0 : index
    %37 = vector.load %arg2[%36, %c0_12, %c0_13] : memref<8x8x512xf32, #tpu.memory_space<vmem>>, vector<1x8x512xf32>
    %38 = vector.shape_cast %37 : vector<1x8x512xf32> to vector<8x512xf32>
    %c0_14 = arith.constant 0 : index
    %c0_15 = arith.constant 0 : index
    %39 = vector.load %arg3[%c0_14, %c0_15] : memref<128x512xf32, #tpu.memory_space<vmem>>, vector<128x512xf32>
    %cst_16 = arith.constant dense<0.000000e+00> : vector<8x512xf32>
    %40 = tpu.matmul %35, %39, %cst_16 {dimension_numbers = #tpu.dot_dimension_numbers<[1], [0], [0], [1], [0, 0, 1, 1], [], []>} : vector<8x128xf32>, vector<128x512xf32>, vector<8x512xf32> -> vector<8x512xf32>
    %41 = arith.addf %38, %40 : vector<8x512xf32>
    %42 = vector.extract_strided_slice %41 {offsets = [0, 0], sizes = [8, 128], strides = [1, 1]} : vector<8x512xf32> to vector<8x128xf32>
    %43 = arith.negf %42 : vector<8x128xf32>
    %44 = math.exp %43 : vector<8x128xf32>
    %cst_17 = arith.constant 1.000000e+00 : f32
    %45 = vector.broadcast %cst_17 : f32 to vector<8x128xf32>
    %46 = arith.addf %45, %44 : vector<8x128xf32>
    %47 = arith.divf %45, %46 : vector<8x128xf32>
    %48 = vector.extract_strided_slice %41 {offsets = [0, 128], sizes = [8, 128], strides = [1, 1]} : vector<8x512xf32> to vector<8x128xf32>
    %49 = arith.negf %48 : vector<8x128xf32>
    %50 = math.exp %49 : vector<8x128xf32>
    %cst_18 = arith.constant 1.000000e+00 : f32
    %51 = vector.broadcast %cst_18 : f32 to vector<8x128xf32>
    %52 = arith.addf %51, %50 : vector<8x128xf32>
    %53 = arith.divf %51, %52 : vector<8x128xf32>
    %54 = vector.extract_strided_slice %41 {offsets = [0, 256], sizes = [8, 128], strides = [1, 1]} : vector<8x512xf32> to vector<8x128xf32>
    %55 = math.tanh %54 : vector<8x128xf32>
    %56 = vector.extract_strided_slice %41 {offsets = [0, 384], sizes = [8, 128], strides = [1, 1]} : vector<8x512xf32> to vector<8x128xf32>
    %57 = arith.negf %56 : vector<8x128xf32>
    %58 = math.exp %57 : vector<8x128xf32>
    %cst_19 = arith.constant 1.000000e+00 : f32
    %59 = vector.broadcast %cst_19 : f32 to vector<8x128xf32>
    %60 = arith.addf %59, %58 : vector<8x128xf32>
    %61 = arith.divf %59, %60 : vector<8x128xf32>
    %62 = arith.mulf %53, %33 : vector<8x128xf32>
    %63 = arith.mulf %47, %55 : vector<8x128xf32>
    %64 = arith.addf %62, %63 : vector<8x128xf32>
    %65 = math.tanh %64 : vector<8x128xf32>
    %66 = arith.mulf %61, %65 : vector<8x128xf32>
    %c2_i32 = arith.constant 2 : i32
    %67 = arith.index_cast %c2_i32 : i32 to index
    %c0_20 = arith.constant 0 : index
    %c0_21 = arith.constant 0 : index
    %68 = vector.load %arg2[%67, %c0_20, %c0_21] : memref<8x8x512xf32, #tpu.memory_space<vmem>>, vector<1x8x512xf32>
    %69 = vector.shape_cast %68 : vector<1x8x512xf32> to vector<8x512xf32>
    %c0_22 = arith.constant 0 : index
    %c0_23 = arith.constant 0 : index
    %70 = vector.load %arg3[%c0_22, %c0_23] : memref<128x512xf32, #tpu.memory_space<vmem>>, vector<128x512xf32>
    %cst_24 = arith.constant dense<0.000000e+00> : vector<8x512xf32>
    %71 = tpu.matmul %66, %70, %cst_24 {dimension_numbers = #tpu.dot_dimension_numbers<[1], [0], [0], [1], [0, 0, 1, 1], [], []>} : vector<8x128xf32>, vector<128x512xf32>, vector<8x512xf32> -> vector<8x512xf32>
    %72 = arith.addf %69, %71 : vector<8x512xf32>
    %73 = vector.extract_strided_slice %72 {offsets = [0, 0], sizes = [8, 128], strides = [1, 1]} : vector<8x512xf32> to vector<8x128xf32>
    %74 = arith.negf %73 : vector<8x128xf32>
    %75 = math.exp %74 : vector<8x128xf32>
    %cst_25 = arith.constant 1.000000e+00 : f32
    %76 = vector.broadcast %cst_25 : f32 to vector<8x128xf32>
    %77 = arith.addf %76, %75 : vector<8x128xf32>
    %78 = arith.divf %76, %77 : vector<8x128xf32>
    %79 = vector.extract_strided_slice %72 {offsets = [0, 128], sizes = [8, 128], strides = [1, 1]} : vector<8x512xf32> to vector<8x128xf32>
    %80 = arith.negf %79 : vector<8x128xf32>
    %81 = math.exp %80 : vector<8x128xf32>
    %cst_26 = arith.constant 1.000000e+00 : f32
    %82 = vector.broadcast %cst_26 : f32 to vector<8x128xf32>
    %83 = arith.addf %82, %81 : vector<8x128xf32>
    %84 = arith.divf %82, %83 : vector<8x128xf32>
    %85 = vector.extract_strided_slice %72 {offsets = [0, 256], sizes = [8, 128], strides = [1, 1]} : vector<8x512xf32> to vector<8x128xf32>
    %86 = math.tanh %85 : vector<8x128xf32>
    %87 = vector.extract_strided_slice %72 {offsets = [0, 384], sizes = [8, 128], strides = [1, 1]} : vector<8x512xf32> to vector<8x128xf32>
    %88 = arith.negf %87 : vector<8x128xf32>
    %89 = math.exp %88 : vector<8x128xf32>
    %cst_27 = arith.constant 1.000000e+00 : f32
    %90 = vector.broadcast %cst_27 : f32 to vector<8x128xf32>
    %91 = arith.addf %90, %89 : vector<8x128xf32>
    %92 = arith.divf %90, %91 : vector<8x128xf32>
    %93 = arith.mulf %84, %64 : vector<8x128xf32>
    %94 = arith.mulf %78, %86 : vector<8x128xf32>
    %95 = arith.addf %93, %94 : vector<8x128xf32>
    %96 = math.tanh %95 : vector<8x128xf32>
    %97 = arith.mulf %92, %96 : vector<8x128xf32>
    %c3_i32 = arith.constant 3 : i32
    %98 = arith.index_cast %c3_i32 : i32 to index
    %c0_28 = arith.constant 0 : index
    %c0_29 = arith.constant 0 : index
    %99 = vector.load %arg2[%98, %c0_28, %c0_29] : memref<8x8x512xf32, #tpu.memory_space<vmem>>, vector<1x8x512xf32>
    %100 = vector.shape_cast %99 : vector<1x8x512xf32> to vector<8x512xf32>
    %c0_30 = arith.constant 0 : index
    %c0_31 = arith.constant 0 : index
    %101 = vector.load %arg3[%c0_30, %c0_31] : memref<128x512xf32, #tpu.memory_space<vmem>>, vector<128x512xf32>
    %cst_32 = arith.constant dense<0.000000e+00> : vector<8x512xf32>
    %102 = tpu.matmul %97, %101, %cst_32 {dimension_numbers = #tpu.dot_dimension_numbers<[1], [0], [0], [1], [0, 0, 1, 1], [], []>} : vector<8x128xf32>, vector<128x512xf32>, vector<8x512xf32> -> vector<8x512xf32>
    %103 = arith.addf %100, %102 : vector<8x512xf32>
    %104 = vector.extract_strided_slice %103 {offsets = [0, 0], sizes = [8, 128], strides = [1, 1]} : vector<8x512xf32> to vector<8x128xf32>
    %105 = arith.negf %104 : vector<8x128xf32>
    %106 = math.exp %105 : vector<8x128xf32>
    %cst_33 = arith.constant 1.000000e+00 : f32
    %107 = vector.broadcast %cst_33 : f32 to vector<8x128xf32>
    %108 = arith.addf %107, %106 : vector<8x128xf32>
    %109 = arith.divf %107, %108 : vector<8x128xf32>
    %110 = vector.extract_strided_slice %103 {offsets = [0, 128], sizes = [8, 128], strides = [1, 1]} : vector<8x512xf32> to vector<8x128xf32>
    %111 = arith.negf %110 : vector<8x128xf32>
    %112 = math.exp %111 : vector<8x128xf32>
    %cst_34 = arith.constant 1.000000e+00 : f32
    %113 = vector.broadcast %cst_34 : f32 to vector<8x128xf32>
    %114 = arith.addf %113, %112 : vector<8x128xf32>
    %115 = arith.divf %113, %114 : vector<8x128xf32>
    %116 = vector.extract_strided_slice %103 {offsets = [0, 256], sizes = [8, 128], strides = [1, 1]} : vector<8x512xf32> to vector<8x128xf32>
    %117 = math.tanh %116 : vector<8x128xf32>
    %118 = vector.extract_strided_slice %103 {offsets = [0, 384], sizes = [8, 128], strides = [1, 1]} : vector<8x512xf32> to vector<8x128xf32>
    %119 = arith.negf %118 : vector<8x128xf32>
    %120 = math.exp %119 : vector<8x128xf32>
    %cst_35 = arith.constant 1.000000e+00 : f32
    %121 = vector.broadcast %cst_35 : f32 to vector<8x128xf32>
    %122 = arith.addf %121, %120 : vector<8x128xf32>
    %123 = arith.divf %121, %122 : vector<8x128xf32>
    %124 = arith.mulf %115, %95 : vector<8x128xf32>
    %125 = arith.mulf %109, %117 : vector<8x128xf32>
    %126 = arith.addf %124, %125 : vector<8x128xf32>
    %127 = math.tanh %126 : vector<8x128xf32>
    %128 = arith.mulf %123, %127 : vector<8x128xf32>
    %c4_i32 = arith.constant 4 : i32
    %129 = arith.index_cast %c4_i32 : i32 to index
    %c0_36 = arith.constant 0 : index
    %c0_37 = arith.constant 0 : index
    %130 = vector.load %arg2[%129, %c0_36, %c0_37] : memref<8x8x512xf32, #tpu.memory_space<vmem>>, vector<1x8x512xf32>
    %131 = vector.shape_cast %130 : vector<1x8x512xf32> to vector<8x512xf32>
    %c0_38 = arith.constant 0 : index
    %c0_39 = arith.constant 0 : index
    %132 = vector.load %arg3[%c0_38, %c0_39] : memref<128x512xf32, #tpu.memory_space<vmem>>, vector<128x512xf32>
    %cst_40 = arith.constant dense<0.000000e+00> : vector<8x512xf32>
    %133 = tpu.matmul %128, %132, %cst_40 {dimension_numbers = #tpu.dot_dimension_numbers<[1], [0], [0], [1], [0, 0, 1, 1], [], []>} : vector<8x128xf32>, vector<128x512xf32>, vector<8x512xf32> -> vector<8x512xf32>
    %134 = arith.addf %131, %133 : vector<8x512xf32>
    %135 = vector.extract_strided_slice %134 {offsets = [0, 0], sizes = [8, 128], strides = [1, 1]} : vector<8x512xf32> to vector<8x128xf32>
    %136 = arith.negf %135 : vector<8x128xf32>
    %137 = math.exp %136 : vector<8x128xf32>
    %cst_41 = arith.constant 1.000000e+00 : f32
    %138 = vector.broadcast %cst_41 : f32 to vector<8x128xf32>
    %139 = arith.addf %138, %137 : vector<8x128xf32>
    %140 = arith.divf %138, %139 : vector<8x128xf32>
    %141 = vector.extract_strided_slice %134 {offsets = [0, 128], sizes = [8, 128], strides = [1, 1]} : vector<8x512xf32> to vector<8x128xf32>
    %142 = arith.negf %141 : vector<8x128xf32>
    %143 = math.exp %142 : vector<8x128xf32>
    %cst_42 = arith.constant 1.000000e+00 : f32
    %144 = vector.broadcast %cst_42 : f32 to vector<8x128xf32>
    %145 = arith.addf %144, %143 : vector<8x128xf32>
    %146 = arith.divf %144, %145 : vector<8x128xf32>
    %147 = vector.extract_strided_slice %134 {offsets = [0, 256], sizes = [8, 128], strides = [1, 1]} : vector<8x512xf32> to vector<8x128xf32>
    %148 = math.tanh %147 : vector<8x128xf32>
    %149 = vector.extract_strided_slice %134 {offsets = [0, 384], sizes = [8, 128], strides = [1, 1]} : vector<8x512xf32> to vector<8x128xf32>
    %150 = arith.negf %149 : vector<8x128xf32>
    %151 = math.exp %150 : vector<8x128xf32>
    %cst_43 = arith.constant 1.000000e+00 : f32
    %152 = vector.broadcast %cst_43 : f32 to vector<8x128xf32>
    %153 = arith.addf %152, %151 : vector<8x128xf32>
    %154 = arith.divf %152, %153 : vector<8x128xf32>
    %155 = arith.mulf %146, %126 : vector<8x128xf32>
    %156 = arith.mulf %140, %148 : vector<8x128xf32>
    %157 = arith.addf %155, %156 : vector<8x128xf32>
    %158 = math.tanh %157 : vector<8x128xf32>
    %159 = arith.mulf %154, %158 : vector<8x128xf32>
    %c5_i32 = arith.constant 5 : i32
    %160 = arith.index_cast %c5_i32 : i32 to index
    %c0_44 = arith.constant 0 : index
    %c0_45 = arith.constant 0 : index
    %161 = vector.load %arg2[%160, %c0_44, %c0_45] : memref<8x8x512xf32, #tpu.memory_space<vmem>>, vector<1x8x512xf32>
    %162 = vector.shape_cast %161 : vector<1x8x512xf32> to vector<8x512xf32>
    %c0_46 = arith.constant 0 : index
    %c0_47 = arith.constant 0 : index
    %163 = vector.load %arg3[%c0_46, %c0_47] : memref<128x512xf32, #tpu.memory_space<vmem>>, vector<128x512xf32>
    %cst_48 = arith.constant dense<0.000000e+00> : vector<8x512xf32>
    %164 = tpu.matmul %159, %163, %cst_48 {dimension_numbers = #tpu.dot_dimension_numbers<[1], [0], [0], [1], [0, 0, 1, 1], [], []>} : vector<8x128xf32>, vector<128x512xf32>, vector<8x512xf32> -> vector<8x512xf32>
    %165 = arith.addf %162, %164 : vector<8x512xf32>
    %166 = vector.extract_strided_slice %165 {offsets = [0, 0], sizes = [8, 128], strides = [1, 1]} : vector<8x512xf32> to vector<8x128xf32>
    %167 = arith.negf %166 : vector<8x128xf32>
    %168 = math.exp %167 : vector<8x128xf32>
    %cst_49 = arith.constant 1.000000e+00 : f32
    %169 = vector.broadcast %cst_49 : f32 to vector<8x128xf32>
    %170 = arith.addf %169, %168 : vector<8x128xf32>
    %171 = arith.divf %169, %170 : vector<8x128xf32>
    %172 = vector.extract_strided_slice %165 {offsets = [0, 128], sizes = [8, 128], strides = [1, 1]} : vector<8x512xf32> to vector<8x128xf32>
    %173 = arith.negf %172 : vector<8x128xf32>
    %174 = math.exp %173 : vector<8x128xf32>
    %cst_50 = arith.constant 1.000000e+00 : f32
    %175 = vector.broadcast %cst_50 : f32 to vector<8x128xf32>
    %176 = arith.addf %175, %174 : vector<8x128xf32>
    %177 = arith.divf %175, %176 : vector<8x128xf32>
    %178 = vector.extract_strided_slice %165 {offsets = [0, 256], sizes = [8, 128], strides = [1, 1]} : vector<8x512xf32> to vector<8x128xf32>
    %179 = math.tanh %178 : vector<8x128xf32>
    %180 = vector.extract_strided_slice %165 {offsets = [0, 384], sizes = [8, 128], strides = [1, 1]} : vector<8x512xf32> to vector<8x128xf32>
    %181 = arith.negf %180 : vector<8x128xf32>
    %182 = math.exp %181 : vector<8x128xf32>
    %cst_51 = arith.constant 1.000000e+00 : f32
    %183 = vector.broadcast %cst_51 : f32 to vector<8x128xf32>
    %184 = arith.addf %183, %182 : vector<8x128xf32>
    %185 = arith.divf %183, %184 : vector<8x128xf32>
    %186 = arith.mulf %177, %157 : vector<8x128xf32>
    %187 = arith.mulf %171, %179 : vector<8x128xf32>
    %188 = arith.addf %186, %187 : vector<8x128xf32>
    %189 = math.tanh %188 : vector<8x128xf32>
    %190 = arith.mulf %185, %189 : vector<8x128xf32>
    %c6_i32 = arith.constant 6 : i32
    %191 = arith.index_cast %c6_i32 : i32 to index
    %c0_52 = arith.constant 0 : index
    %c0_53 = arith.constant 0 : index
    %192 = vector.load %arg2[%191, %c0_52, %c0_53] : memref<8x8x512xf32, #tpu.memory_space<vmem>>, vector<1x8x512xf32>
    %193 = vector.shape_cast %192 : vector<1x8x512xf32> to vector<8x512xf32>
    %c0_54 = arith.constant 0 : index
    %c0_55 = arith.constant 0 : index
    %194 = vector.load %arg3[%c0_54, %c0_55] : memref<128x512xf32, #tpu.memory_space<vmem>>, vector<128x512xf32>
    %cst_56 = arith.constant dense<0.000000e+00> : vector<8x512xf32>
    %195 = tpu.matmul %190, %194, %cst_56 {dimension_numbers = #tpu.dot_dimension_numbers<[1], [0], [0], [1], [0, 0, 1, 1], [], []>} : vector<8x128xf32>, vector<128x512xf32>, vector<8x512xf32> -> vector<8x512xf32>
    %196 = arith.addf %193, %195 : vector<8x512xf32>
    %197 = vector.extract_strided_slice %196 {offsets = [0, 0], sizes = [8, 128], strides = [1, 1]} : vector<8x512xf32> to vector<8x128xf32>
    %198 = arith.negf %197 : vector<8x128xf32>
    %199 = math.exp %198 : vector<8x128xf32>
    %cst_57 = arith.constant 1.000000e+00 : f32
    %200 = vector.broadcast %cst_57 : f32 to vector<8x128xf32>
    %201 = arith.addf %200, %199 : vector<8x128xf32>
    %202 = arith.divf %200, %201 : vector<8x128xf32>
    %203 = vector.extract_strided_slice %196 {offsets = [0, 128], sizes = [8, 128], strides = [1, 1]} : vector<8x512xf32> to vector<8x128xf32>
    %204 = arith.negf %203 : vector<8x128xf32>
    %205 = math.exp %204 : vector<8x128xf32>
    %cst_58 = arith.constant 1.000000e+00 : f32
    %206 = vector.broadcast %cst_58 : f32 to vector<8x128xf32>
    %207 = arith.addf %206, %205 : vector<8x128xf32>
    %208 = arith.divf %206, %207 : vector<8x128xf32>
    %209 = vector.extract_strided_slice %196 {offsets = [0, 256], sizes = [8, 128], strides = [1, 1]} : vector<8x512xf32> to vector<8x128xf32>
    %210 = math.tanh %209 : vector<8x128xf32>
    %211 = vector.extract_strided_slice %196 {offsets = [0, 384], sizes = [8, 128], strides = [1, 1]} : vector<8x512xf32> to vector<8x128xf32>
    %212 = arith.negf %211 : vector<8x128xf32>
    %213 = math.exp %212 : vector<8x128xf32>
    %cst_59 = arith.constant 1.000000e+00 : f32
    %214 = vector.broadcast %cst_59 : f32 to vector<8x128xf32>
    %215 = arith.addf %214, %213 : vector<8x128xf32>
    %216 = arith.divf %214, %215 : vector<8x128xf32>
    %217 = arith.mulf %208, %188 : vector<8x128xf32>
    %218 = arith.mulf %202, %210 : vector<8x128xf32>
    %219 = arith.addf %217, %218 : vector<8x128xf32>
    %220 = math.tanh %219 : vector<8x128xf32>
    %221 = arith.mulf %216, %220 : vector<8x128xf32>
    %c7_i32 = arith.constant 7 : i32
    %222 = arith.index_cast %c7_i32 : i32 to index
    %c0_60 = arith.constant 0 : index
    %c0_61 = arith.constant 0 : index
    %223 = vector.load %arg2[%222, %c0_60, %c0_61] : memref<8x8x512xf32, #tpu.memory_space<vmem>>, vector<1x8x512xf32>
    %224 = vector.shape_cast %223 : vector<1x8x512xf32> to vector<8x512xf32>
    %c0_62 = arith.constant 0 : index
    %c0_63 = arith.constant 0 : index
    %225 = vector.load %arg3[%c0_62, %c0_63] : memref<128x512xf32, #tpu.memory_space<vmem>>, vector<128x512xf32>
    %cst_64 = arith.constant dense<0.000000e+00> : vector<8x512xf32>
    %226 = tpu.matmul %221, %225, %cst_64 {dimension_numbers = #tpu.dot_dimension_numbers<[1], [0], [0], [1], [0, 0, 1, 1], [], []>} : vector<8x128xf32>, vector<128x512xf32>, vector<8x512xf32> -> vector<8x512xf32>
    %227 = arith.addf %224, %226 : vector<8x512xf32>
    %228 = vector.extract_strided_slice %227 {offsets = [0, 0], sizes = [8, 128], strides = [1, 1]} : vector<8x512xf32> to vector<8x128xf32>
    %229 = arith.negf %228 : vector<8x128xf32>
    %230 = math.exp %229 : vector<8x128xf32>
    %cst_65 = arith.constant 1.000000e+00 : f32
    %231 = vector.broadcast %cst_65 : f32 to vector<8x128xf32>
    %232 = arith.addf %231, %230 : vector<8x128xf32>
    %233 = arith.divf %231, %232 : vector<8x128xf32>
    %234 = vector.extract_strided_slice %227 {offsets = [0, 128], sizes = [8, 128], strides = [1, 1]} : vector<8x512xf32> to vector<8x128xf32>
    %235 = arith.negf %234 : vector<8x128xf32>
    %236 = math.exp %235 : vector<8x128xf32>
    %cst_66 = arith.constant 1.000000e+00 : f32
    %237 = vector.broadcast %cst_66 : f32 to vector<8x128xf32>
    %238 = arith.addf %237, %236 : vector<8x128xf32>
    %239 = arith.divf %237, %238 : vector<8x128xf32>
    %240 = vector.extract_strided_slice %227 {offsets = [0, 256], sizes = [8, 128], strides = [1, 1]} : vector<8x512xf32> to vector<8x128xf32>
    %241 = math.tanh %240 : vector<8x128xf32>
    %242 = vector.extract_strided_slice %227 {offsets = [0, 384], sizes = [8, 128], strides = [1, 1]} : vector<8x512xf32> to vector<8x128xf32>
    %243 = arith.negf %242 : vector<8x128xf32>
    %244 = math.exp %243 : vector<8x128xf32>
    %cst_67 = arith.constant 1.000000e+00 : f32
    %245 = vector.broadcast %cst_67 : f32 to vector<8x128xf32>
    %246 = arith.addf %245, %244 : vector<8x128xf32>
    %247 = arith.divf %245, %246 : vector<8x128xf32>
    %248 = arith.mulf %239, %219 : vector<8x128xf32>
    %249 = arith.mulf %233, %241 : vector<8x128xf32>
    %250 = arith.addf %248, %249 : vector<8x128xf32>
    %251 = math.tanh %250 : vector<8x128xf32>
    %252 = arith.mulf %247, %251 : vector<8x128xf32>
    %c8_i32 = arith.constant 8 : i32
    %c0_68 = arith.constant 0 : index
    %c0_69 = arith.constant 0 : index
    %253 = vector.load %arg7[%c0_68, %c0_69] : memref<8x128xf32, #tpu.memory_space<vmem>>, vector<8x128xf32>
    tpu.vector_store %arg7[%c0_68, %c0_69], %252 {strides = array<i32>} : memref<8x128xf32, #tpu.memory_space<vmem>>, vector<8x128xf32>,
    %c0_70 = arith.constant 0 : index
    %c0_71 = arith.constant 0 : index
    %254 = vector.load %arg8[%c0_70, %c0_71] : memref<8x128xf32, #tpu.memory_space<vmem>>, vector<8x128xf32>
    tpu.vector_store %arg8[%c0_70, %c0_71], %250 {strides = array<i32>} : memref<8x128xf32, #tpu.memory_space<vmem>>, vector<8x128xf32>,
    %c0_i32_72 = arith.constant 0 : i32
    %255 = arith.cmpi eq, %arg1, %c0_i32_72 : i32
    %256 = arith.extui %255 : i1 to i32
    %c0_i32_73 = arith.constant 0 : i32
    %257 = arith.cmpi ne, %256, %c0_i32_73 : i32
    scf.if %257 {
      %c0_74 = arith.constant 0 : index
      %c0_75 = arith.constant 0 : index
      %258 = vector.load %arg4[%c0_74, %c0_75] : memref<128x128xf32, #tpu.memory_space<vmem>>, vector<128x128xf32>
      %cst_76 = arith.constant dense<0.000000e+00> : vector<8x128xf32>
      %259 = tpu.matmul %252, %258, %cst_76 {dimension_numbers = #tpu.dot_dimension_numbers<[1], [0], [0], [1], [0, 0, 1, 1], [], []>} : vector<8x128xf32>, vector<128x128xf32>, vector<8x128xf32> -> vector<8x128xf32>
      %c0_77 = arith.constant 0 : index
      %c0_78 = arith.constant 0 : index
      %260 = vector.load %arg5[%c0_77, %c0_78] : memref<1x128xf32, #tpu.memory_space<vmem>>, vector<1x128xf32>
      %261 = vector.broadcast %260 : vector<1x128xf32> to vector<8x128xf32>
      %262 = arith.addf %259, %261 : vector<8x128xf32>
      %c0_79 = arith.constant 0 : index
      %c0_80 = arith.constant 0 : index
      %263 = vector.load %arg6[%c0_79, %c0_80] : memref<8x128xf32, #tpu.memory_space<vmem>>, vector<8x128xf32>
      tpu.vector_store %arg6[%c0_79, %c0_80], %262 {strides = array<i32>} : memref<8x128xf32, #tpu.memory_space<vmem>>, vector<8x128xf32>,
    } else {
    }
    return
  }
  func.func @transform_0(%arg0: i32, %arg1: i32) -> (i32, i32, i32) {
    %c0_i32 = arith.constant 0 : i32
    %c0_i32_0 = arith.constant 0 : i32
    return %arg1, %arg0, %c0_i32 : i32, i32, i32
  }
  func.func @transform_1(%arg0: i32, %arg1: i32) -> (i32, i32) {
    %c0_i32 = arith.constant 0 : i32
    %c0_i32_0 = arith.constant 0 : i32
    %c0_i32_1 = arith.constant 0 : i32
    return %c0_i32, %c0_i32_0 : i32, i32
  }
  func.func @transform_2(%arg0: i32, %arg1: i32) -> (i32, i32) {
    %c0_i32 = arith.constant 0 : i32
    %c0_i32_0 = arith.constant 0 : i32
    %c0_i32_1 = arith.constant 0 : i32
    return %c0_i32, %c0_i32_0 : i32, i32
  }
  func.func @transform_3(%arg0: i32, %arg1: i32) -> (i32, i32) {
    %c0_i32 = arith.constant 0 : i32
    %c0_i32_0 = arith.constant 0 : i32
    %c0_i32_1 = arith.constant 0 : i32
    return %c0_i32, %c0_i32_0 : i32, i32
  }
  func.func @transform_4(%arg0: i32, %arg1: i32) -> (i32, i32) {
    %c0_i32 = arith.constant 0 : i32
    %c0_i32_0 = arith.constant 0 : i32
    return %arg0, %c0_i32 : i32, i32
  }
}

</mosaic_0001>

<bundles_post_ra>
// kernel: lstm_model_forward.4
= control target key start
LH: loop header
LB: loop body
LE: loop exit
PB: predicated region body
PF: predicated region fallthrough
CT: control target
= control target key end

     0   :  { %8 = vsyncpa [#allocation3], 0  ;;  %s730_s0 = inlined_call_operand.hbm [shape: f32[64,128], index: 0, kind: input, shape index: {}]   ;;  %s731_s1 = inlined_call_operand.hbm [shape: f32[128,512], index: 1, kind: input, shape index: {}]   ;;  %s732_s2 = inlined_call_operand.hbm [shape: f32[1,512], index: 2, kind: input, shape index: {}]   ;;  %s733_s3 = inlined_call_operand.hbm [shape: f32[64,512], index: 3, kind: output, shape index: {}]  }
   0x1   :  { %9 = vsyncpa [#allocation6], 0 }
   0x2   :  { %10 = vsyncpa [#allocation4], 0  ;;  %s591_s12 = smov [#allocation5]   ;;  %s497_s16 = scalar_lea.hbm %s731_s1, 8192 }
   0x3   :  { %s28_s13 = sshll.u32 %s591_s12, 4  ;;  %p498_p0 = scmp.ne.s32.totalorder %s731_s1, %s497_s16  ;;  %s29_s13 = int_to_ptr.vmem [resolvable:$true] %s28_s13 }
   0x4   :  { %p501_p1 = scmp.lt.u32.totalorder %s497_s16, %s731_s1 }
   0x6   :  { %p503_p2 = pnand %p501_p1, %p498_p0 }
   0x8   :  { %506 = shalt.err (!%p503_p2)
}
   0x9   :  { %s507_s21 = scalar_lea.vmem %s29_s13, 8192  ;;  %p512_p4 = scmp.lt.s32.totalorder %s29_s13, %s29_s13 }
   0xa   :  { %p508_p3 = scmp.ne.s32.totalorder %s29_s13, %s507_s21  ;;  %p513_p5 = scmp.lt.s32.totalorder %s507_s21, %s507_s21 }
   0xc   :  { %p514_p6 = por %p513_p5, %p512_p4 }
   0xe   :  { %p515_p7 = pnand %p514_p6, %p508_p3 }
  0x10   :  { %518 = shalt.err (!%p515_p7)
}
  0x11   :  { %s592_s22 = smov 512   ;;  %s593_s23 = smov 32  }
  0x12   :  { %34 = dma.hbm_to_vmem [thread:$0]  %s731_s1, 8192, %s29_s13, [#allocation6], %s592_s22, %s592_s22, %s593_s23  }
  0x13   :  { %s594_s26 = smov [#allocation2]   ;;  %s519_s30 = scalar_lea.hbm %s730_s0, 1024 }
  0x14   :  { %s16_s27 = sshll.u32 %s594_s26, 4  ;;  %p520_p8 = scmp.ne.s32.totalorder %s730_s0, %s519_s30  ;;  %s17_s27 = int_to_ptr.vmem [resolvable:$true] %s16_s27 }
  0x15   :  { %p523_p9 = scmp.lt.u32.totalorder %s519_s30, %s730_s0 }
  0x17   :  { %p525_p10 = pnand %p523_p9, %p520_p8 }
  0x19   :  { %528 = shalt.err (!%p525_p10)
}
  0x1a   :  { %s529_s8 = scalar_lea.vmem %s17_s27, 1024  ;;  %p534_p12 = scmp.lt.s32.totalorder %s17_s27, %s17_s27 }
  0x1b   :  { %p530_p11 = scmp.ne.s32.totalorder %s17_s27, %s529_s8  ;;  %p535_p13 = scmp.lt.s32.totalorder %s529_s8, %s529_s8 }
  0x1d   :  { %p536_p0 = por %p535_p13, %p534_p12 }
  0x1f   :  { %p537_p1 = pnand %p536_p0, %p530_p11 }
  0x21   :  { %540 = shalt.err (!%p537_p1)
}
  0x22   :  { %s595_s1 = smov 128   ;;  %s596_s9 = smov 8  }
  0x23   :  { %22 = dma.hbm_to_vmem [thread:$0]  %s730_s0, 1024, %s17_s27, [#allocation3], %s595_s1, %s595_s1, %s596_s9  }
  0x24   :  { %s597_s12 = smov [#allocation7]   ;;  %s541_s16 = scalar_lea.hbm %s732_s2, 64 }
  0x25   :  { %s41_s13 = sshll.u32 %s597_s12, 4  ;;  %p542_p2 = scmp.ne.s32.totalorder %s732_s2, %s541_s16  ;;  %s42_s13 = int_to_ptr.vmem [resolvable:$true] %s41_s13 }
  0x26   :  { %p545_p3 = scmp.lt.u32.totalorder %s541_s16, %s732_s2 }
  0x28   :  { %p547_p4 = pnand %p545_p3, %p542_p2 }
  0x2a   :  { %550 = shalt.err (!%p547_p4)
}
  0x2b   :  { %s551_s21 = scalar_lea.vmem %s42_s13, 64  ;;  %p556_p6 = scmp.lt.s32.totalorder %s42_s13, %s42_s13 }
  0x2c   :  { %p552_p5 = scmp.ne.s32.totalorder %s42_s13, %s551_s21  ;;  %p557_p7 = scmp.lt.s32.totalorder %s551_s21, %s551_s21 }
  0x2e   :  { %p558_p8 = por %p557_p7, %p556_p6 }
  0x30   :  { %p559_p9 = pnand %p558_p8, %p552_p5 }
  0x32   :  { %562 = shalt.err (!%p559_p9)
}
  0x33   :  { %44 = dma.hbm_to_vmem [thread:$0]  %s732_s2, 64, %s42_s13, [#allocation6]  }
  0x34   :  { %585 = dma.done.wait [#allocation3], 1024  }
  0x35   :  { %586 = vsyncadd [#allocation3], 4294966272 }
  0x36   :  { %587 = dma.done.wait [#allocation6], 8256  }
  0x37   :  { %588 = vsyncadd [#allocation6], 4294959040  ;;  %v598_v0 = vmov 0.0   ;;  %v63_v1 = vld [vmem:[#allocation5 + $0x8] sm:$0xff]  ;;  %v65_v3 = vld [vmem:[#allocation5 + $0x18] sm:$0xff]  ;;  %s599_s2 = smov [#allocation8]  }
  0x38   :  { %212 = vmatprep.mubr.f32.mxu0 %v598_v0  ;;  %325 = vmatprep.mubr.f32.mxu1 %v598_v0  ;;  %v67_v2 = vld [vmem:[#allocation5 + $0x28] sm:$0xff]  ;;  %v69_v5 = vld [vmem:[#allocation5 + $0x38] sm:$0xff]  ;;  %v62_v6 = vld [vmem:[#allocation5] sm:$0xff]  ;;  %s411_s25 = sshll.u32 %s599_s2, 4  ;;  %s412_s25 = int_to_ptr.vmem [resolvable:$true] %s411_s25 }
  0x39   :  { %v424_v4 = vpack.c.bf16 %v67_v2, %v63_v1  ;;  %v66_v7 = vld [vmem:[#allocation5 + $0x20] sm:$0xff]  ;;  %v456_v8 = vpack.c.bf16 %v69_v5, %v65_v3  ;;  %v64_v10 = vld [vmem:[#allocation5 + $0x10] sm:$0xff]  ;;  %v71_v12 = vld [vmem:[#allocation5 + $0x48] sm:$0xff]  ;;  %s563_s26 = scalar_lea.vmem %s412_s25, 4096  ;;  %p568_p11 = scmp.lt.s32.totalorder %s412_s25, %s412_s25 }
  0x3a   :  { %v426_v9 = vpack.c.bf16 %v66_v7, %v62_v6  ;;  %v68_v11 = vld [vmem:[#allocation5 + $0x30] sm:$0xff]  ;;  %v75_v14 = vld [vmem:[#allocation5 + $0x68] sm:$0xff]  ;;  %v73_v15 = vld [vmem:[#allocation5 + $0x58] sm:$0xff]  ;;  %p564_p10 = scmp.ne.s32.totalorder %s412_s25, %s563_s26  ;;  %p569_p12 = scmp.lt.s32.totalorder %s563_s26, %s563_s26 }
  0x3b   :  { %425 = vmatprep.subr.bf16.mxu0 %v424_v4  ;;  %v458_v13 = vpack.c.bf16 %v68_v11, %v64_v10  ;;  %v77_v16 = vld [vmem:[#allocation5 + $0x78] sm:$0xff]  ;;  %457 = vmatprep.subr.bf16.mxu1 %v456_v8  ;;  %v428_v17 = vpack.c.bf16 %v75_v14, %v71_v12  ;;  %v70_v19 = vld [vmem:[#allocation5 + $0x40] sm:$0xff]  ;;  %v72_v21 = vld [vmem:[#allocation5 + $0x50] sm:$0xff] }
  0x3c   :  { %427 = vmatpush1.bf16.msra.mxu0 %v426_v9  ;;  %v460_v18 = vpack.c.bf16 %v77_v16, %v73_v15  ;;  %v74_v20 = vld [vmem:[#allocation5 + $0x60] sm:$0xff]  ;;  %v76_v23 = vld [vmem:[#allocation5 + $0x70] sm:$0xff]  ;;  %v79_v24 = vld [vmem:[#allocation5 + $0x88] sm:$0xff]  ;;  %p570_p13 = por %p569_p12, %p568_p11 }
  0x3d   :  { %459 = vmatpush1.bf16.msra.mxu1 %v458_v13  ;;  %v430_v22 = vpack.c.bf16 %v74_v20, %v70_v19  ;;  %v83_v25 = vld [vmem:[#allocation5 + $0xa8] sm:$0xff]  ;;  %429 = vmatprep.subr.bf16.mxu0 %v428_v17  ;;  %v462_v26 = vpack.c.bf16 %v76_v23, %v72_v21  ;;  %v81_v28 = vld [vmem:[#allocation5 + $0x98] sm:$0xff]  ;;  %v78_v30 = vld [vmem:[#allocation5 + $0x80] sm:$0xff] }
  0x3e   :  { %461 = vmatprep.subr.bf16.mxu1 %v460_v18  ;;  %v432_v27 = vpack.c.bf16 %v83_v25, %v79_v24  ;;  %v85_v29 = vld [vmem:[#allocation5 + $0xb8] sm:$0xff]  ;;  %v82_v32 = vld [vmem:[#allocation5 + $0xa0] sm:$0xff]  ;;  %v80_v33 = vld [vmem:[#allocation5 + $0x90] sm:$0xff]  ;;  %p571_p0 = pnand %p570_p13, %p564_p10 }
  0x3f   :  { %v464_v31 = vpack.c.bf16 %v85_v29, %v81_v28  ;;  %v84_v34 = vld [vmem:[#allocation5 + $0xb0] sm:$0xff]  ;;  %v434_v35 = vpack.c.bf16 %v82_v32, %v78_v30  ;;  %v87_v36 = vld [vmem:[#allocation5 + $0xc8] sm:$0xff]  ;;  %v89_v38 = vld [vmem:[#allocation5 + $0xd8] sm:$0xff] }
  0x40   :  { %431 = vmatpush1.bf16.msra.mxu0 %v430_v22  ;;  %v91_v37 = vld [vmem:[#allocation5 + $0xe8] sm:$0xff]  ;;  %v466_v39 = vpack.c.bf16 %v84_v34, %v80_v33  ;;  %v93_v41 = vld [vmem:[#allocation5 + $0xf8] sm:$0xff]  ;;  %v86_v42 = vld [vmem:[#allocation5 + $0xc0] sm:$0xff] }
  0x41   :  { %463 = vmatpush1.bf16.msra.mxu1 %v462_v26  ;;  %433 = vmatprep.subr.bf16.mxu0 %v432_v27  ;;  %v436_v40 = vpack.c.bf16 %v91_v37, %v87_v36  ;;  %v90_v43 = vld [vmem:[#allocation5 + $0xe0] sm:$0xff]  ;;  %v468_v44 = vpack.c.bf16 %v93_v41, %v89_v38  ;;  %v88_v45 = vld [vmem:[#allocation5 + $0xd0] sm:$0xff]  ;;  %v95_v47 = vld [vmem:[#allocation5 + $0x108] sm:$0xff] }
  0x42   :  { %465 = vmatprep.subr.bf16.mxu1 %v464_v31  ;;  %v92_v46 = vld [vmem:[#allocation5 + $0xf0] sm:$0xff]  ;;  %v99_v48 = vld [vmem:[#allocation5 + $0x128] sm:$0xff]  ;;  %v97_v49 = vld [vmem:[#allocation5 + $0x118] sm:$0xff]  ;;  %v438_v51 = vpack.c.bf16 %v90_v43, %v86_v42  ;;  %v128_v42 = vlaneseq }
  0x43   :  { %v101_v50 = vld [vmem:[#allocation5 + $0x138] sm:$0xff]  ;;  %v470_v52 = vpack.c.bf16 %v92_v46, %v88_v45  ;;  %v440_v53 = vpack.c.bf16 %v99_v48, %v95_v47  ;;  %v94_v54 = vld [vmem:[#allocation5 + $0x100] sm:$0xff]  ;;  %v96_v56 = vld [vmem:[#allocation5 + $0x110] sm:$0xff] }
  0x44   :  { %435 = vmatpush1.bf16.msra.mxu0 %v434_v35  ;;  %v98_v55 = vld [vmem:[#allocation5 + $0x120] sm:$0xff]  ;;  %v472_v57 = vpack.c.bf16 %v101_v50, %v97_v49  ;;  %v100_v58 = vld [vmem:[#allocation5 + $0x130] sm:$0xff]  ;;  %v103_v59 = vld [vmem:[#allocation5 + $0x148] sm:$0xff]  ;;  %v129_v43 = vshrl.u32 %v128_v42, 7 }
  0x45   :  { %467 = vmatpush1.bf16.msra.mxu1 %v466_v39  ;;  %437 = vmatprep.subr.bf16.mxu0 %v436_v40  ;;  %v107_v60 = vld [vmem:[#allocation5 + $0x168] sm:$0xff]  ;;  %v105_v61 = vld [vmem:[#allocation5 + $0x158] sm:$0xff]  ;;  %v442_v63 = vpack.c.bf16 %v98_v55, %v94_v54  ;;  %v474_v1 = vpack.c.bf16 %v100_v58, %v96_v56  ;;  %v102_v3 = vld [vmem:[#allocation5 + $0x140] sm:$0xff] }
  0x46   :  { %469 = vmatprep.subr.bf16.mxu1 %v468_v44  ;;  %v109_v62 = vld [vmem:[#allocation5 + $0x178] sm:$0xff]  ;;  %v444_v2 = vpack.c.bf16 %v107_v60, %v103_v59  ;;  %v106_v4 = vld [vmem:[#allocation5 + $0x160] sm:$0xff]  ;;  %v104_v5 = vld [vmem:[#allocation5 + $0x150] sm:$0xff]  ;;  %v130_v44 = vsub.s32 0, %v129_v43  ;;  %v138_v46 = vsub.s32 2, %v129_v43  ;;  %v134_v47 = vsub.s32 1, %v129_v43 }
  0x47   :  { %v476_v6 = vpack.c.bf16 %v109_v62, %v105_v61  ;;  %v108_v7 = vld [vmem:[#allocation5 + $0x170] sm:$0xff]  ;;  %v111_v8 = vld [vmem:[#allocation5 + $0x188] sm:$0xff]  ;;  %v113_v10 = vld [vmem:[#allocation5 + $0x198] sm:$0xff]  ;;  %v446_v12 = vpack.c.bf16 %v106_v4, %v102_v3  ;;  %v142_v48 = vsub.s32 3, %v129_v43 }
  0x48   :  { %439 = vmatpush1.bf16.msra.mxu0 %v438_v51  ;;  %v115_v9 = vld [vmem:[#allocation5 + $0x1a8] sm:$0xff]  ;;  %v117_v11 = vld [vmem:[#allocation5 + $0x1b8] sm:$0xff]  ;;  %v478_v13 = vpack.c.bf16 %v108_v7, %v104_v5  ;;  %v110_v15 = vld [vmem:[#allocation5 + $0x180] sm:$0xff] }
  0x49   :  { %471 = vmatpush1.bf16.msra.mxu1 %v470_v52  ;;  %441 = vmatprep.subr.bf16.mxu0 %v440_v53  ;;  %v448_v14 = vpack.c.bf16 %v115_v9, %v111_v8  ;;  %v114_v16 = vld [vmem:[#allocation5 + $0x1a0] sm:$0xff]  ;;  %v112_v17 = vld [vmem:[#allocation5 + $0x190] sm:$0xff]  ;;  %v480_v18 = vpack.c.bf16 %v117_v11, %v113_v10  ;;  %v119_v20 = vld [vmem:[#allocation5 + $0x1c8] sm:$0xff] }
  0x4a   :  { %473 = vmatprep.subr.bf16.mxu1 %v472_v57  ;;  %v116_v19 = vld [vmem:[#allocation5 + $0x1b0] sm:$0xff]  ;;  %v123_v21 = vld [vmem:[#allocation5 + $0x1e8] sm:$0xff]  ;;  %v121_v22 = vld [vmem:[#allocation5 + $0x1d8] sm:$0xff]  ;;  %v450_v24 = vpack.c.bf16 %v114_v16, %v110_v15 }
  0x4b   :  { %v125_v23 = vld [vmem:[#allocation5 + $0x1f8] sm:$0xff]  ;;  %v482_v25 = vpack.c.bf16 %v116_v19, %v112_v17  ;;  %v452_v26 = vpack.c.bf16 %v123_v21, %v119_v20  ;;  %v118_v27 = vld [vmem:[#allocation5 + $0x1c0] sm:$0xff]  ;;  %v120_v30 = vld [vmem:[#allocation5 + $0x1d0] sm:$0xff] }
  0x4c   :  { %443 = vmatpush1.bf16.msra.mxu0 %v442_v63  ;;  %v122_v28 = vld [vmem:[#allocation5 + $0x1e0] sm:$0xff]  ;;  %v484_v29 = vpack.c.bf16 %v125_v23, %v121_v22  ;;  %v124_v31 = vld [vmem:[#allocation5 + $0x1f0] sm:$0xff]  ;;  %v55_v35 = vld [vmem:[#allocation2 + $0x8] sm:$0xff] }
  0x4d   :  { %475 = vmatpush1.bf16.msra.mxu1 %v474_v1  ;;  %445 = vmatprep.subr.bf16.mxu0 %v444_v2  ;;  %v454_v32 = vpack.c.bf16 %v122_v28, %v118_v27  ;;  %v486_v33 = vpack.c.bf16 %v124_v31, %v120_v30  ;;  %v54_v34 = vld [vmem:[#allocation2] sm:$0xff]  ;;  %v56_v36 = vld [vmem:[#allocation2 + $0x10] sm:$0xff]  ;;  %v57_v37 = vld [vmem:[#allocation2 + $0x18] sm:$0xff] }
  0x4e   :  { %477 = vmatprep.subr.bf16.mxu1 %v476_v6  ;;  %v58_v38 = vld [vmem:[#allocation2 + $0x20] sm:$0xff]  ;;  %v59_v39 = vld [vmem:[#allocation2 + $0x28] sm:$0xff]  ;;  %v60_v40 = vld [vmem:[#allocation2 + $0x30] sm:$0xff] }
  0x4f   :  { %v61_v41 = vld [vmem:[#allocation2 + $0x38] sm:$0xff]  ;;  %v126_v45 = vld [vmem:[#allocation7] sm:$0xf] }
  0x50   :  { %447 = vmatpush1.bf16.msra.mxu0 %v446_v12  ;;  %v675_v49 = vrot.slane %v126_v45, %v130_v44  ;;  %v677_v50 = vrot.slane %v126_v45, %v138_v46  ;;  %v679_v51 = vrot.slane %v126_v45, %v134_v47  ;;  %v681_v52 = vrot.slane %v126_v45, %v142_v48 }
  0x51   :  { %479 = vmatpush1.bf16.msra.mxu1 %v478_v13  ;;  %449 = vmatprep.subr.bf16.mxu0 %v448_v14 }
  0x52   :  { %481 = vmatprep.subr.bf16.mxu1 %v480_v18 }
  0x54   :  { %451 = vmatpush1.bf16.msra.mxu0 %v450_v24 }
  0x55   :  { %483 = vmatpush1.bf16.msra.mxu1 %v482_v25  ;;  %453 = vmatprep.subr.bf16.mxu0 %v452_v26 }
  0x56   :  { %485 = vmatprep.subr.bf16.mxu1 %v484_v29 }
  0x58   :  { %455 = vmatpush1.bf16.msra.mxu0 %v454_v32 }
  0x59   :  { %487 = vmatpush1.bf16.msra.mxu1 %v486_v33 }
  0x5b   :  { %213 = vmatmul.mubr.f32.vlgmr.msra.gmra.mrb[0].mxu0 %v54_v34 }
  0x5c   :  { %326 = vmatmul.mubr.f32.vlgmr.msra.gmra.mrb[0].mxu1 %v54_v34  ;;  %218 = vmatprep.mubr.f32.mxu0 %v598_v0 }
  0x5d   :  { %331 = vmatprep.mubr.f32.mxu1 %v598_v0 }
  0x5f   :  { %219 = vmatmul.mubr.f32.gmra.mrb[2].mxu0 %v55_v35 }
  0x60   :  { %332 = vmatmul.mubr.f32.gmra.mrb[2].mxu1 %v55_v35  ;;  %224 = vmatprep.mubr.f32.mxu0 %v598_v0 }
  0x61   :  { %337 = vmatprep.mubr.f32.mxu1 %v598_v0 }
  0x63   :  { %225 = vmatmul.mubr.f32.gmra.mrb[4].mxu0 %v56_v36 }
  0x64   :  { %338 = vmatmul.mubr.f32.gmra.mrb[4].mxu1 %v56_v36  ;;  %230 = vmatprep.mubr.f32.mxu0 %v598_v0 }
  0x65   :  { %343 = vmatprep.mubr.f32.mxu1 %v598_v0 }
  0x67   :  { %231 = vmatmul.mubr.f32.gmra.mrb[6].mxu0 %v57_v37 }
  0x68   :  { %344 = vmatmul.mubr.f32.gmra.mrb[6].mxu1 %v57_v37  ;;  %236 = vmatprep.mubr.f32.mxu0 %v598_v0 }
  0x69   :  { %349 = vmatprep.mubr.f32.mxu1 %v598_v0 }
  0x6b   :  { %237 = vmatmul.mubr.f32.gmra.mrb[8].mxu0 %v58_v38 }
  0x6c   :  { %350 = vmatmul.mubr.f32.gmra.mrb[8].mxu1 %v58_v38  ;;  %242 = vmatprep.mubr.f32.mxu0 %v598_v0 }
  0x6d   :  { %355 = vmatprep.mubr.f32.mxu1 %v598_v0 }
  0x6f   :  { %243 = vmatmul.mubr.f32.gmra.mrb[10].mxu0 %v59_v39 }
  0x70   :  { %356 = vmatmul.mubr.f32.gmra.mrb[10].mxu1 %v59_v39  ;;  %248 = vmatprep.mubr.f32.mxu0 %v598_v0 }
  0x71   :  { %361 = vmatprep.mubr.f32.mxu1 %v598_v0 }
  0x73   :  { %249 = vmatmul.mubr.f32.gmra.mrb[12].mxu0 %v60_v40 }
  0x74   :  { %362 = vmatmul.mubr.f32.gmra.mrb[12].mxu1 %v60_v40  ;;  %254 = vmatprep.mubr.f32.mxu0 %v598_v0 }
  0x75   :  { %367 = vmatprep.mubr.f32.mxu1 %v598_v0 }
  0x77   :  { %255 = vmatmul.mubr.f32.gmra.mrb[14].mxu0 %v61_v41 }
  0x78   :  { %368 = vmatmul.mubr.f32.gmra.mrb[14].mxu1 %v61_v41 }
 0x12e   :  { %v214_v53 = vpop.f32.mrb[0].mxu0 }
 0x12f   :  { %v215_v0 = vadd.f32 %v214_v53, %v675_v49  ;;  %v327_v54 = vpop.f32.mrb[0].mxu1  ;;  %v216_v55 = vpop.f32.mrb[1].mxu0 }
 0x130   :  { %v328_v56 = vadd.f32 %v327_v54, %v677_v50  ;;  %v217_v57 = vadd.f32 %v216_v55, %v679_v51  ;;  %v329_v58 = vpop.f32.mrb[1].mxu1 }
 0x131   :  { %374 = vst [vmem:[#allocation8] sm:$0xff] %v215_v0  ;;  %v330_v59 = vadd.f32 %v329_v58, %v681_v52 }
 0x132   :  { %376 = vst [vmem:[#allocation8 + $0x10] sm:$0xff] %v328_v56  ;;  %375 = vst [vmem:[#allocation8 + $0x8] sm:$0xff] %v217_v57  ;;  %v220_v60 = vpop.f32.mrb[2].mxu0 }
 0x133   :  { %377 = vst [vmem:[#allocation8 + $0x18] sm:$0xff] %v330_v59  ;;  %v221_v61 = vadd.f32 %v220_v60, %v675_v49  ;;  %v333_v62 = vpop.f32.mrb[2].mxu1  ;;  %v222_v63 = vpop.f32.mrb[3].mxu0 }
 0x134   :  { %v334_v1 = vadd.f32 %v333_v62, %v677_v50  ;;  %v223_v2 = vadd.f32 %v222_v63, %v679_v51  ;;  %v335_v3 = vpop.f32.mrb[3].mxu1 }
 0x135   :  { %378 = vst [vmem:[#allocation8 + $0x20] sm:$0xff] %v221_v61  ;;  %v336_v4 = vadd.f32 %v335_v3, %v681_v52 }
 0x136   :  { %380 = vst [vmem:[#allocation8 + $0x30] sm:$0xff] %v334_v1  ;;  %379 = vst [vmem:[#allocation8 + $0x28] sm:$0xff] %v223_v2  ;;  %v226_v5 = vpop.f32.mrb[4].mxu0 }
 0x137   :  { %381 = vst [vmem:[#allocation8 + $0x38] sm:$0xff] %v336_v4  ;;  %v227_v6 = vadd.f32 %v226_v5, %v675_v49  ;;  %v339_v7 = vpop.f32.mrb[4].mxu1  ;;  %v228_v8 = vpop.f32.mrb[5].mxu0 }
 0x138   :  { %v340_v9 = vadd.f32 %v339_v7, %v677_v50  ;;  %v229_v10 = vadd.f32 %v228_v8, %v679_v51  ;;  %v341_v11 = vpop.f32.mrb[5].mxu1 }
 0x139   :  { %382 = vst [vmem:[#allocation8 + $0x40] sm:$0xff] %v227_v6  ;;  %v342_v12 = vadd.f32 %v341_v11, %v681_v52 }
 0x13a   :  { %384 = vst [vmem:[#allocation8 + $0x50] sm:$0xff] %v340_v9  ;;  %383 = vst [vmem:[#allocation8 + $0x48] sm:$0xff] %v229_v10  ;;  %v232_v13 = vpop.f32.mrb[6].mxu0 }
 0x13b   :  { %385 = vst [vmem:[#allocation8 + $0x58] sm:$0xff] %v342_v12  ;;  %v233_v14 = vadd.f32 %v232_v13, %v675_v49  ;;  %v345_v15 = vpop.f32.mrb[6].mxu1  ;;  %v234_v16 = vpop.f32.mrb[7].mxu0 }
 0x13c   :  { %v346_v17 = vadd.f32 %v345_v15, %v677_v50  ;;  %v235_v18 = vadd.f32 %v234_v16, %v679_v51  ;;  %v347_v19 = vpop.f32.mrb[7].mxu1 }
 0x13d   :  { %386 = vst [vmem:[#allocation8 + $0x60] sm:$0xff] %v233_v14  ;;  %v348_v20 = vadd.f32 %v347_v19, %v681_v52 }
 0x13e   :  { %388 = vst [vmem:[#allocation8 + $0x70] sm:$0xff] %v346_v17  ;;  %387 = vst [vmem:[#allocation8 + $0x68] sm:$0xff] %v235_v18  ;;  %v238_v21 = vpop.f32.mrb[8].mxu0 }
 0x13f   :  { %389 = vst [vmem:[#allocation8 + $0x78] sm:$0xff] %v348_v20  ;;  %v239_v22 = vadd.f32 %v238_v21, %v675_v49  ;;  %v351_v23 = vpop.f32.mrb[8].mxu1  ;;  %v240_v24 = vpop.f32.mrb[9].mxu0 }
 0x140   :  { %v352_v25 = vadd.f32 %v351_v23, %v677_v50  ;;  %v241_v26 = vadd.f32 %v240_v24, %v679_v51  ;;  %v353_v27 = vpop.f32.mrb[9].mxu1 }
 0x141   :  { %390 = vst [vmem:[#allocation8 + $0x80] sm:$0xff] %v239_v22  ;;  %v354_v28 = vadd.f32 %v353_v27, %v681_v52 }
 0x142   :  { %392 = vst [vmem:[#allocation8 + $0x90] sm:$0xff] %v352_v25  ;;  %391 = vst [vmem:[#allocation8 + $0x88] sm:$0xff] %v241_v26  ;;  %v244_v29 = vpop.f32.mrb[10].mxu0 }
 0x143   :  { %393 = vst [vmem:[#allocation8 + $0x98] sm:$0xff] %v354_v28  ;;  %v245_v30 = vadd.f32 %v244_v29, %v675_v49  ;;  %v357_v31 = vpop.f32.mrb[10].mxu1  ;;  %v246_v32 = vpop.f32.mrb[11].mxu0 }
 0x144   :  { %v358_v33 = vadd.f32 %v357_v31, %v677_v50  ;;  %v247_v34 = vadd.f32 %v246_v32, %v679_v51  ;;  %v359_v35 = vpop.f32.mrb[11].mxu1 }
 0x145   :  { %394 = vst [vmem:[#allocation8 + $0xa0] sm:$0xff] %v245_v30  ;;  %v360_v36 = vadd.f32 %v359_v35, %v681_v52 }
 0x146   :  { %396 = vst [vmem:[#allocation8 + $0xb0] sm:$0xff] %v358_v33  ;;  %395 = vst [vmem:[#allocation8 + $0xa8] sm:$0xff] %v247_v34  ;;  %v250_v37 = vpop.f32.mrb[12].mxu0 }
 0x147   :  { %397 = vst [vmem:[#allocation8 + $0xb8] sm:$0xff] %v360_v36  ;;  %v251_v38 = vadd.f32 %v250_v37, %v675_v49  ;;  %v363_v39 = vpop.f32.mrb[12].mxu1  ;;  %v252_v40 = vpop.f32.mrb[13].mxu0 }
 0x148   :  { %v364_v41 = vadd.f32 %v363_v39, %v677_v50  ;;  %v253_v42 = vadd.f32 %v252_v40, %v679_v51  ;;  %v365_v43 = vpop.f32.mrb[13].mxu1 }
 0x149   :  { %398 = vst [vmem:[#allocation8 + $0xc0] sm:$0xff] %v251_v38  ;;  %v366_v44 = vadd.f32 %v365_v43, %v681_v52 }
 0x14a   :  { %400 = vst [vmem:[#allocation8 + $0xd0] sm:$0xff] %v364_v41  ;;  %399 = vst [vmem:[#allocation8 + $0xc8] sm:$0xff] %v253_v42  ;;  %v256_v45 = vpop.f32.mrb[14].mxu0 }
 0x14b   :  { %401 = vst [vmem:[#allocation8 + $0xd8] sm:$0xff] %v366_v44  ;;  %v257_v46 = vadd.f32 %v256_v45, %v675_v49  ;;  %v369_v47 = vpop.f32.mrb[14].mxu1  ;;  %v258_v48 = vpop.f32.mrb[15].mxu0 }
 0x14c   :  { %v370_v53 = vadd.f32 %v369_v47, %v677_v50  ;;  %v259_v0 = vadd.f32 %v258_v48, %v679_v51  ;;  %v371_v54 = vpop.f32.mrb[15].mxu1 }
 0x14d   :  { %402 = vst [vmem:[#allocation8 + $0xe0] sm:$0xff] %v257_v46  ;;  %v372_v55 = vadd.f32 %v371_v54, %v681_v52 }
 0x14e   :  { %404 = vst [vmem:[#allocation8 + $0xf0] sm:$0xff] %v370_v53  ;;  %403 = vst [vmem:[#allocation8 + $0xe8] sm:$0xff] %v259_v0 }
 0x14f   :  { %405 = vst [vmem:[#allocation8 + $0xf8] sm:$0xff] %v372_v55 }
 0x150   :  { %574 = shalt.err (!%p571_p0)
}
 0x151   :  { %s575_s29 = scalar_lea.hbm %s733_s3, 4096 }
 0x152   :  { %p576_p1 = scmp.ne.s32.totalorder %s733_s3, %s575_s29  ;;  %p579_p2 = scmp.lt.u32.totalorder %s575_s29, %s733_s3 }
 0x154   :  { %p581_p3 = pnand %p579_p2, %p576_p1 }
 0x156   :  { %584 = shalt.err (!%p581_p3)
}
 0x157   :  { %417 = dma.vmem_to_hbm [thread:$0]  %s412_s25, 4096, %s733_s3, [#allocation4], %s592_s22, %s592_s22, %s593_s23  }
 0x158   :  { %589 = dma.done.wait [#allocation4], 4096  }
 0x159   :  { %590 = vsyncadd [#allocation4], 4294963200 }
 0x15a   :  { %421 = vsyncpa [#allocation3], 1 }
 0x15b   :  { %422 = vsyncpa [#allocation6], 1 }
 0x15c   :  { %423 = vsyncpa [#allocation4], 1 }

// kernel: lstm_model_forward.7
= control target key start
LH: loop header
LB: loop body
LE: loop exit
PB: predicated region body
PF: predicated region fallthrough
CT: control target
= control target key end

     0   :  { %9 = vsyncpa [#allocation5], 0  ;;  %s3000_s0 = inlined_call_operand.hbm [shape: f32[8,8,512], index: 0, kind: input, shape index: {}]   ;;  %s3001_s1 = inlined_call_operand.hbm [shape: f32[128,512], index: 1, kind: input, shape index: {}]   ;;  %s3002_s2 = inlined_call_operand.hbm [shape: f32[128,128], index: 2, kind: input, shape index: {}]   ;;  %s3003_s3 = inlined_call_operand.hbm [shape: f32[1,128], index: 3, kind: input, shape index: {}]   ;;  %s3004_s4 = inlined_call_operand.hbm [shape: f32[8,128], index: 4, kind: output, shape index: {}]  }
   0x1   :  { %10 = vsyncpa [#allocation8], 0 }
   0x2   :  { %11 = vsyncpa [#allocation11], 0 }
   0x3   :  { %12 = vsyncpa [#allocation6], 0  ;;  %s2529_s15 = smov [#allocation7]   ;;  %s2530_s17 = smov [#allocation4]  }
   0x4   :  { %s30_s16 = sshll.u32 %s2529_s15, 4  ;;  %s18_s18 = sshll.u32 %s2530_s17, 4  ;;  %s31_s16 = int_to_ptr.vmem [resolvable:$true] %s30_s16  ;;  %s2566_s18 = int_to_ptr.vmem [resolvable:$true] %s18_s18 }
   0x5   :  { %s2411_s21 = scalar_lea.hbm %s3001_s1, 8192 }
   0x6   :  { %p2412_p0 = scmp.ne.s32.totalorder %s3001_s1, %s2411_s21  ;;  %p2415_p1 = scmp.lt.u32.totalorder %s2411_s21, %s3001_s1 }
   0x8   :  { %p2417_p2 = pnand %p2415_p1, %p2412_p0 }
   0xa   :  { %2420 = shalt.err (!%p2417_p2)
}
   0xb   :  { %s2421_s26 = scalar_lea.vmem %s31_s16, 8192  ;;  %p2426_p4 = scmp.lt.s32.totalorder %s31_s16, %s31_s16 }
   0xc   :  { %p2422_p3 = scmp.ne.s32.totalorder %s31_s16, %s2421_s26  ;;  %p2427_p5 = scmp.lt.s32.totalorder %s2421_s26, %s2421_s26 }
   0xe   :  { %p2428_p6 = por %p2427_p5, %p2426_p4 }
  0x10   :  { %p2429_p7 = pnand %p2428_p6, %p2422_p3 }
  0x12   :  { %2432 = shalt.err (!%p2429_p7)
}
  0x13   :  { %s2531_s27 = smov 512   ;;  %s2532_s28 = smov 32  }
  0x14   :  { %36 = dma.hbm_to_vmem [thread:$0]  %s3001_s1, 8192, %s31_s16, [#allocation8], %s2531_s27, %s2531_s27, %s2532_s28  }
  0x15   :  { %s2433_s7 = scalar_lea.hbm %s3000_s0, 4096 }
  0x16   :  { %p2434_p8 = scmp.ne.s32.totalorder %s3000_s0, %s2433_s7  ;;  %p2437_p9 = scmp.lt.u32.totalorder %s2433_s7, %s3000_s0 }
  0x18   :  { %p2439_p10 = pnand %p2437_p9, %p2434_p8 }
  0x1a   :  { %2442 = shalt.err (!%p2439_p10)
}
  0x1b   :  { %s2443_s12 = scalar_lea.vmem %s2566_s18, 4096  ;;  %p2448_p12 = scmp.lt.s32.totalorder %s2566_s18, %s2566_s18 }
  0x1c   :  { %p2444_p11 = scmp.ne.s32.totalorder %s2566_s18, %s2443_s12  ;;  %p2449_p13 = scmp.lt.s32.totalorder %s2443_s12, %s2443_s12 }
  0x1e   :  { %p2450_p0 = por %p2449_p13, %p2448_p12 }
  0x20   :  { %p2451_p1 = pnand %p2450_p0, %p2444_p11 }
  0x22   :  { %2454 = shalt.err (!%p2451_p1)
}
  0x23   :  { %24 = dma.hbm_to_vmem [thread:$0]  %s3000_s0, 4096, %s2566_s18, [#allocation5], %s2531_s27, %s2531_s27, %s2532_s28  }
  0x24   :  { %s2533_s14 = smov [#allocation9]   ;;  %s2455_s19 = scalar_lea.hbm %s3002_s2, 2048 }
  0x25   :  { %s42_s15 = sshll.u32 %s2533_s14, 4  ;;  %p2456_p2 = scmp.ne.s32.totalorder %s3002_s2, %s2455_s19  ;;  %s43_s15 = int_to_ptr.vmem [resolvable:$true] %s42_s15 }
  0x26   :  { %p2459_p3 = scmp.lt.u32.totalorder %s2455_s19, %s3002_s2 }
  0x28   :  { %p2461_p4 = pnand %p2459_p3, %p2456_p2 }
  0x2a   :  { %2464 = shalt.err (!%p2461_p4)
}
  0x2b   :  { %s2465_s24 = scalar_lea.vmem %s43_s15, 2048  ;;  %p2470_p6 = scmp.lt.s32.totalorder %s43_s15, %s43_s15 }
  0x2c   :  { %p2466_p5 = scmp.ne.s32.totalorder %s43_s15, %s2465_s24  ;;  %p2471_p7 = scmp.lt.s32.totalorder %s2465_s24, %s2465_s24 }
  0x2e   :  { %p2472_p8 = por %p2471_p7, %p2470_p6 }
  0x30   :  { %p2473_p9 = pnand %p2472_p8, %p2466_p5 }
  0x32   :  { %2476 = shalt.err (!%p2473_p9)
}
  0x33   :  { %s2534_s0 = smov 128   ;;  %s2535_s18 = smov 8  }
  0x34   :  { %48 = dma.hbm_to_vmem [thread:$0]  %s3002_s2, 2048, %s43_s15, [#allocation8], %s2534_s0, %s2534_s0, %s2535_s18  }
  0x35   :  { %s2536_s27 = smov [#allocation10]   ;;  %s2477_s5 = scalar_lea.hbm %s3003_s3, 16 }
  0x36   :  { %s55_s28 = sshll.u32 %s2536_s27, 4  ;;  %p2478_p10 = scmp.ne.s32.totalorder %s3003_s3, %s2477_s5  ;;  %s56_s28 = int_to_ptr.vmem [resolvable:$true] %s55_s28 }
  0x37   :  { %p2481_p11 = scmp.lt.u32.totalorder %s2477_s5, %s3003_s3 }
  0x39   :  { %p2483_p12 = pnand %p2481_p11, %p2478_p10 }
  0x3b   :  { %2486 = shalt.err (!%p2483_p12)
}
  0x3c   :  { %s2487_s10 = scalar_lea.vmem %s56_s28, 16  ;;  %s2491_s2 = scalar_lea.vmem %s56_s28, 32 }
  0x3d   :  { %p2488_p13 = scmp.ne.s32.totalorder %s56_s28, %s2487_s10  ;;  %p2492_p0 = scmp.lt.s32.totalorder %s56_s28, %s56_s28 }
  0x3e   :  { %p2493_p1 = scmp.lt.s32.totalorder %s2491_s2, %s2487_s10 }
  0x40   :  { %p2494_p2 = por %p2493_p1, %p2492_p0 }
  0x42   :  { %p2495_p3 = pnand %p2494_p2, %p2488_p13 }
  0x44   :  { %2498 = shalt.err (!%p2495_p3)
}
  0x45   :  { %58 = dma.hbm_to_vmem [thread:$0]  %s3003_s3, 16, %s56_s28, [#allocation11]  }
  0x46   :  { %2521 = dma.done.wait [#allocation5], 4096  }
  0x47   :  { %2522 = vsyncadd [#allocation5], 4294963200 }
  0x48   :  { %2523 = dma.done.wait [#allocation8], 10240  }
  0x49   :  { %2524 = vsyncadd [#allocation8], 4294957056 }
  0x4a   :  { %2525 = dma.done.wait [#allocation11], 16  }
  0x4b   :  { %2526 = vsyncadd [#allocation11], 4294967280  ;;  %v2537_v0 = vmov 0.0   ;;  %v84_v1 = vld [vmem:[#allocation7 + $0x8] sm:$0xff]  ;;  %v83_v3 = vld [vmem:[#allocation7] sm:$0xff]  ;;  %vm2539_vm0 = vmmov 0  }
  0x4c   :  { %211 = vmatprep.mubr.f32.mxu0 %v2537_v0  ;;  %282 = vmatprep.mubr.f32.mxu1 %v2537_v0  ;;  %v88_v2 = vld [vmem:[#allocation7 + $0x28] sm:$0xff]  ;;  %v87_v5 = vld [vmem:[#allocation7 + $0x20] sm:$0xff]  ;;  %v86_v19 = vld [vmem:[#allocation7 + $0x18] sm:$0xff]  ;;  %s2540_s3 = smov [#allocation12]  }
  0x4d   :  { %v2623_v4 = vpack.c.bf16 %v88_v2, %v84_v1  ;;  %v92_v6 = vld [vmem:[#allocation7 + $0x48] sm:$0xff]  ;;  %v2625_v8 = vpack.c.bf16 %v87_v5, %v83_v3  ;;  %v91_v10 = vld [vmem:[#allocation7 + $0x40] sm:$0xff]  ;;  %v90_v20 = vld [vmem:[#allocation7 + $0x38] sm:$0xff]  ;;  %s1647_s1 = sshll.u32 %s2540_s3, 4  ;;  %s1648_s1 = int_to_ptr.vmem [resolvable:$true] %s1647_s1 }
  0x4e   :  { %v96_v7 = vld [vmem:[#allocation7 + $0x68] sm:$0xff]  ;;  %v95_v11 = vld [vmem:[#allocation7 + $0x60] sm:$0xff]  ;;  %v2636_v22 = vpack.c.bf16 %v90_v20, %v86_v19  ;;  %v85_v23 = vld [vmem:[#allocation7 + $0x10] sm:$0xff]  ;;  %s2499_s13 = scalar_lea.vmem %s1648_s1, 128  ;;  %p2504_p5 = scmp.lt.s32.totalorder %s1648_s1, %s1648_s1 }
  0x4f   :  { %v2627_v9 = vpack.c.bf16 %v96_v7, %v92_v6  ;;  %v100_v12 = vld [vmem:[#allocation7 + $0x88] sm:$0xff]  ;;  %1736 = vmatprep.subr.bf16.mxu0 %v2623_v4  ;;  %v2631_v14 = vpack.c.bf16 %v95_v11, %v91_v10  ;;  %v99_v15 = vld [vmem:[#allocation7 + $0x80] sm:$0xff]  ;;  %v89_v24 = vld [vmem:[#allocation7 + $0x30] sm:$0xff]  ;;  %p2500_p4 = scmp.ne.s32.totalorder %s1648_s1, %s2499_s13  ;;  %p2505_p6 = scmp.lt.s32.totalorder %s2499_s13, %s2499_s13 }
  0x50   :  { %v104_v13 = vld [vmem:[#allocation7 + $0xa8] sm:$0xff]  ;;  %1738 = vmatpush1.bf16.msra.mxu0 %v2625_v8  ;;  %v103_v16 = vld [vmem:[#allocation7 + $0xa0] sm:$0xff]  ;;  %v2638_v25 = vpack.c.bf16 %v89_v24, %v85_v23  ;;  %1768 = vmatprep.subr.bf16.mxu1 %v2636_v22  ;;  %v94_v27 = vld [vmem:[#allocation7 + $0x58] sm:$0xff] }
  0x51   :  { %1740 = vmatprep.subr.bf16.mxu0 %v2627_v9  ;;  %v2634_v17 = vpack.c.bf16 %v104_v13, %v100_v12  ;;  %v108_v18 = vld [vmem:[#allocation7 + $0xc8] sm:$0xff]  ;;  %v2641_v26 = vpack.c.bf16 %v103_v16, %v99_v15  ;;  %v98_v28 = vld [vmem:[#allocation7 + $0x78] sm:$0xff]  ;;  %v93_v29 = vld [vmem:[#allocation7 + $0x50] sm:$0xff]  ;;  %p2506_p7 = por %p2505_p6, %p2504_p5 }
  0x52   :  { %v112_v21 = vld [vmem:[#allocation7 + $0xe8] sm:$0xff]  ;;  %v107_v31 = vld [vmem:[#allocation7 + $0xc0] sm:$0xff]  ;;  %1770 = vmatpush1.bf16.msra.mxu1 %v2638_v25  ;;  %v2648_v33 = vpack.c.bf16 %v98_v28, %v94_v27  ;;  %v97_v34 = vld [vmem:[#allocation7 + $0x70] sm:$0xff] }
  0x53   :  { %v2645_v30 = vpack.c.bf16 %v112_v21, %v108_v18  ;;  %v111_v32 = vld [vmem:[#allocation7 + $0xe0] sm:$0xff]  ;;  %v116_v35 = vld [vmem:[#allocation7 + $0x108] sm:$0xff]  ;;  %v2650_v37 = vpack.c.bf16 %v97_v34, %v93_v29  ;;  %v102_v38 = vld [vmem:[#allocation7 + $0x98] sm:$0xff]  ;;  %p2507_p8 = pnand %p2506_p7, %p2500_p4 }
  0x54   :  { %1742 = vmatpush1.bf16.msra.mxu0 %v2631_v14  ;;  %v120_v36 = vld [vmem:[#allocation7 + $0x128] sm:$0xff]  ;;  %1772 = vmatprep.subr.bf16.mxu1 %v2648_v33  ;;  %v106_v39 = vld [vmem:[#allocation7 + $0xb8] sm:$0xff]  ;;  %v101_v40 = vld [vmem:[#allocation7 + $0x90] sm:$0xff]  ;;  %v2654_v42 = vpack.c.bf16 %v111_v32, %v107_v31 }
  0x55   :  { %1744 = vmatprep.subr.bf16.mxu0 %v2634_v17  ;;  %v105_v41 = vld [vmem:[#allocation7 + $0xb0] sm:$0xff]  ;;  %v115_v43 = vld [vmem:[#allocation7 + $0x100] sm:$0xff]  ;;  %v2656_v45 = vpack.c.bf16 %v106_v39, %v102_v38  ;;  %v2659_v46 = vpack.c.bf16 %v120_v36, %v116_v35  ;;  %v124_v47 = vld [vmem:[#allocation7 + $0x148] sm:$0xff] }
  0x56   :  { %v119_v44 = vld [vmem:[#allocation7 + $0x120] sm:$0xff]  ;;  %1774 = vmatpush1.bf16.msra.mxu1 %v2650_v37  ;;  %v2662_v48 = vpack.c.bf16 %v105_v41, %v101_v40  ;;  %v110_v49 = vld [vmem:[#allocation7 + $0xd8] sm:$0xff]  ;;  %v128_v51 = vld [vmem:[#allocation7 + $0x168] sm:$0xff] }
  0x57   :  { %v114_v50 = vld [vmem:[#allocation7 + $0xf8] sm:$0xff]  ;;  %1776 = vmatprep.subr.bf16.mxu1 %v2656_v45  ;;  %v109_v53 = vld [vmem:[#allocation7 + $0xd0] sm:$0xff]  ;;  %v2668_v55 = vpack.c.bf16 %v119_v44, %v115_v43  ;;  %v2671_v58 = vpack.c.bf16 %v128_v51, %v124_v47  ;;  %v123_v59 = vld [vmem:[#allocation7 + $0x140] sm:$0xff] }
  0x58   :  { %1746 = vmatpush1.bf16.msra.mxu0 %v2641_v26  ;;  %v2665_v52 = vpack.c.bf16 %v114_v50, %v110_v49  ;;  %v113_v54 = vld [vmem:[#allocation7 + $0xf0] sm:$0xff]  ;;  %v118_v56 = vld [vmem:[#allocation7 + $0x118] sm:$0xff]  ;;  %v127_v60 = vld [vmem:[#allocation7 + $0x160] sm:$0xff] }
  0x59   :  { %1748 = vmatprep.subr.bf16.mxu0 %v2645_v30  ;;  %v122_v57 = vld [vmem:[#allocation7 + $0x138] sm:$0xff]  ;;  %v132_v61 = vld [vmem:[#allocation7 + $0x188] sm:$0xff]  ;;  %v2674_v62 = vpack.c.bf16 %v113_v54, %v109_v53  ;;  %v117_v2 = vld [vmem:[#allocation7 + $0x110] sm:$0xff]  ;;  %v2680_v7 = vpack.c.bf16 %v127_v60, %v123_v59 }
  0x5a   :  { %1778 = vmatpush1.bf16.msra.mxu1 %v2662_v48  ;;  %v136_v63 = vld [vmem:[#allocation7 + $0x1a8] sm:$0xff]  ;;  %v2677_v1 = vpack.c.bf16 %v122_v57, %v118_v56  ;;  %v121_v3 = vld [vmem:[#allocation7 + $0x130] sm:$0xff]  ;;  %v126_v5 = vld [vmem:[#allocation7 + $0x158] sm:$0xff] }
  0x5b   :  { %1780 = vmatprep.subr.bf16.mxu1 %v2665_v52  ;;  %v130_v6 = vld [vmem:[#allocation7 + $0x178] sm:$0xff]  ;;  %v2683_v10 = vpack.c.bf16 %v136_v63, %v132_v61  ;;  %v131_v11 = vld [vmem:[#allocation7 + $0x180] sm:$0xff]  ;;  %v140_v13 = vld [vmem:[#allocation7 + $0x1c8] sm:$0xff]  ;;  %v2686_v15 = vpack.c.bf16 %v121_v3, %v117_v2 }
  0x5c   :  { %1750 = vmatpush1.bf16.msra.mxu0 %v2654_v42  ;;  %v135_v12 = vld [vmem:[#allocation7 + $0x1a0] sm:$0xff]  ;;  %v144_v16 = vld [vmem:[#allocation7 + $0x1e8] sm:$0xff]  ;;  %v2689_v18 = vpack.c.bf16 %v130_v6, %v126_v5  ;;  %v125_v19 = vld [vmem:[#allocation7 + $0x150] sm:$0xff] }
  0x5d   :  { %1752 = vmatprep.subr.bf16.mxu0 %v2659_v46  ;;  %v129_v20 = vld [vmem:[#allocation7 + $0x170] sm:$0xff]  ;;  %v134_v21 = vld [vmem:[#allocation7 + $0x198] sm:$0xff]  ;;  %v2692_v24 = vpack.c.bf16 %v135_v12, %v131_v11  ;;  %v2695_v27 = vpack.c.bf16 %v144_v16, %v140_v13  ;;  %v139_v28 = vld [vmem:[#allocation7 + $0x1c0] sm:$0xff] }
  0x5e   :  { %1782 = vmatpush1.bf16.msra.mxu1 %v2674_v62  ;;  %v138_v23 = vld [vmem:[#allocation7 + $0x1b8] sm:$0xff]  ;;  %v143_v29 = vld [vmem:[#allocation7 + $0x1e0] sm:$0xff]  ;;  %v2698_v31 = vpack.c.bf16 %v129_v20, %v125_v19  ;;  %v133_v34 = vld [vmem:[#allocation7 + $0x190] sm:$0xff] }
  0x5f   :  { %1784 = vmatprep.subr.bf16.mxu1 %v2677_v1  ;;  %v2701_v32 = vpack.c.bf16 %v138_v23, %v134_v21  ;;  %v137_v35 = vld [vmem:[#allocation7 + $0x1b0] sm:$0xff]  ;;  %v142_v36 = vld [vmem:[#allocation7 + $0x1d8] sm:$0xff]  ;;  %v2704_v39 = vpack.c.bf16 %v143_v29, %v139_v28  ;;  %v79_v49 = vld [vmem:[#allocation4] sm:$0xff] }
  0x60   :  { %1754 = vmatpush1.bf16.msra.mxu0 %v2668_v55  ;;  %v146_v38 = vld [vmem:[#allocation7 + $0x1f8] sm:$0xff]  ;;  %v2708_v40 = vpack.c.bf16 %v137_v35, %v133_v34  ;;  %v141_v43 = vld [vmem:[#allocation7 + $0x1d0] sm:$0xff]  ;;  %v80_v50 = vld [vmem:[#allocation4 + $0x8] sm:$0xff] }
  0x61   :  { %1756 = vmatprep.subr.bf16.mxu0 %v2671_v58  ;;  %v2711_v41 = vpack.c.bf16 %v146_v38, %v142_v36  ;;  %v145_v44 = vld [vmem:[#allocation7 + $0x1f0] sm:$0xff]  ;;  %v82_v60 = vld [vmem:[#allocation4 + $0x18] sm:$0xff] }
  0x62   :  { %1786 = vmatpush1.bf16.msra.mxu1 %v2686_v15  ;;  %v2715_v47 = vpack.c.bf16 %v145_v44, %v141_v43  ;;  %v81_v3 = vld [vmem:[#allocation4 + $0x10] sm:$0xff]  ;;  %v318_v44 = vld [vmem:[#allocation4 + $0x20] sm:$0xff] }
  0x63   :  { %1788 = vmatprep.subr.bf16.mxu1 %v2689_v18 }
  0x64   :  { %1758 = vmatpush1.bf16.msra.mxu0 %v2680_v7 }
  0x65   :  { %1760 = vmatprep.subr.bf16.mxu0 %v2683_v10 }
  0x66   :  { %1790 = vmatpush1.bf16.msra.mxu1 %v2698_v31 }
  0x67   :  { %1792 = vmatprep.subr.bf16.mxu1 %v2701_v32 }
  0x68   :  { %1762 = vmatpush1.bf16.msra.mxu0 %v2692_v24 }
  0x69   :  { %1764 = vmatprep.subr.bf16.mxu0 %v2695_v27 }
  0x6a   :  { %1794 = vmatpush1.bf16.msra.mxu1 %v2708_v40 }
  0x6b   :  { %1796 = vmatprep.subr.bf16.mxu1 %v2711_v41 }
  0x6c   :  { %1766 = vmatpush1.bf16.msra.mxu0 %v2704_v39 }
  0x6d   :  { %1800 = vmatprep.subr.bf16.mxu0 %v2623_v4 }
  0x6e   :  { %1798 = vmatpush1.bf16.msra.mxu1 %v2715_v47 }
  0x6f   :  { %212 = vmatmul.mubr.f32.vlgmr.msra.gmra.mrb[0].mxu0 %v2537_v0  ;;  %1832 = vmatprep.subr.bf16.mxu1 %v2636_v22 }
  0x70   :  { %1802 = vmatpush1.bf16.msra.mxu0 %v2625_v8  ;;  %386 = vmatprep.mubr.f32.mxu0 %v2537_v0 }
  0x71   :  { %1804 = vmatprep.subr.bf16.mxu0 %v2627_v9  ;;  %283 = vmatmul.mubr.f32.vlgmr.msra.gmra.mrb[0].mxu1 %v2537_v0 }
  0x72   :  { %1834 = vmatpush1.bf16.msra.mxu1 %v2638_v25  ;;  %457 = vmatprep.mubr.f32.mxu1 %v2537_v0 }
  0x73   :  { %1836 = vmatprep.subr.bf16.mxu1 %v2648_v33 }
  0x74   :  { %1806 = vmatpush1.bf16.msra.mxu0 %v2631_v14 }
  0x75   :  { %1808 = vmatprep.subr.bf16.mxu0 %v2634_v17 }
  0x76   :  { %1838 = vmatpush1.bf16.msra.mxu1 %v2650_v37 }
  0x77   :  { %1840 = vmatprep.subr.bf16.mxu1 %v2656_v45 }
  0x78   :  { %1810 = vmatpush1.bf16.msra.mxu0 %v2641_v26 }
  0x79   :  { %1812 = vmatprep.subr.bf16.mxu0 %v2645_v30 }
  0x7a   :  { %1842 = vmatpush1.bf16.msra.mxu1 %v2662_v48 }
  0x7b   :  { %1844 = vmatprep.subr.bf16.mxu1 %v2665_v52 }
  0x7c   :  { %1814 = vmatpush1.bf16.msra.mxu0 %v2654_v42 }
  0x7d   :  { %1816 = vmatprep.subr.bf16.mxu0 %v2659_v46 }
  0x7e   :  { %1846 = vmatpush1.bf16.msra.mxu1 %v2674_v62 }
  0x7f   :  { %1848 = vmatprep.subr.bf16.mxu1 %v2677_v1 }
  0x80   :  { %1818 = vmatpush1.bf16.msra.mxu0 %v2668_v55 }
  0x81   :  { %1820 = vmatprep.subr.bf16.mxu0 %v2671_v58 }
  0x82   :  { %1850 = vmatpush1.bf16.msra.mxu1 %v2686_v15 }
  0x83   :  { %1852 = vmatprep.subr.bf16.mxu1 %v2689_v18 }
  0x84   :  { %1822 = vmatpush1.bf16.msra.mxu0 %v2680_v7 }
  0x85   :  { %1824 = vmatprep.subr.bf16.mxu0 %v2683_v10 }
  0x86   :  { %1854 = vmatpush1.bf16.msra.mxu1 %v2698_v31 }
  0x87   :  { %1856 = vmatprep.subr.bf16.mxu1 %v2701_v32 }
  0x88   :  { %1826 = vmatpush1.bf16.msra.mxu0 %v2692_v24 }
  0x89   :  { %1828 = vmatprep.subr.bf16.mxu0 %v2695_v27 }
  0x8a   :  { %1858 = vmatpush1.bf16.msra.mxu1 %v2708_v40 }
  0x8b   :  { %1860 = vmatprep.subr.bf16.mxu1 %v2711_v41 }
  0x8c   :  { %1830 = vmatpush1.bf16.msra.mxu0 %v2704_v39 }
  0x8d   :  { %1864 = vmatprep.subr.bf16.mxu0 %v2623_v4 }
  0x8e   :  { %1862 = vmatpush1.bf16.msra.mxu1 %v2715_v47 }
  0x8f   :  { %1896 = vmatprep.subr.bf16.mxu1 %v2636_v22 }
 0x142   :  { %v213_v51 = vpop.f32.mrb[0].mxu0 }
 0x143   :  { %v289_v53 = vadd.f32 %v213_v51, %v79_v49  ;;  %v215_v54 = vpop.f32.mrb[1].mxu0  ;;  %v319_v49 = vld [vmem:[#allocation4 + $0x28] sm:$0xff] }
 0x144   :  { %v290_v56 = vadd.f32 %v215_v54, %v80_v50  ;;  %v284_v61 = vpop.f32.mrb[0].mxu1 }
 0x145   :  { %v1658_v57 = vmul.f32 -1.442695, %v289_v53  ;;  %v286_v63 = vpop.f32.mrb[1].mxu1  ;;  %v291_v6 = vadd.f32 %v284_v61, %v81_v3  ;;  %v321_v61 = vld [vmem:[#allocation4 + $0x38] sm:$0xff] }
 0x146   :  { %v1659_v59 = vmul.f32 -1.442695, %v290_v56  ;;  %v292_v2 = vadd.f32 %v286_v63, %v82_v60 }
 0x147   :  { %2283 = vpow2.f32 %v1658_v57 }
 0x148   :  { %2285 = vpow2.f32 %v1659_v59  ;;  %v1660_v5 = vmul.f32 -1.442695, %v292_v2  ;;  %v320_v2 = vld [vmem:[#allocation4 + $0x30] sm:$0xff] }
 0x14a   :  { %2287 = vpow2.f32 %v1660_v5 }
 0x14b   :  { %2289 = vtanh.f32 %v291_v6 }
 0x151   :  { %v2284_v11 = vpop.eup %2283 }
 0x152   :  { %v2286_v12 = vpop.eup %2285  ;;  %v296_v13 = vadd.f32 1.0, %v2284_v11 }
 0x153   :  { %v302_v16 = vadd.f32 1.0, %v2286_v12 }
 0x154   :  { %2291 = vrcp.f32 %v296_v13  ;;  %v2288_v19 = vpop.eup %2287 }
 0x155   :  { %2293 = vrcp.f32 %v302_v16  ;;  %v2290_v20 = vpop.eup %2289  ;;  %v309_v23 = vadd.f32 1.0, %v2288_v19 }
 0x157   :  { %2295 = vrcp.f32 %v309_v23 }
 0x15e   :  { %v2292_v21 = vpop.eup %2291 }
 0x15f   :  { %v2294_v28 = vpop.eup %2293  ;;  %v313_v29 = vmul.f32 %v2292_v21, %v2290_v20 }
 0x160   :  { %v312_v34 = vmul.f32 0.0, %v2294_v28 }
 0x161   :  { %v2296_v36 = vpop.eup %2295 }
 0x162   :  { %v2757_v35 = vadd.f32 %v313_v29, %v312_v34 }
 0x164   :  { %2297 = vtanh.f32 %v2757_v35 }
 0x16e   :  { %v2298_v38 = vpop.eup %2297 }
 0x16f   :  { %v316_v43 = vmul.f32 %v2298_v38, %v2296_v36 }
 0x171   :  { %387 = vmatmul.mubr.f32.vlgmr.msra.gmra.mrb[2].mxu0 %v316_v43  ;;  %458 = vmatmul.mubr.f32.vlgmr.msra.gmra.mrb[2].mxu1 %v316_v43 }
 0x172   :  { %1866 = vmatpush1.bf16.msra.mxu0 %v2625_v8  ;;  %1898 = vmatpush1.bf16.msra.mxu1 %v2638_v25 }
 0x173   :  { %1868 = vmatprep.subr.bf16.mxu0 %v2627_v9  ;;  %1900 = vmatprep.subr.bf16.mxu1 %v2648_v33 }
 0x174   :  { %561 = vmatprep.mubr.f32.mxu0 %v2537_v0  ;;  %632 = vmatprep.mubr.f32.mxu1 %v2537_v0 }
 0x176   :  { %1870 = vmatpush1.bf16.msra.mxu0 %v2631_v14  ;;  %1902 = vmatpush1.bf16.msra.mxu1 %v2650_v37 }
 0x177   :  { %1872 = vmatprep.subr.bf16.mxu0 %v2634_v17  ;;  %1904 = vmatprep.subr.bf16.mxu1 %v2656_v45 }
 0x17a   :  { %1874 = vmatpush1.bf16.msra.mxu0 %v2641_v26  ;;  %1906 = vmatpush1.bf16.msra.mxu1 %v2662_v48 }
 0x17b   :  { %1876 = vmatprep.subr.bf16.mxu0 %v2645_v30  ;;  %1908 = vmatprep.subr.bf16.mxu1 %v2665_v52 }
 0x17e   :  { %1878 = vmatpush1.bf16.msra.mxu0 %v2654_v42  ;;  %1910 = vmatpush1.bf16.msra.mxu1 %v2674_v62 }
 0x17f   :  { %1880 = vmatprep.subr.bf16.mxu0 %v2659_v46  ;;  %1912 = vmatprep.subr.bf16.mxu1 %v2677_v1 }
 0x182   :  { %1882 = vmatpush1.bf16.msra.mxu0 %v2668_v55  ;;  %1914 = vmatpush1.bf16.msra.mxu1 %v2686_v15 }
 0x183   :  { %1884 = vmatprep.subr.bf16.mxu0 %v2671_v58  ;;  %1916 = vmatprep.subr.bf16.mxu1 %v2689_v18 }
 0x186   :  { %1886 = vmatpush1.bf16.msra.mxu0 %v2680_v7  ;;  %1918 = vmatpush1.bf16.msra.mxu1 %v2698_v31 }
 0x187   :  { %1888 = vmatprep.subr.bf16.mxu0 %v2683_v10  ;;  %1920 = vmatprep.subr.bf16.mxu1 %v2701_v32 }
 0x18a   :  { %1890 = vmatpush1.bf16.msra.mxu0 %v2692_v24  ;;  %1922 = vmatpush1.bf16.msra.mxu1 %v2708_v40 }
 0x18b   :  { %1892 = vmatprep.subr.bf16.mxu0 %v2695_v27  ;;  %1924 = vmatprep.subr.bf16.mxu1 %v2711_v41 }
 0x18e   :  { %1894 = vmatpush1.bf16.msra.mxu0 %v2704_v39  ;;  %1926 = vmatpush1.bf16.msra.mxu1 %v2715_v47 }
 0x18f   :  { %1928 = vmatprep.subr.bf16.mxu0 %v2623_v4  ;;  %1960 = vmatprep.subr.bf16.mxu1 %v2636_v22 }
 0x244   :  { %v388_v50 = vpop.f32.mrb[2].mxu0  ;;  %v459_v51 = vpop.f32.mrb[2].mxu1 }
 0x245   :  { %v464_v53 = vadd.f32 %v388_v50, %v318_v44  ;;  %v390_v54 = vpop.f32.mrb[3].mxu0  ;;  %v461_v56 = vpop.f32.mrb[3].mxu1  ;;  %v466_v5 = vadd.f32 %v459_v51, %v320_v2  ;;  %v494_v44 = vld [vmem:[#allocation4 + $0x48] sm:$0xff] }
 0x246   :  { %v465_v57 = vadd.f32 %v390_v54, %v319_v49  ;;  %v467_v63 = vadd.f32 %v461_v56, %v321_v61 }
 0x247   :  { %v1661_v59 = vmul.f32 -1.442695, %v464_v53 }
 0x248   :  { %v1662_v60 = vmul.f32 -1.442695, %v465_v57  ;;  %v1663_v3 = vmul.f32 -1.442695, %v467_v63  ;;  %v495_v63 = vld [vmem:[#allocation4 + $0x50] sm:$0xff] }
 0x249   :  { %2299 = vpow2.f32 %v1661_v59 }
 0x24a   :  { %2301 = vpow2.f32 %v1662_v60  ;;  %v496_v60 = vld [vmem:[#allocation4 + $0x58] sm:$0xff] }
 0x24b   :  { %2303 = vpow2.f32 %v1663_v3 }
 0x24c   :  { %2305 = vtanh.f32 %v466_v5 }
 0x253   :  { %v2300_v6 = vpop.eup %2299 }
 0x254   :  { %v2302_v11 = vpop.eup %2301  ;;  %v471_v12 = vadd.f32 1.0, %v2300_v6 }
 0x255   :  { %v477_v13 = vadd.f32 1.0, %v2302_v11  ;;  %v2304_v16 = vpop.eup %2303 }
 0x256   :  { %2307 = vrcp.f32 %v471_v12  ;;  %v2306_v19 = vpop.eup %2305  ;;  %v484_v28 = vadd.f32 1.0, %v2304_v16 }
 0x257   :  { %2309 = vrcp.f32 %v477_v13 }
 0x258   :  { %2311 = vrcp.f32 %v484_v28 }
 0x260   :  { %v2308_v20 = vpop.eup %2307 }
 0x261   :  { %v2310_v21 = vpop.eup %2309  ;;  %v488_v23 = vmul.f32 %v2308_v20, %v2306_v19 }
 0x262   :  { %v487_v29 = vmul.f32 %v2310_v21, %v2757_v35  ;;  %v2312_v36 = vpop.eup %2311  ;;  %v493_v35 = vld [vmem:[#allocation4 + $0x40] sm:$0xff] }
 0x264   :  { %v2795_v34 = vadd.f32 %v488_v23, %v487_v29 }
 0x266   :  { %2313 = vtanh.f32 %v2795_v34 }
 0x270   :  { %v2314_v38 = vpop.eup %2313 }
 0x271   :  { %v491_v43 = vmul.f32 %v2314_v38, %v2312_v36 }
 0x273   :  { %562 = vmatmul.mubr.f32.vlgmr.msra.gmra.mrb[4].mxu0 %v491_v43  ;;  %633 = vmatmul.mubr.f32.vlgmr.msra.gmra.mrb[4].mxu1 %v491_v43 }
 0x274   :  { %1930 = vmatpush1.bf16.msra.mxu0 %v2625_v8  ;;  %1962 = vmatpush1.bf16.msra.mxu1 %v2638_v25 }
 0x275   :  { %1932 = vmatprep.subr.bf16.mxu0 %v2627_v9  ;;  %1964 = vmatprep.subr.bf16.mxu1 %v2648_v33 }
 0x276   :  { %736 = vmatprep.mubr.f32.mxu0 %v2537_v0  ;;  %807 = vmatprep.mubr.f32.mxu1 %v2537_v0 }
 0x278   :  { %1934 = vmatpush1.bf16.msra.mxu0 %v2631_v14  ;;  %1966 = vmatpush1.bf16.msra.mxu1 %v2650_v37 }
 0x279   :  { %1936 = vmatprep.subr.bf16.mxu0 %v2634_v17  ;;  %1968 = vmatprep.subr.bf16.mxu1 %v2656_v45 }
 0x27c   :  { %1938 = vmatpush1.bf16.msra.mxu0 %v2641_v26  ;;  %1970 = vmatpush1.bf16.msra.mxu1 %v2662_v48 }
 0x27d   :  { %1940 = vmatprep.subr.bf16.mxu0 %v2645_v30  ;;  %1972 = vmatprep.subr.bf16.mxu1 %v2665_v52 }
 0x280   :  { %1942 = vmatpush1.bf16.msra.mxu0 %v2654_v42  ;;  %1974 = vmatpush1.bf16.msra.mxu1 %v2674_v62 }
 0x281   :  { %1944 = vmatprep.subr.bf16.mxu0 %v2659_v46  ;;  %1976 = vmatprep.subr.bf16.mxu1 %v2677_v1 }
 0x284   :  { %1946 = vmatpush1.bf16.msra.mxu0 %v2668_v55  ;;  %1978 = vmatpush1.bf16.msra.mxu1 %v2686_v15 }
 0x285   :  { %1948 = vmatprep.subr.bf16.mxu0 %v2671_v58  ;;  %1980 = vmatprep.subr.bf16.mxu1 %v2689_v18 }
 0x288   :  { %1950 = vmatpush1.bf16.msra.mxu0 %v2680_v7  ;;  %1982 = vmatpush1.bf16.msra.mxu1 %v2698_v31 }
 0x289   :  { %1952 = vmatprep.subr.bf16.mxu0 %v2683_v10  ;;  %1984 = vmatprep.subr.bf16.mxu1 %v2701_v32 }
 0x28c   :  { %1954 = vmatpush1.bf16.msra.mxu0 %v2692_v24  ;;  %1986 = vmatpush1.bf16.msra.mxu1 %v2708_v40 }
 0x28d   :  { %1956 = vmatprep.subr.bf16.mxu0 %v2695_v27  ;;  %1988 = vmatprep.subr.bf16.mxu1 %v2711_v41 }
 0x290   :  { %1958 = vmatpush1.bf16.msra.mxu0 %v2704_v39  ;;  %1990 = vmatpush1.bf16.msra.mxu1 %v2715_v47 }
 0x291   :  { %1992 = vmatprep.subr.bf16.mxu0 %v2623_v4  ;;  %2024 = vmatprep.subr.bf16.mxu1 %v2636_v22 }
 0x346   :  { %v563_v49 = vpop.f32.mrb[4].mxu0  ;;  %v634_v50 = vpop.f32.mrb[4].mxu1 }
 0x347   :  { %v639_v51 = vadd.f32 %v563_v49, %v493_v35  ;;  %v565_v53 = vpop.f32.mrb[5].mxu0  ;;  %v636_v54 = vpop.f32.mrb[5].mxu1  ;;  %v641_v3 = vadd.f32 %v634_v50, %v495_v63  ;;  %v669_v35 = vld [vmem:[#allocation4 + $0x68] sm:$0xff] }
 0x348   :  { %v640_v56 = vadd.f32 %v565_v53, %v494_v44  ;;  %v642_v61 = vadd.f32 %v636_v54, %v496_v60 }
 0x349   :  { %v1664_v57 = vmul.f32 -1.442695, %v639_v51 }
 0x34a   :  { %v1665_v59 = vmul.f32 -1.442695, %v640_v56  ;;  %v1666_v2 = vmul.f32 -1.442695, %v642_v61  ;;  %v670_v61 = vld [vmem:[#allocation4 + $0x70] sm:$0xff] }
 0x34b   :  { %2315 = vpow2.f32 %v1664_v57 }
 0x34c   :  { %2317 = vpow2.f32 %v1665_v59  ;;  %v671_v59 = vld [vmem:[#allocation4 + $0x78] sm:$0xff] }
 0x34d   :  { %2319 = vpow2.f32 %v1666_v2 }
 0x34e   :  { %2321 = vtanh.f32 %v641_v3 }
 0x355   :  { %v2316_v5 = vpop.eup %2315 }
 0x356   :  { %v2318_v6 = vpop.eup %2317  ;;  %v646_v11 = vadd.f32 1.0, %v2316_v5 }
 0x357   :  { %v652_v12 = vadd.f32 1.0, %v2318_v6  ;;  %v2320_v13 = vpop.eup %2319 }
 0x358   :  { %2323 = vrcp.f32 %v646_v11  ;;  %v2322_v16 = vpop.eup %2321  ;;  %v659_v23 = vadd.f32 1.0, %v2320_v13 }
 0x359   :  { %2325 = vrcp.f32 %v652_v12 }
 0x35a   :  { %2327 = vrcp.f32 %v659_v23 }
 0x362   :  { %v2324_v19 = vpop.eup %2323 }
 0x363   :  { %v2326_v20 = vpop.eup %2325  ;;  %v663_v21 = vmul.f32 %v2324_v19, %v2322_v16 }
 0x364   :  { %v662_v28 = vmul.f32 %v2326_v20, %v2795_v34  ;;  %v2328_v36 = vpop.eup %2327  ;;  %v668_v34 = vld [vmem:[#allocation4 + $0x60] sm:$0xff] }
 0x366   :  { %v2833_v29 = vadd.f32 %v663_v21, %v662_v28 }
 0x368   :  { %2329 = vtanh.f32 %v2833_v29 }
 0x372   :  { %v2330_v38 = vpop.eup %2329 }
 0x373   :  { %v666_v43 = vmul.f32 %v2330_v38, %v2328_v36 }
 0x375   :  { %737 = vmatmul.mubr.f32.vlgmr.msra.gmra.mrb[6].mxu0 %v666_v43  ;;  %808 = vmatmul.mubr.f32.vlgmr.msra.gmra.mrb[6].mxu1 %v666_v43 }
 0x376   :  { %1994 = vmatpush1.bf16.msra.mxu0 %v2625_v8  ;;  %2026 = vmatpush1.bf16.msra.mxu1 %v2638_v25 }
 0x377   :  { %1996 = vmatprep.subr.bf16.mxu0 %v2627_v9  ;;  %2028 = vmatprep.subr.bf16.mxu1 %v2648_v33 }
 0x378   :  { %911 = vmatprep.mubr.f32.mxu0 %v2537_v0  ;;  %982 = vmatprep.mubr.f32.mxu1 %v2537_v0 }
 0x37a   :  { %1998 = vmatpush1.bf16.msra.mxu0 %v2631_v14  ;;  %2030 = vmatpush1.bf16.msra.mxu1 %v2650_v37 }
 0x37b   :  { %2000 = vmatprep.subr.bf16.mxu0 %v2634_v17  ;;  %2032 = vmatprep.subr.bf16.mxu1 %v2656_v45 }
 0x37e   :  { %2002 = vmatpush1.bf16.msra.mxu0 %v2641_v26  ;;  %2034 = vmatpush1.bf16.msra.mxu1 %v2662_v48 }
 0x37f   :  { %2004 = vmatprep.subr.bf16.mxu0 %v2645_v30  ;;  %2036 = vmatprep.subr.bf16.mxu1 %v2665_v52 }
 0x382   :  { %2006 = vmatpush1.bf16.msra.mxu0 %v2654_v42  ;;  %2038 = vmatpush1.bf16.msra.mxu1 %v2674_v62 }
 0x383   :  { %2008 = vmatprep.subr.bf16.mxu0 %v2659_v46  ;;  %2040 = vmatprep.subr.bf16.mxu1 %v2677_v1 }
 0x386   :  { %2010 = vmatpush1.bf16.msra.mxu0 %v2668_v55  ;;  %2042 = vmatpush1.bf16.msra.mxu1 %v2686_v15 }
 0x387   :  { %2012 = vmatprep.subr.bf16.mxu0 %v2671_v58  ;;  %2044 = vmatprep.subr.bf16.mxu1 %v2689_v18 }
 0x38a   :  { %2014 = vmatpush1.bf16.msra.mxu0 %v2680_v7  ;;  %2046 = vmatpush1.bf16.msra.mxu1 %v2698_v31 }
 0x38b   :  { %2016 = vmatprep.subr.bf16.mxu0 %v2683_v10  ;;  %2048 = vmatprep.subr.bf16.mxu1 %v2701_v32 }
 0x38e   :  { %2018 = vmatpush1.bf16.msra.mxu0 %v2692_v24  ;;  %2050 = vmatpush1.bf16.msra.mxu1 %v2708_v40 }
 0x38f   :  { %2020 = vmatprep.subr.bf16.mxu0 %v2695_v27  ;;  %2052 = vmatprep.subr.bf16.mxu1 %v2711_v41 }
 0x392   :  { %2022 = vmatpush1.bf16.msra.mxu0 %v2704_v39  ;;  %2054 = vmatpush1.bf16.msra.mxu1 %v2715_v47 }
 0x393   :  { %2056 = vmatprep.subr.bf16.mxu0 %v2623_v4  ;;  %2088 = vmatprep.subr.bf16.mxu1 %v2636_v22 }
 0x448   :  { %v738_v44 = vpop.f32.mrb[6].mxu0  ;;  %v809_v49 = vpop.f32.mrb[6].mxu1 }
 0x449   :  { %v814_v50 = vadd.f32 %v738_v44, %v668_v34  ;;  %v740_v51 = vpop.f32.mrb[7].mxu0  ;;  %v811_v53 = vpop.f32.mrb[7].mxu1  ;;  %v816_v2 = vadd.f32 %v809_v49, %v670_v61  ;;  %v844_v34 = vld [vmem:[#allocation4 + $0x88] sm:$0xff] }
 0x44a   :  { %v815_v54 = vadd.f32 %v740_v51, %v669_v35  ;;  %v817_v60 = vadd.f32 %v811_v53, %v671_v59 }
 0x44b   :  { %v1667_v56 = vmul.f32 -1.442695, %v814_v50 }
 0x44c   :  { %v1668_v57 = vmul.f32 -1.442695, %v815_v54  ;;  %v1669_v63 = vmul.f32 -1.442695, %v817_v60  ;;  %v845_v60 = vld [vmem:[#allocation4 + $0x90] sm:$0xff] }
 0x44d   :  { %2331 = vpow2.f32 %v1667_v56 }
 0x44e   :  { %2333 = vpow2.f32 %v1668_v57  ;;  %v846_v57 = vld [vmem:[#allocation4 + $0x98] sm:$0xff] }
 0x44f   :  { %2335 = vpow2.f32 %v1669_v63 }
 0x450   :  { %2337 = vtanh.f32 %v816_v2 }
 0x457   :  { %v2332_v3 = vpop.eup %2331 }
 0x458   :  { %v2334_v5 = vpop.eup %2333  ;;  %v821_v6 = vadd.f32 1.0, %v2332_v3 }
 0x459   :  { %v827_v11 = vadd.f32 1.0, %v2334_v5  ;;  %v2336_v12 = vpop.eup %2335 }
 0x45a   :  { %2339 = vrcp.f32 %v821_v6  ;;  %v2338_v13 = vpop.eup %2337  ;;  %v834_v21 = vadd.f32 1.0, %v2336_v12 }
 0x45b   :  { %2341 = vrcp.f32 %v827_v11 }
 0x45c   :  { %2343 = vrcp.f32 %v834_v21 }
 0x464   :  { %v2340_v16 = vpop.eup %2339 }
 0x465   :  { %v2342_v19 = vpop.eup %2341  ;;  %v838_v20 = vmul.f32 %v2340_v16, %v2338_v13 }
 0x466   :  { %v837_v23 = vmul.f32 %v2342_v19, %v2833_v29  ;;  %v2344_v36 = vpop.eup %2343  ;;  %v843_v29 = vld [vmem:[#allocation4 + $0x80] sm:$0xff] }
 0x468   :  { %v2871_v28 = vadd.f32 %v838_v20, %v837_v23 }
 0x46a   :  { %2345 = vtanh.f32 %v2871_v28 }
 0x474   :  { %v2346_v38 = vpop.eup %2345 }
 0x475   :  { %v841_v43 = vmul.f32 %v2346_v38, %v2344_v36 }
 0x477   :  { %912 = vmatmul.mubr.f32.vlgmr.msra.gmra.mrb[8].mxu0 %v841_v43  ;;  %983 = vmatmul.mubr.f32.vlgmr.msra.gmra.mrb[8].mxu1 %v841_v43 }
 0x478   :  { %2058 = vmatpush1.bf16.msra.mxu0 %v2625_v8  ;;  %2090 = vmatpush1.bf16.msra.mxu1 %v2638_v25 }
 0x479   :  { %2060 = vmatprep.subr.bf16.mxu0 %v2627_v9  ;;  %2092 = vmatprep.subr.bf16.mxu1 %v2648_v33 }
 0x47a   :  { %1086 = vmatprep.mubr.f32.mxu0 %v2537_v0  ;;  %1157 = vmatprep.mubr.f32.mxu1 %v2537_v0 }
 0x47c   :  { %2062 = vmatpush1.bf16.msra.mxu0 %v2631_v14  ;;  %2094 = vmatpush1.bf16.msra.mxu1 %v2650_v37 }
 0x47d   :  { %2064 = vmatprep.subr.bf16.mxu0 %v2634_v17  ;;  %2096 = vmatprep.subr.bf16.mxu1 %v2656_v45 }
 0x480   :  { %2066 = vmatpush1.bf16.msra.mxu0 %v2641_v26  ;;  %2098 = vmatpush1.bf16.msra.mxu1 %v2662_v48 }
 0x481   :  { %2068 = vmatprep.subr.bf16.mxu0 %v2645_v30  ;;  %2100 = vmatprep.subr.bf16.mxu1 %v2665_v52 }
 0x484   :  { %2070 = vmatpush1.bf16.msra.mxu0 %v2654_v42  ;;  %2102 = vmatpush1.bf16.msra.mxu1 %v2674_v62 }
 0x485   :  { %2072 = vmatprep.subr.bf16.mxu0 %v2659_v46  ;;  %2104 = vmatprep.subr.bf16.mxu1 %v2677_v1 }
 0x488   :  { %2074 = vmatpush1.bf16.msra.mxu0 %v2668_v55  ;;  %2106 = vmatpush1.bf16.msra.mxu1 %v2686_v15 }
 0x489   :  { %2076 = vmatprep.subr.bf16.mxu0 %v2671_v58  ;;  %2108 = vmatprep.subr.bf16.mxu1 %v2689_v18 }
 0x48c   :  { %2078 = vmatpush1.bf16.msra.mxu0 %v2680_v7  ;;  %2110 = vmatpush1.bf16.msra.mxu1 %v2698_v31 }
 0x48d   :  { %2080 = vmatprep.subr.bf16.mxu0 %v2683_v10  ;;  %2112 = vmatprep.subr.bf16.mxu1 %v2701_v32 }
 0x490   :  { %2082 = vmatpush1.bf16.msra.mxu0 %v2692_v24  ;;  %2114 = vmatpush1.bf16.msra.mxu1 %v2708_v40 }
 0x491   :  { %2084 = vmatprep.subr.bf16.mxu0 %v2695_v27  ;;  %2116 = vmatprep.subr.bf16.mxu1 %v2711_v41 }
 0x494   :  { %2086 = vmatpush1.bf16.msra.mxu0 %v2704_v39  ;;  %2118 = vmatpush1.bf16.msra.mxu1 %v2715_v47 }
 0x495   :  { %2120 = vmatprep.subr.bf16.mxu0 %v2623_v4  ;;  %2152 = vmatprep.subr.bf16.mxu1 %v2636_v22 }
 0x54a   :  { %v913_v35 = vpop.f32.mrb[8].mxu0  ;;  %v984_v44 = vpop.f32.mrb[8].mxu1 }
 0x54b   :  { %v989_v49 = vadd.f32 %v913_v35, %v843_v29  ;;  %v915_v50 = vpop.f32.mrb[9].mxu0  ;;  %v986_v51 = vpop.f32.mrb[9].mxu1  ;;  %v991_v63 = vadd.f32 %v984_v44, %v845_v60  ;;  %v1019_v29 = vld [vmem:[#allocation4 + $0xa8] sm:$0xff] }
 0x54c   :  { %v990_v53 = vadd.f32 %v915_v50, %v844_v34  ;;  %v992_v59 = vadd.f32 %v986_v51, %v846_v57 }
 0x54d   :  { %v1670_v54 = vmul.f32 -1.442695, %v989_v49 }
 0x54e   :  { %v1671_v56 = vmul.f32 -1.442695, %v990_v53  ;;  %v1672_v61 = vmul.f32 -1.442695, %v992_v59  ;;  %v1020_v59 = vld [vmem:[#allocation4 + $0xb0] sm:$0xff] }
 0x54f   :  { %2347 = vpow2.f32 %v1670_v54 }
 0x550   :  { %2349 = vpow2.f32 %v1671_v56  ;;  %v1021_v56 = vld [vmem:[#allocation4 + $0xb8] sm:$0xff] }
 0x551   :  { %2351 = vpow2.f32 %v1672_v61 }
 0x552   :  { %2353 = vtanh.f32 %v991_v63 }
 0x559   :  { %v2348_v2 = vpop.eup %2347 }
 0x55a   :  { %v2350_v3 = vpop.eup %2349  ;;  %v996_v5 = vadd.f32 1.0, %v2348_v2 }
 0x55b   :  { %v1002_v6 = vadd.f32 1.0, %v2350_v3  ;;  %v2352_v11 = vpop.eup %2351 }
 0x55c   :  { %2355 = vrcp.f32 %v996_v5  ;;  %v2354_v12 = vpop.eup %2353  ;;  %v1009_v20 = vadd.f32 1.0, %v2352_v11 }
 0x55d   :  { %2357 = vrcp.f32 %v1002_v6 }
 0x55e   :  { %2359 = vrcp.f32 %v1009_v20 }
 0x566   :  { %v2356_v13 = vpop.eup %2355 }
 0x567   :  { %v2358_v16 = vpop.eup %2357  ;;  %v1013_v19 = vmul.f32 %v2356_v13, %v2354_v12 }
 0x568   :  { %v1012_v21 = vmul.f32 %v2358_v16, %v2871_v28  ;;  %v2360_v36 = vpop.eup %2359  ;;  %v1018_v28 = vld [vmem:[#allocation4 + $0xa0] sm:$0xff] }
 0x56a   :  { %v2909_v23 = vadd.f32 %v1013_v19, %v1012_v21 }
 0x56c   :  { %2361 = vtanh.f32 %v2909_v23 }
 0x576   :  { %v2362_v38 = vpop.eup %2361 }
 0x577   :  { %v1016_v43 = vmul.f32 %v2362_v38, %v2360_v36  ;;  %v1548_v38 = vld [vmem:[#allocation9 + $0x8] sm:$0xff] }
 0x579   :  { %1087 = vmatmul.mubr.f32.vlgmr.msra.gmra.mrb[10].mxu0 %v1016_v43  ;;  %1158 = vmatmul.mubr.f32.vlgmr.msra.gmra.mrb[10].mxu1 %v1016_v43 }
 0x57a   :  { %2122 = vmatpush1.bf16.msra.mxu0 %v2625_v8  ;;  %2154 = vmatpush1.bf16.msra.mxu1 %v2638_v25 }
 0x57b   :  { %2124 = vmatprep.subr.bf16.mxu0 %v2627_v9  ;;  %2156 = vmatprep.subr.bf16.mxu1 %v2648_v33 }
 0x57c   :  { %1261 = vmatprep.mubr.f32.mxu0 %v2537_v0  ;;  %1332 = vmatprep.mubr.f32.mxu1 %v2537_v0 }
 0x57e   :  { %2126 = vmatpush1.bf16.msra.mxu0 %v2631_v14  ;;  %2158 = vmatpush1.bf16.msra.mxu1 %v2650_v37 }
 0x57f   :  { %2128 = vmatprep.subr.bf16.mxu0 %v2634_v17  ;;  %2160 = vmatprep.subr.bf16.mxu1 %v2656_v45 }
 0x582   :  { %2130 = vmatpush1.bf16.msra.mxu0 %v2641_v26  ;;  %2162 = vmatpush1.bf16.msra.mxu1 %v2662_v48 }
 0x583   :  { %2132 = vmatprep.subr.bf16.mxu0 %v2645_v30  ;;  %2164 = vmatprep.subr.bf16.mxu1 %v2665_v52 }
 0x586   :  { %2134 = vmatpush1.bf16.msra.mxu0 %v2654_v42  ;;  %2166 = vmatpush1.bf16.msra.mxu1 %v2674_v62 }
 0x587   :  { %2136 = vmatprep.subr.bf16.mxu0 %v2659_v46  ;;  %2168 = vmatprep.subr.bf16.mxu1 %v2677_v1 }
 0x58a   :  { %2138 = vmatpush1.bf16.msra.mxu0 %v2668_v55  ;;  %2170 = vmatpush1.bf16.msra.mxu1 %v2686_v15 }
 0x58b   :  { %2140 = vmatprep.subr.bf16.mxu0 %v2671_v58  ;;  %2172 = vmatprep.subr.bf16.mxu1 %v2689_v18 }
 0x58e   :  { %2142 = vmatpush1.bf16.msra.mxu0 %v2680_v7  ;;  %2174 = vmatpush1.bf16.msra.mxu1 %v2698_v31 }
 0x58f   :  { %2144 = vmatprep.subr.bf16.mxu0 %v2683_v10  ;;  %2176 = vmatprep.subr.bf16.mxu1 %v2701_v32 }
 0x592   :  { %2146 = vmatpush1.bf16.msra.mxu0 %v2692_v24  ;;  %2178 = vmatpush1.bf16.msra.mxu1 %v2708_v40 }
 0x593   :  { %2148 = vmatprep.subr.bf16.mxu0 %v2695_v27  ;;  %2180 = vmatprep.subr.bf16.mxu1 %v2711_v41 }
 0x596   :  { %2150 = vmatpush1.bf16.msra.mxu0 %v2704_v39  ;;  %2182 = vmatpush1.bf16.msra.mxu1 %v2715_v47 }
 0x597   :  { %2184 = vmatprep.subr.bf16.mxu0 %v2623_v4  ;;  %2216 = vmatprep.subr.bf16.mxu1 %v2636_v22 }
 0x64c   :  { %v1088_v34 = vpop.f32.mrb[10].mxu0  ;;  %v1159_v35 = vpop.f32.mrb[10].mxu1 }
 0x64d   :  { %v1164_v44 = vadd.f32 %v1088_v34, %v1018_v28  ;;  %v1090_v49 = vpop.f32.mrb[11].mxu0  ;;  %v1161_v50 = vpop.f32.mrb[11].mxu1  ;;  %v1166_v61 = vadd.f32 %v1159_v35, %v1020_v59  ;;  %v2538_v28 = vmov 0.0|0.0   ;;  %v1550_v34 = vld [vmem:[#allocation9 + $0x18] sm:$0xff] }
 0x64e   :  { %v1165_v51 = vadd.f32 %v1090_v49, %v1019_v29  ;;  %v1167_v57 = vadd.f32 %v1161_v50, %v1021_v56  ;;  %v1549_v29 = vld [vmem:[#allocation9 + $0x10] sm:$0xff]  ;;  %v1552_v49 = vld [vmem:[#allocation9 + $0x28] sm:$0xff]  ;;  %v1555_v56 = vld [vmem:[#allocation9 + $0x40] sm:$0xff] }
 0x64f   :  { %v1673_v53 = vmul.f32 -1.442695, %v1164_v44  ;;  %v2251_v35 = vpack.c.bf16 %v1550_v34, %v1549_v29  ;;  %v1551_v44 = vld [vmem:[#allocation9 + $0x20] sm:$0xff] }
 0x650   :  { %v1674_v54 = vmul.f32 -1.442695, %v1165_v51  ;;  %v1675_v60 = vmul.f32 -1.442695, %v1167_v57  ;;  %v2254_v50 = vpack.c.bf16 %v1552_v49, %v1551_v44  ;;  %v1553_v51 = vld [vmem:[#allocation9 + $0x30] sm:$0xff]  ;;  %v1556_v57 = vld [vmem:[#allocation9 + $0x48] sm:$0xff] }
 0x651   :  { %2363 = vpow2.f32 %v1673_v53  ;;  %v1554_v53 = vld [vmem:[#allocation9 + $0x38] sm:$0xff]  ;;  %v2260_v59 = vpack.c.bf16 %v1556_v57, %v1555_v56 }
 0x652   :  { %2365 = vpow2.f32 %v1674_v54  ;;  %v2257_v54 = vpack.c.bf16 %v1554_v53, %v1553_v51 }
 0x653   :  { %2367 = vpow2.f32 %v1675_v60  ;;  %v1557_v60 = vld [vmem:[#allocation9 + $0x50] sm:$0xff] }
 0x654   :  { %2369 = vtanh.f32 %v1166_v61  ;;  %v1558_v61 = vld [vmem:[#allocation9 + $0x58] sm:$0xff] }
 0x65b   :  { %v2364_v4 = vpop.eup %2363 }
 0x65c   :  { %v2366_v63 = vpop.eup %2365  ;;  %v1171_v22 = vadd.f32 1.0, %v2364_v4  ;;  %v1559_v4 = vld [vmem:[#allocation9 + $0x60] sm:$0xff] }
 0x65d   :  { %v1177_v2 = vadd.f32 1.0, %v2366_v63  ;;  %v2368_v3 = vpop.eup %2367  ;;  %v2263_v63 = vpack.c.bf16 %v1558_v61, %v1557_v60 }
 0x65e   :  { %2371 = vrcp.f32 %v1171_v22  ;;  %v2370_v5 = vpop.eup %2369  ;;  %v1184_v13 = vadd.f32 1.0, %v2368_v3  ;;  %v1560_v22 = vld [vmem:[#allocation9 + $0x68] sm:$0xff]  ;;  %v1561_v3 = vld [vmem:[#allocation9 + $0x70] sm:$0xff] }
 0x65f   :  { %2373 = vrcp.f32 %v1177_v2  ;;  %v2266_v2 = vpack.c.bf16 %v1560_v22, %v1559_v4 }
 0x660   :  { %2375 = vrcp.f32 %v1184_v13 }
 0x668   :  { %v2372_v6 = vpop.eup %2371 }
 0x669   :  { %v2374_v11 = vpop.eup %2373  ;;  %v1188_v12 = vmul.f32 %v2372_v6, %v2370_v5  ;;  %v1562_v5 = vld [vmem:[#allocation9 + $0x78] sm:$0xff] }
 0x66a   :  { %v1187_v16 = vmul.f32 %v2374_v11, %v2909_v23  ;;  %v2376_v20 = vpop.eup %2375  ;;  %v1547_v23 = vld [vmem:[#allocation9] sm:$0xff]  ;;  %v2269_v6 = vpack.c.bf16 %v1562_v5, %v1561_v3 }
 0x66b   :  { %v2248_v43 = vpack.c.bf16 %v1548_v38, %v1547_v23  ;;  %v1368_v11 = vld [vmem:[#allocation4 + $0xe0] sm:$0xff] }
 0x66c   :  { %v2947_v19 = vadd.f32 %v1188_v12, %v1187_v16  ;;  %v1369_v12 = vld [vmem:[#allocation4 + $0xe8] sm:$0xff] }
 0x66e   :  { %2377 = vtanh.f32 %v2947_v19 }
 0x678   :  { %v2378_v21 = vpop.eup %2377 }
 0x679   :  { %v1191_v36 = vmul.f32 %v2378_v21, %v2376_v20 }
 0x67b   :  { %1262 = vmatmul.mubr.f32.vlgmr.msra.gmra.mrb[12].mxu0 %v1191_v36  ;;  %1333 = vmatmul.mubr.f32.vlgmr.msra.gmra.mrb[12].mxu1 %v1191_v36 }
 0x67c   :  { %2186 = vmatpush1.bf16.msra.mxu0 %v2625_v8  ;;  %2218 = vmatpush1.bf16.msra.mxu1 %v2638_v25  ;;  %v1193_v8 = vld [vmem:[#allocation4 + $0xc0] sm:$0xff] }
 0x67d   :  { %2188 = vmatprep.subr.bf16.mxu0 %v2627_v9  ;;  %2220 = vmatprep.subr.bf16.mxu1 %v2648_v33  ;;  %v1194_v9 = vld [vmem:[#allocation4 + $0xc8] sm:$0xff] }
 0x67e   :  { %1436 = vmatprep.mubr.f32.mxu0 %v2537_v0  ;;  %1507 = vmatprep.mubr.f32.mxu1 %v2537_v0 }
 0x680   :  { %2190 = vmatpush1.bf16.msra.mxu0 %v2631_v14  ;;  %2222 = vmatpush1.bf16.msra.mxu1 %v2650_v37 }
 0x681   :  { %2192 = vmatprep.subr.bf16.mxu0 %v2634_v17  ;;  %2224 = vmatprep.subr.bf16.mxu1 %v2656_v45  ;;  %v1196_v45 = vld [vmem:[#allocation4 + $0xd8] sm:$0xff] }
 0x684   :  { %2194 = vmatpush1.bf16.msra.mxu0 %v2641_v26  ;;  %2226 = vmatpush1.bf16.msra.mxu1 %v2662_v48  ;;  %v1195_v48 = vld [vmem:[#allocation4 + $0xd0] sm:$0xff] }
 0x685   :  { %2196 = vmatprep.subr.bf16.mxu0 %v2645_v30  ;;  %2228 = vmatprep.subr.bf16.mxu1 %v2665_v52 }
 0x688   :  { %2198 = vmatpush1.bf16.msra.mxu0 %v2654_v42  ;;  %2230 = vmatpush1.bf16.msra.mxu1 %v2674_v62 }
 0x689   :  { %2200 = vmatprep.subr.bf16.mxu0 %v2659_v46  ;;  %2232 = vmatprep.subr.bf16.mxu1 %v2677_v1 }
 0x68c   :  { %2202 = vmatpush1.bf16.msra.mxu0 %v2668_v55  ;;  %2234 = vmatpush1.bf16.msra.mxu1 %v2686_v15 }
 0x68d   :  { %2204 = vmatprep.subr.bf16.mxu0 %v2671_v58  ;;  %2236 = vmatprep.subr.bf16.mxu1 %v2689_v18 }
 0x690   :  { %2206 = vmatpush1.bf16.msra.mxu0 %v2680_v7  ;;  %2238 = vmatpush1.bf16.msra.mxu1 %v2698_v31 }
 0x691   :  { %2208 = vmatprep.subr.bf16.mxu0 %v2683_v10  ;;  %2240 = vmatprep.subr.bf16.mxu1 %v2701_v32 }
 0x694   :  { %2210 = vmatpush1.bf16.msra.mxu0 %v2692_v24  ;;  %2242 = vmatpush1.bf16.msra.mxu1 %v2708_v40 }
 0x695   :  { %2212 = vmatprep.subr.bf16.mxu0 %v2695_v27  ;;  %2244 = vmatprep.subr.bf16.mxu1 %v2711_v41 }
 0x698   :  { %2214 = vmatpush1.bf16.msra.mxu0 %v2704_v39  ;;  %2246 = vmatpush1.bf16.msra.mxu1 %v2715_v47 }
 0x699   :  { %2247 = vmatprep.subr.bf16.mxu0 %v2538_v28 }
 0x74e   :  { %v1263_v14 = vpop.f32.mrb[12].mxu0  ;;  %v1334_v17 = vpop.f32.mrb[12].mxu1 }
 0x74f   :  { %v1339_v25 = vadd.f32 %v1263_v14, %v1193_v8  ;;  %v1265_v26 = vpop.f32.mrb[13].mxu0  ;;  %v1336_v30 = vpop.f32.mrb[13].mxu1  ;;  %v1341_v55 = vadd.f32 %v1334_v17, %v1195_v48  ;;  %v1370_v17 = vld [vmem:[#allocation4 + $0xf0] sm:$0xff] }
 0x750   :  { %v1340_v33 = vadd.f32 %v1265_v26, %v1194_v9  ;;  %v1342_v46 = vadd.f32 %v1336_v30, %v1196_v45 }
 0x751   :  { %v1676_v37 = vmul.f32 -1.442695, %v1339_v25 }
 0x752   :  { %v1677_v42 = vmul.f32 -1.442695, %v1340_v33  ;;  %v1678_v52 = vmul.f32 -1.442695, %v1342_v46 }
 0x753   :  { %2379 = vpow2.f32 %v1676_v37 }
 0x754   :  { %2381 = vpow2.f32 %v1677_v42 }
 0x755   :  { %2383 = vpow2.f32 %v1678_v52 }
 0x756   :  { %2385 = vtanh.f32 %v1341_v55 }
 0x75d   :  { %v2380_v58 = vpop.eup %2379 }
 0x75e   :  { %v2382_v62 = vpop.eup %2381  ;;  %v1346_v1 = vadd.f32 1.0, %v2380_v58 }
 0x75f   :  { %v1352_v7 = vadd.f32 1.0, %v2382_v62  ;;  %v2384_v10 = vpop.eup %2383 }
 0x760   :  { %2387 = vrcp.f32 %v1346_v1  ;;  %v2386_v15 = vpop.eup %2385  ;;  %v1359_v31 = vadd.f32 1.0, %v2384_v10 }
 0x761   :  { %2389 = vrcp.f32 %v1352_v7 }
 0x762   :  { %2391 = vrcp.f32 %v1359_v31 }
 0x76a   :  { %v2388_v18 = vpop.eup %2387 }
 0x76b   :  { %v2390_v24 = vpop.eup %2389  ;;  %v1363_v27 = vmul.f32 %v2388_v18, %v2386_v15  ;;  %v1682_v18 = vld [vmem:[#allocation10] ss:$0 sm:$0xff] }
 0x76c   :  { %v1362_v32 = vmul.f32 %v2390_v24, %v2947_v19  ;;  %v2392_v40 = vpop.eup %2391 }
 0x76e   :  { %v2983_v39 = vadd.f32 %v1363_v27, %v1362_v32 }
 0x770   :  { %2393 = vtanh.f32 %v2983_v39 }
 0x77a   :  { %v2394_v41 = vpop.eup %2393 }
 0x77b   :  { %v1366_v47 = vmul.f32 %v2394_v41, %v2392_v40 }
 0x77d   :  { %1437 = vmatmul.mubr.f32.vlgmr.msra.gmra.mrb[14].mxu0 %v1366_v47  ;;  %1508 = vmatmul.mubr.f32.vlgmr.msra.gmra.mrb[14].mxu1 %v1366_v47 }
 0x77e   :  { %2249 = vmatpush3.bf16.msra.mxu0 %v2248_v43  ;;  %1732 = vmatprep.mubr.msk.f32.mxu0 %vm2539_vm0, %v2537_v0  ;;  %v1371_v0 = vld [vmem:[#allocation4 + $0xf8] sm:$0xff] }
 0x77f   :  { %2250 = vmatprep.subr.bf16.mxu0 %v2538_v28 }
 0x782   :  { %2252 = vmatpush3.bf16.msra.mxu0 %v2251_v35 }
 0x783   :  { %2253 = vmatprep.subr.bf16.mxu0 %v2538_v28 }
 0x786   :  { %2255 = vmatpush3.bf16.msra.mxu0 %v2254_v50 }
 0x787   :  { %2256 = vmatprep.subr.bf16.mxu0 %v2538_v28 }
 0x78a   :  { %2258 = vmatpush3.bf16.msra.mxu0 %v2257_v54 }
 0x78b   :  { %2259 = vmatprep.subr.bf16.mxu0 %v2538_v28 }
 0x78e   :  { %2261 = vmatpush3.bf16.msra.mxu0 %v2260_v59 }
 0x78f   :  { %2262 = vmatprep.subr.bf16.mxu0 %v2538_v28 }
 0x792   :  { %2264 = vmatpush3.bf16.msra.mxu0 %v2263_v63 }
 0x793   :  { %2265 = vmatprep.subr.bf16.mxu0 %v2538_v28 }
 0x796   :  { %2267 = vmatpush3.bf16.msra.mxu0 %v2266_v2 }
 0x797   :  { %2268 = vmatprep.subr.bf16.mxu0 %v2538_v28 }
 0x79a   :  { %2270 = vmatpush3.bf16.msra.mxu0 %v2269_v6 }
 0x850   :  { %v1438_v13 = vpop.f32.mrb[14].mxu0  ;;  %v1509_v16 = vpop.f32.mrb[14].mxu1 }
 0x851   :  { %v1514_v19 = vadd.f32 %v1438_v13, %v1368_v11  ;;  %v1440_v20 = vpop.f32.mrb[15].mxu0  ;;  %v1511_v21 = vpop.f32.mrb[15].mxu1  ;;  %v1516_v26 = vadd.f32 %v1509_v16, %v1370_v17 }
 0x852   :  { %v1515_v36 = vadd.f32 %v1440_v20, %v1369_v12  ;;  %v1517_v14 = vadd.f32 %v1511_v21, %v1371_v0 }
 0x853   :  { %v1679_v8 = vmul.f32 -1.442695, %v1514_v19 }
 0x854   :  { %v1680_v9 = vmul.f32 -1.442695, %v1515_v36  ;;  %v1681_v25 = vmul.f32 -1.442695, %v1517_v14 }
 0x855   :  { %2395 = vpow2.f32 %v1679_v8 }
 0x856   :  { %2397 = vpow2.f32 %v1680_v9 }
 0x857   :  { %2399 = vpow2.f32 %v1681_v25 }
 0x858   :  { %2401 = vtanh.f32 %v1516_v26 }
 0x85f   :  { %v2396_v30 = vpop.eup %2395 }
 0x860   :  { %v2398_v33 = vpop.eup %2397  ;;  %v1521_v37 = vadd.f32 1.0, %v2396_v30 }
 0x861   :  { %v1527_v42 = vadd.f32 1.0, %v2398_v33  ;;  %v2400_v45 = vpop.eup %2399 }
 0x862   :  { %2403 = vrcp.f32 %v1521_v37  ;;  %v2402_v46 = vpop.eup %2401  ;;  %v1534_v58 = vadd.f32 1.0, %v2400_v45 }
 0x863   :  { %2405 = vrcp.f32 %v1527_v42 }
 0x864   :  { %2407 = vrcp.f32 %v1534_v58 }
 0x86c   :  { %v2404_v48 = vpop.eup %2403 }
 0x86d   :  { %v2406_v52 = vpop.eup %2405  ;;  %v1538_v55 = vmul.f32 %v2404_v48, %v2402_v46 }
 0x86e   :  { %v1537_v62 = vmul.f32 %v2406_v52, %v2983_v39  ;;  %v2408_v7 = vpop.eup %2407 }
 0x870   :  { %v1539_v1 = vadd.f32 %v1538_v55, %v1537_v62 }
 0x872   :  { %2409 = vtanh.f32 %v1539_v1 }
 0x87c   :  { %v2410_v10 = vpop.eup %2409 }
 0x87d   :  { %v1541_v15 = vmul.f32 %v2410_v10, %v2408_v7 }
 0x87f   :  { %1733 = vmatmul.mubr.f32.vlgmr.msra.gmra.mrb[16].mxu0 %v1541_v15 }
 0x952   :  { %v1636_v24 = vpop.f32.mrb[16].mxu0 }
 0x953   :  { %v1637_v27 = vadd.f32 %v1682_v18, %v1636_v24  ;;  %v1734_v31 = vpop.f32.mrb[17].mxu0 }
 0x955   :  { %1640 = vst [vmem:[#allocation12] sm:$0xff] %v1637_v27 }
 0x956   :  { %2510 = shalt.err (!%p2507_p8)
}
 0x957   :  { %s2511_s16 = scalar_lea.hbm %s3004_s4, 128 }
 0x958   :  { %p2512_p9 = scmp.ne.s32.totalorder %s3004_s4, %s2511_s16  ;;  %p2515_p10 = scmp.lt.u32.totalorder %s2511_s16, %s3004_s4 }
 0x95a   :  { %p2517_p11 = pnand %p2515_p10, %p2512_p9 }
 0x95c   :  { %2520 = shalt.err (!%p2517_p11)
}
 0x95d   :  { %1650 = dma.vmem_to_hbm [thread:$0]  %s1648_s1, 128, %s3004_s4, [#allocation6]  }
 0x95e   :  { %2527 = dma.done.wait [#allocation6], 128  }
 0x95f   :  { %2528 = vsyncadd [#allocation6], 4294967168 }
 0x960   :  { %1654 = vsyncpa [#allocation5], 1 }
 0x961   :  { %1655 = vsyncpa [#allocation8], 1 }
 0x962   :  { %1656 = vsyncpa [#allocation11], 1 }
 0x963   :  { %1657 = vsyncpa [#allocation6], 1 }

// kernel: lstm_model_forward.5
= control target key start
LH: loop header
LB: loop body
LE: loop exit
PB: predicated region body
PF: predicated region fallthrough
CT: control target
= control target key end

     0   :  { %7 = vsyncpa [#allocation5], 0  ;;  %s3218_s0 = inlined_call_operand.hbm [shape: f32[8,8,512], index: 0, kind: input, shape index: {}]   ;;  %s3219_s1 = inlined_call_operand.hbm [shape: f32[128,512], index: 1, kind: input, shape index: {}]   ;;  %s3220_s2 = inlined_call_operand.hbm [shape: f32[8,8,128], index: 2, kind: output, shape index: {}]  }
   0x1   :  { %8 = vsyncpa [#allocation8], 0 }
   0x2   :  { %9 = vsyncpa [#allocation6], 0  ;;  %s2738_s9 = smov [#allocation4]   ;;  %s2666_s13 = scalar_lea.hbm %s3218_s0, 4096 }
   0x3   :  { %s15_s10 = sshll.u32 %s2738_s9, 4  ;;  %p2667_p0 = scmp.ne.s32.totalorder %s3218_s0, %s2666_s13  ;;  %s16_s10 = int_to_ptr.vmem [resolvable:$true] %s15_s10 }
   0x4   :  { %p2670_p1 = scmp.lt.u32.totalorder %s2666_s13, %s3218_s0 }
   0x6   :  { %p2672_p2 = pnand %p2670_p1, %p2667_p0 }
   0x8   :  { %2675 = shalt.err (!%p2672_p2)
}
   0x9   :  { %s2676_s18 = scalar_lea.vmem %s16_s10, 4096  ;;  %p2681_p4 = scmp.lt.s32.totalorder %s16_s10, %s16_s10 }
   0xa   :  { %p2677_p3 = scmp.ne.s32.totalorder %s16_s10, %s2676_s18  ;;  %p2682_p5 = scmp.lt.s32.totalorder %s2676_s18, %s2676_s18 }
   0xc   :  { %p2683_p6 = por %p2682_p5, %p2681_p4 }
   0xe   :  { %p2684_p7 = pnand %p2683_p6, %p2677_p3 }
  0x10   :  { %2687 = shalt.err (!%p2684_p7)
}
  0x11   :  { %s2739_s19 = smov 512   ;;  %s2740_s20 = smov 32  }
  0x12   :  { %21 = dma.hbm_to_vmem [thread:$0]  %s3218_s0, 4096, %s16_s10, [#allocation5], %s2739_s19, %s2739_s19, %s2740_s20  }
  0x13   :  { %s2741_s23 = smov [#allocation7]   ;;  %s2688_s27 = scalar_lea.hbm %s3219_s1, 8192 }
  0x14   :  { %s27_s24 = sshll.u32 %s2741_s23, 4  ;;  %p2689_p8 = scmp.ne.s32.totalorder %s3219_s1, %s2688_s27  ;;  %s28_s24 = int_to_ptr.vmem [resolvable:$true] %s27_s24 }
  0x15   :  { %p2692_p9 = scmp.lt.u32.totalorder %s2688_s27, %s3219_s1 }
  0x17   :  { %p2694_p10 = pnand %p2692_p9, %p2689_p8 }
  0x19   :  { %2697 = shalt.err (!%p2694_p10)
}
  0x1a   :  { %s2698_s4 = scalar_lea.vmem %s28_s24, 8192  ;;  %p2703_p12 = scmp.lt.s32.totalorder %s28_s24, %s28_s24 }
  0x1b   :  { %p2699_p11 = scmp.ne.s32.totalorder %s28_s24, %s2698_s4  ;;  %p2704_p13 = scmp.lt.s32.totalorder %s2698_s4, %s2698_s4 }
  0x1d   :  { %p2705_p0 = por %p2704_p13, %p2703_p12 }
  0x1f   :  { %p2706_p1 = pnand %p2705_p0, %p2699_p11 }
  0x21   :  { %2709 = shalt.err (!%p2706_p1)
}
  0x22   :  { %33 = dma.hbm_to_vmem [thread:$0]  %s3219_s1, 8192, %s28_s24, [#allocation8], %s2739_s19, %s2739_s19, %s2740_s20  }
  0x23   :  { %2732 = dma.done.wait [#allocation5], 4096  }
  0x24   :  { %2733 = vsyncadd [#allocation5], 4294963200 }
  0x25   :  { %2734 = dma.done.wait [#allocation8], 8192  }
  0x26   :  { %2735 = vsyncadd [#allocation8], 4294959104  ;;  %v2742_v0 = vmov 0.0   ;;  %v53_v1 = vld [vmem:[#allocation7 + $0x8] sm:$0xff]  ;;  %v52_v3 = vld [vmem:[#allocation7] sm:$0xff]  ;;  %s2743_s1 = smov [#allocation9]  }
  0x27   :  { %180 = vmatprep.mubr.f32.mxu0 %v2742_v0  ;;  %251 = vmatprep.mubr.f32.mxu1 %v2742_v0  ;;  %v57_v2 = vld [vmem:[#allocation7 + $0x28] sm:$0xff]  ;;  %v56_v5 = vld [vmem:[#allocation7 + $0x20] sm:$0xff]  ;;  %v55_v19 = vld [vmem:[#allocation7 + $0x18] sm:$0xff]  ;;  %s1981_s6 = sshll.u32 %s2743_s1, 4  ;;  %s1982_s6 = int_to_ptr.vmem [resolvable:$true] %s1981_s6 }
  0x28   :  { %v2787_v4 = vpack.c.bf16 %v57_v2, %v53_v1  ;;  %v61_v6 = vld [vmem:[#allocation7 + $0x48] sm:$0xff]  ;;  %v2789_v8 = vpack.c.bf16 %v56_v5, %v52_v3  ;;  %v60_v10 = vld [vmem:[#allocation7 + $0x40] sm:$0xff]  ;;  %v59_v20 = vld [vmem:[#allocation7 + $0x38] sm:$0xff]  ;;  %s2710_s7 = scalar_lea.vmem %s1982_s6, 1024  ;;  %p2715_p3 = scmp.lt.s32.totalorder %s1982_s6, %s1982_s6 }
  0x29   :  { %v65_v7 = vld [vmem:[#allocation7 + $0x68] sm:$0xff]  ;;  %v64_v11 = vld [vmem:[#allocation7 + $0x60] sm:$0xff]  ;;  %v2800_v22 = vpack.c.bf16 %v59_v20, %v55_v19  ;;  %v54_v23 = vld [vmem:[#allocation7 + $0x10] sm:$0xff]  ;;  %p2711_p2 = scmp.ne.s32.totalorder %s1982_s6, %s2710_s7  ;;  %p2716_p4 = scmp.lt.s32.totalorder %s2710_s7, %s2710_s7 }
  0x2a   :  { %v2791_v9 = vpack.c.bf16 %v65_v7, %v61_v6  ;;  %v69_v12 = vld [vmem:[#allocation7 + $0x88] sm:$0xff]  ;;  %2019 = vmatprep.subr.bf16.mxu0 %v2787_v4  ;;  %v2795_v14 = vpack.c.bf16 %v64_v11, %v60_v10  ;;  %v68_v15 = vld [vmem:[#allocation7 + $0x80] sm:$0xff]  ;;  %v58_v24 = vld [vmem:[#allocation7 + $0x30] sm:$0xff] }
  0x2b   :  { %v73_v13 = vld [vmem:[#allocation7 + $0xa8] sm:$0xff]  ;;  %2021 = vmatpush1.bf16.msra.mxu0 %v2789_v8  ;;  %v72_v16 = vld [vmem:[#allocation7 + $0xa0] sm:$0xff]  ;;  %v2802_v25 = vpack.c.bf16 %v58_v24, %v54_v23  ;;  %2051 = vmatprep.subr.bf16.mxu1 %v2800_v22  ;;  %v63_v27 = vld [vmem:[#allocation7 + $0x58] sm:$0xff]  ;;  %p2717_p5 = por %p2716_p4, %p2715_p3 }
  0x2c   :  { %2023 = vmatprep.subr.bf16.mxu0 %v2791_v9  ;;  %v2798_v17 = vpack.c.bf16 %v73_v13, %v69_v12  ;;  %v77_v18 = vld [vmem:[#allocation7 + $0xc8] sm:$0xff]  ;;  %v2805_v26 = vpack.c.bf16 %v72_v16, %v68_v15  ;;  %v67_v28 = vld [vmem:[#allocation7 + $0x78] sm:$0xff]  ;;  %v62_v29 = vld [vmem:[#allocation7 + $0x50] sm:$0xff] }
  0x2d   :  { %v81_v21 = vld [vmem:[#allocation7 + $0xe8] sm:$0xff]  ;;  %v76_v31 = vld [vmem:[#allocation7 + $0xc0] sm:$0xff]  ;;  %2053 = vmatpush1.bf16.msra.mxu1 %v2802_v25  ;;  %v2812_v33 = vpack.c.bf16 %v67_v28, %v63_v27  ;;  %v66_v34 = vld [vmem:[#allocation7 + $0x70] sm:$0xff]  ;;  %p2718_p6 = pnand %p2717_p5, %p2711_p2 }
  0x2e   :  { %v2809_v30 = vpack.c.bf16 %v81_v21, %v77_v18  ;;  %v80_v32 = vld [vmem:[#allocation7 + $0xe0] sm:$0xff]  ;;  %v85_v35 = vld [vmem:[#allocation7 + $0x108] sm:$0xff]  ;;  %v2814_v37 = vpack.c.bf16 %v66_v34, %v62_v29  ;;  %v71_v38 = vld [vmem:[#allocation7 + $0x98] sm:$0xff] }
  0x2f   :  { %2025 = vmatpush1.bf16.msra.mxu0 %v2795_v14  ;;  %v89_v36 = vld [vmem:[#allocation7 + $0x128] sm:$0xff]  ;;  %2055 = vmatprep.subr.bf16.mxu1 %v2812_v33  ;;  %v75_v39 = vld [vmem:[#allocation7 + $0xb8] sm:$0xff]  ;;  %v70_v40 = vld [vmem:[#allocation7 + $0x90] sm:$0xff]  ;;  %v2818_v42 = vpack.c.bf16 %v80_v32, %v76_v31 }
  0x30   :  { %2027 = vmatprep.subr.bf16.mxu0 %v2798_v17  ;;  %v74_v41 = vld [vmem:[#allocation7 + $0xb0] sm:$0xff]  ;;  %v84_v43 = vld [vmem:[#allocation7 + $0x100] sm:$0xff]  ;;  %v2820_v45 = vpack.c.bf16 %v75_v39, %v71_v38  ;;  %v2823_v46 = vpack.c.bf16 %v89_v36, %v85_v35  ;;  %v93_v47 = vld [vmem:[#allocation7 + $0x148] sm:$0xff] }
  0x31   :  { %v88_v44 = vld [vmem:[#allocation7 + $0x120] sm:$0xff]  ;;  %2057 = vmatpush1.bf16.msra.mxu1 %v2814_v37  ;;  %v2826_v48 = vpack.c.bf16 %v74_v41, %v70_v40  ;;  %v79_v49 = vld [vmem:[#allocation7 + $0xd8] sm:$0xff]  ;;  %v97_v51 = vld [vmem:[#allocation7 + $0x168] sm:$0xff] }
  0x32   :  { %v83_v50 = vld [vmem:[#allocation7 + $0xf8] sm:$0xff]  ;;  %2059 = vmatprep.subr.bf16.mxu1 %v2820_v45  ;;  %v78_v53 = vld [vmem:[#allocation7 + $0xd0] sm:$0xff]  ;;  %v2832_v55 = vpack.c.bf16 %v88_v44, %v84_v43  ;;  %v2835_v58 = vpack.c.bf16 %v97_v51, %v93_v47  ;;  %v92_v59 = vld [vmem:[#allocation7 + $0x140] sm:$0xff] }
  0x33   :  { %2029 = vmatpush1.bf16.msra.mxu0 %v2805_v26  ;;  %v2829_v52 = vpack.c.bf16 %v83_v50, %v79_v49  ;;  %v82_v54 = vld [vmem:[#allocation7 + $0xf0] sm:$0xff]  ;;  %v87_v56 = vld [vmem:[#allocation7 + $0x118] sm:$0xff]  ;;  %v96_v60 = vld [vmem:[#allocation7 + $0x160] sm:$0xff] }
  0x34   :  { %2031 = vmatprep.subr.bf16.mxu0 %v2809_v30  ;;  %v91_v57 = vld [vmem:[#allocation7 + $0x138] sm:$0xff]  ;;  %v101_v61 = vld [vmem:[#allocation7 + $0x188] sm:$0xff]  ;;  %v2838_v62 = vpack.c.bf16 %v82_v54, %v78_v53  ;;  %v86_v2 = vld [vmem:[#allocation7 + $0x110] sm:$0xff]  ;;  %v2844_v7 = vpack.c.bf16 %v96_v60, %v92_v59 }
  0x35   :  { %2061 = vmatpush1.bf16.msra.mxu1 %v2826_v48  ;;  %v105_v63 = vld [vmem:[#allocation7 + $0x1a8] sm:$0xff]  ;;  %v2841_v1 = vpack.c.bf16 %v91_v57, %v87_v56  ;;  %v90_v3 = vld [vmem:[#allocation7 + $0x130] sm:$0xff]  ;;  %v95_v5 = vld [vmem:[#allocation7 + $0x158] sm:$0xff] }
  0x36   :  { %2063 = vmatprep.subr.bf16.mxu1 %v2829_v52  ;;  %v99_v6 = vld [vmem:[#allocation7 + $0x178] sm:$0xff]  ;;  %v2847_v10 = vpack.c.bf16 %v105_v63, %v101_v61  ;;  %v100_v11 = vld [vmem:[#allocation7 + $0x180] sm:$0xff]  ;;  %v109_v13 = vld [vmem:[#allocation7 + $0x1c8] sm:$0xff]  ;;  %v2850_v15 = vpack.c.bf16 %v90_v3, %v86_v2 }
  0x37   :  { %2033 = vmatpush1.bf16.msra.mxu0 %v2818_v42  ;;  %v104_v12 = vld [vmem:[#allocation7 + $0x1a0] sm:$0xff]  ;;  %v113_v16 = vld [vmem:[#allocation7 + $0x1e8] sm:$0xff]  ;;  %v2853_v18 = vpack.c.bf16 %v99_v6, %v95_v5  ;;  %v94_v19 = vld [vmem:[#allocation7 + $0x150] sm:$0xff] }
  0x38   :  { %2035 = vmatprep.subr.bf16.mxu0 %v2823_v46  ;;  %v98_v20 = vld [vmem:[#allocation7 + $0x170] sm:$0xff]  ;;  %v103_v21 = vld [vmem:[#allocation7 + $0x198] sm:$0xff]  ;;  %v2856_v24 = vpack.c.bf16 %v104_v12, %v100_v11  ;;  %v2859_v27 = vpack.c.bf16 %v113_v16, %v109_v13  ;;  %v108_v28 = vld [vmem:[#allocation7 + $0x1c0] sm:$0xff] }
  0x39   :  { %2065 = vmatpush1.bf16.msra.mxu1 %v2838_v62  ;;  %v107_v23 = vld [vmem:[#allocation7 + $0x1b8] sm:$0xff]  ;;  %v112_v29 = vld [vmem:[#allocation7 + $0x1e0] sm:$0xff]  ;;  %v2862_v31 = vpack.c.bf16 %v98_v20, %v94_v19  ;;  %v102_v34 = vld [vmem:[#allocation7 + $0x190] sm:$0xff] }
  0x3a   :  { %2067 = vmatprep.subr.bf16.mxu1 %v2841_v1  ;;  %v2865_v32 = vpack.c.bf16 %v107_v23, %v103_v21  ;;  %v106_v35 = vld [vmem:[#allocation7 + $0x1b0] sm:$0xff]  ;;  %v111_v36 = vld [vmem:[#allocation7 + $0x1d8] sm:$0xff]  ;;  %v2868_v39 = vpack.c.bf16 %v112_v29, %v108_v28  ;;  %v48_v49 = vld [vmem:[#allocation4] sm:$0xff] }
  0x3b   :  { %2037 = vmatpush1.bf16.msra.mxu0 %v2832_v55  ;;  %v115_v38 = vld [vmem:[#allocation7 + $0x1f8] sm:$0xff]  ;;  %v2872_v40 = vpack.c.bf16 %v106_v35, %v102_v34  ;;  %v110_v43 = vld [vmem:[#allocation7 + $0x1d0] sm:$0xff]  ;;  %v49_v50 = vld [vmem:[#allocation4 + $0x8] sm:$0xff] }
  0x3c   :  { %2039 = vmatprep.subr.bf16.mxu0 %v2835_v58  ;;  %v2875_v41 = vpack.c.bf16 %v115_v38, %v111_v36  ;;  %v114_v44 = vld [vmem:[#allocation7 + $0x1f0] sm:$0xff]  ;;  %v51_v60 = vld [vmem:[#allocation4 + $0x18] sm:$0xff] }
  0x3d   :  { %2069 = vmatpush1.bf16.msra.mxu1 %v2850_v15  ;;  %v2879_v47 = vpack.c.bf16 %v114_v44, %v110_v43  ;;  %v50_v3 = vld [vmem:[#allocation4 + $0x10] sm:$0xff] }
  0x3e   :  { %2071 = vmatprep.subr.bf16.mxu1 %v2853_v18 }
  0x3f   :  { %2041 = vmatpush1.bf16.msra.mxu0 %v2844_v7 }
  0x40   :  { %2043 = vmatprep.subr.bf16.mxu0 %v2847_v10 }
  0x41   :  { %2073 = vmatpush1.bf16.msra.mxu1 %v2862_v31 }
  0x42   :  { %2075 = vmatprep.subr.bf16.mxu1 %v2865_v32 }
  0x43   :  { %2045 = vmatpush1.bf16.msra.mxu0 %v2856_v24 }
  0x44   :  { %2047 = vmatprep.subr.bf16.mxu0 %v2859_v27 }
  0x45   :  { %2077 = vmatpush1.bf16.msra.mxu1 %v2872_v40 }
  0x46   :  { %2079 = vmatprep.subr.bf16.mxu1 %v2875_v41 }
  0x47   :  { %2049 = vmatpush1.bf16.msra.mxu0 %v2868_v39 }
  0x48   :  { %2083 = vmatprep.subr.bf16.mxu0 %v2787_v4 }
  0x49   :  { %2081 = vmatpush1.bf16.msra.mxu1 %v2879_v47 }
  0x4a   :  { %181 = vmatmul.mubr.f32.vlgmr.msra.gmra.mrb[0].mxu0 %v2742_v0  ;;  %2115 = vmatprep.subr.bf16.mxu1 %v2800_v22 }
  0x4b   :  { %2085 = vmatpush1.bf16.msra.mxu0 %v2789_v8  ;;  %420 = vmatprep.mubr.f32.mxu0 %v2742_v0 }
  0x4c   :  { %2087 = vmatprep.subr.bf16.mxu0 %v2791_v9  ;;  %252 = vmatmul.mubr.f32.vlgmr.msra.gmra.mrb[0].mxu1 %v2742_v0 }
  0x4d   :  { %2117 = vmatpush1.bf16.msra.mxu1 %v2802_v25  ;;  %491 = vmatprep.mubr.f32.mxu1 %v2742_v0 }
  0x4e   :  { %2119 = vmatprep.subr.bf16.mxu1 %v2812_v33 }
  0x4f   :  { %2089 = vmatpush1.bf16.msra.mxu0 %v2795_v14 }
  0x50   :  { %2091 = vmatprep.subr.bf16.mxu0 %v2798_v17 }
  0x51   :  { %2121 = vmatpush1.bf16.msra.mxu1 %v2814_v37 }
  0x52   :  { %2123 = vmatprep.subr.bf16.mxu1 %v2820_v45 }
  0x53   :  { %2093 = vmatpush1.bf16.msra.mxu0 %v2805_v26 }
  0x54   :  { %2095 = vmatprep.subr.bf16.mxu0 %v2809_v30 }
  0x55   :  { %2125 = vmatpush1.bf16.msra.mxu1 %v2826_v48 }
  0x56   :  { %2127 = vmatprep.subr.bf16.mxu1 %v2829_v52 }
  0x57   :  { %2097 = vmatpush1.bf16.msra.mxu0 %v2818_v42 }
  0x58   :  { %2099 = vmatprep.subr.bf16.mxu0 %v2823_v46 }
  0x59   :  { %2129 = vmatpush1.bf16.msra.mxu1 %v2838_v62 }
  0x5a   :  { %2131 = vmatprep.subr.bf16.mxu1 %v2841_v1 }
  0x5b   :  { %2101 = vmatpush1.bf16.msra.mxu0 %v2832_v55 }
  0x5c   :  { %2103 = vmatprep.subr.bf16.mxu0 %v2835_v58 }
  0x5d   :  { %2133 = vmatpush1.bf16.msra.mxu1 %v2850_v15 }
  0x5e   :  { %2135 = vmatprep.subr.bf16.mxu1 %v2853_v18 }
  0x5f   :  { %2105 = vmatpush1.bf16.msra.mxu0 %v2844_v7 }
  0x60   :  { %2107 = vmatprep.subr.bf16.mxu0 %v2847_v10 }
  0x61   :  { %2137 = vmatpush1.bf16.msra.mxu1 %v2862_v31 }
  0x62   :  { %2139 = vmatprep.subr.bf16.mxu1 %v2865_v32 }
  0x63   :  { %2109 = vmatpush1.bf16.msra.mxu0 %v2856_v24 }
  0x64   :  { %2111 = vmatprep.subr.bf16.mxu0 %v2859_v27 }
  0x65   :  { %2141 = vmatpush1.bf16.msra.mxu1 %v2872_v40 }
  0x66   :  { %2143 = vmatprep.subr.bf16.mxu1 %v2875_v41 }
  0x67   :  { %2113 = vmatpush1.bf16.msra.mxu0 %v2868_v39 }
  0x68   :  { %2147 = vmatprep.subr.bf16.mxu0 %v2787_v4 }
  0x69   :  { %2145 = vmatpush1.bf16.msra.mxu1 %v2879_v47 }
  0x6a   :  { %2179 = vmatprep.subr.bf16.mxu1 %v2800_v22 }
 0x11d   :  { %v182_v51 = vpop.f32.mrb[0].mxu0 }
 0x11e   :  { %v258_v53 = vadd.f32 %v182_v51, %v48_v49  ;;  %v184_v54 = vpop.f32.mrb[1].mxu0 }
 0x11f   :  { %v259_v56 = vadd.f32 %v184_v54, %v49_v50  ;;  %v253_v61 = vpop.f32.mrb[0].mxu1 }
 0x120   :  { %v1994_v57 = vmul.f32 -1.442695, %v258_v53  ;;  %v255_v63 = vpop.f32.mrb[1].mxu1  ;;  %v260_v6 = vadd.f32 %v253_v61, %v50_v3 }
 0x121   :  { %v1995_v59 = vmul.f32 -1.442695, %v259_v56  ;;  %v261_v2 = vadd.f32 %v255_v63, %v51_v60  ;;  %v291_v56 = vld [vmem:[#allocation4 + $0x38] sm:$0xff] }
 0x122   :  { %2538 = vpow2.f32 %v1994_v57  ;;  %v290_v57 = vld [vmem:[#allocation4 + $0x30] sm:$0xff] }
 0x123   :  { %2540 = vpow2.f32 %v1995_v59  ;;  %v1996_v5 = vmul.f32 -1.442695, %v261_v2 }
 0x125   :  { %2542 = vpow2.f32 %v1996_v5 }
 0x126   :  { %2544 = vtanh.f32 %v260_v6 }
 0x12c   :  { %v2539_v11 = vpop.eup %2538 }
 0x12d   :  { %v2541_v12 = vpop.eup %2540  ;;  %v265_v13 = vadd.f32 1.0, %v2539_v11 }
 0x12e   :  { %v271_v16 = vadd.f32 1.0, %v2541_v12 }
 0x12f   :  { %2546 = vrcp.f32 %v265_v13  ;;  %v2543_v19 = vpop.eup %2542 }
 0x130   :  { %2548 = vrcp.f32 %v271_v16  ;;  %v2545_v20 = vpop.eup %2544  ;;  %v278_v23 = vadd.f32 1.0, %v2543_v19 }
 0x132   :  { %2550 = vrcp.f32 %v278_v23 }
 0x139   :  { %v2547_v21 = vpop.eup %2546 }
 0x13a   :  { %v2549_v28 = vpop.eup %2548  ;;  %v282_v29 = vmul.f32 %v2547_v21, %v2545_v20 }
 0x13b   :  { %v281_v34 = vmul.f32 0.0, %v2549_v28  ;;  %v532_v28 = vld [vmem:[#allocation4 + $0x58] sm:$0xff] }
 0x13c   :  { %v2551_v36 = vpop.eup %2550 }
 0x13d   :  { %v2921_v35 = vadd.f32 %v282_v29, %v281_v34  ;;  %v531_v34 = vld [vmem:[#allocation4 + $0x50] sm:$0xff] }
 0x13f   :  { %2552 = vtanh.f32 %v2921_v35 }
 0x149   :  { %v2553_v38 = vpop.eup %2552 }
 0x14a   :  { %v285_v43 = vmul.f32 %v2553_v38, %v2551_v36 }
 0x14c   :  { %286 = vst [vmem:[#allocation9] sm:$0xff] %v285_v43  ;;  %421 = vmatmul.mubr.f32.vlgmr.msra.gmra.mrb[2].mxu0 %v285_v43  ;;  %492 = vmatmul.mubr.f32.vlgmr.msra.gmra.mrb[2].mxu1 %v285_v43 }
 0x14d   :  { %2149 = vmatpush1.bf16.msra.mxu0 %v2789_v8  ;;  %2181 = vmatpush1.bf16.msra.mxu1 %v2802_v25 }
 0x14e   :  { %2151 = vmatprep.subr.bf16.mxu0 %v2791_v9  ;;  %2183 = vmatprep.subr.bf16.mxu1 %v2812_v33 }
 0x14f   :  { %661 = vmatprep.mubr.f32.mxu0 %v2742_v0  ;;  %732 = vmatprep.mubr.f32.mxu1 %v2742_v0 }
 0x151   :  { %2153 = vmatpush1.bf16.msra.mxu0 %v2795_v14  ;;  %2185 = vmatpush1.bf16.msra.mxu1 %v2814_v37 }
 0x152   :  { %2155 = vmatprep.subr.bf16.mxu0 %v2798_v17  ;;  %2187 = vmatprep.subr.bf16.mxu1 %v2820_v45 }
 0x155   :  { %2157 = vmatpush1.bf16.msra.mxu0 %v2805_v26  ;;  %2189 = vmatpush1.bf16.msra.mxu1 %v2826_v48 }
 0x156   :  { %2159 = vmatprep.subr.bf16.mxu0 %v2809_v30  ;;  %2191 = vmatprep.subr.bf16.mxu1 %v2829_v52 }
 0x159   :  { %2161 = vmatpush1.bf16.msra.mxu0 %v2818_v42  ;;  %2193 = vmatpush1.bf16.msra.mxu1 %v2838_v62  ;;  %v288_v42 = vld [vmem:[#allocation4 + $0x20] sm:$0xff] }
 0x15a   :  { %2163 = vmatprep.subr.bf16.mxu0 %v2823_v46  ;;  %2195 = vmatprep.subr.bf16.mxu1 %v2841_v1 }
 0x15d   :  { %2165 = vmatpush1.bf16.msra.mxu0 %v2832_v55  ;;  %2197 = vmatpush1.bf16.msra.mxu1 %v2850_v15  ;;  %v289_v55 = vld [vmem:[#allocation4 + $0x28] sm:$0xff] }
 0x15e   :  { %2167 = vmatprep.subr.bf16.mxu0 %v2835_v58  ;;  %2199 = vmatprep.subr.bf16.mxu1 %v2853_v18 }
 0x161   :  { %2169 = vmatpush1.bf16.msra.mxu0 %v2844_v7  ;;  %2201 = vmatpush1.bf16.msra.mxu1 %v2862_v31 }
 0x162   :  { %2171 = vmatprep.subr.bf16.mxu0 %v2847_v10  ;;  %2203 = vmatprep.subr.bf16.mxu1 %v2865_v32 }
 0x165   :  { %2173 = vmatpush1.bf16.msra.mxu0 %v2856_v24  ;;  %2205 = vmatpush1.bf16.msra.mxu1 %v2872_v40 }
 0x166   :  { %2175 = vmatprep.subr.bf16.mxu0 %v2859_v27  ;;  %2207 = vmatprep.subr.bf16.mxu1 %v2875_v41 }
 0x169   :  { %2177 = vmatpush1.bf16.msra.mxu0 %v2868_v39  ;;  %2209 = vmatpush1.bf16.msra.mxu1 %v2879_v47 }
 0x16a   :  { %2211 = vmatprep.subr.bf16.mxu0 %v2787_v4  ;;  %2243 = vmatprep.subr.bf16.mxu1 %v2800_v22 }
 0x21f   :  { %v422_v7 = vpop.f32.mrb[2].mxu0  ;;  %v493_v44 = vpop.f32.mrb[2].mxu1 }
 0x220   :  { %v498_v49 = vadd.f32 %v422_v7, %v288_v42  ;;  %v424_v24 = vpop.f32.mrb[3].mxu0  ;;  %v495_v50 = vpop.f32.mrb[3].mxu1  ;;  %v500_v60 = vadd.f32 %v493_v44, %v290_v57  ;;  %v1016_v57 = vld [vmem:[#allocation7 + $0x8] sm:$0xff] }
 0x221   :  { %v499_v51 = vadd.f32 %v424_v24, %v289_v55  ;;  %v501_v39 = vadd.f32 %v495_v50, %v291_v56 }
 0x222   :  { %v1997_v53 = vmul.f32 -1.442695, %v498_v49 }
 0x223   :  { %v1998_v54 = vmul.f32 -1.442695, %v499_v51  ;;  %v1999_v59 = vmul.f32 -1.442695, %v501_v39 }
 0x224   :  { %2554 = vpow2.f32 %v1997_v53 }
 0x225   :  { %2556 = vpow2.f32 %v1998_v54 }
 0x226   :  { %2558 = vpow2.f32 %v1999_v59  ;;  %v1020_v59 = vld [vmem:[#allocation7 + $0x28] sm:$0xff] }
 0x227   :  { %2560 = vtanh.f32 %v500_v60  ;;  %v1018_v60 = vld [vmem:[#allocation7 + $0x18] sm:$0xff] }
 0x22e   :  { %v2555_v4 = vpop.eup %2554 }
 0x22f   :  { %v2557_v61 = vpop.eup %2556  ;;  %v505_v22 = vadd.f32 1.0, %v2555_v4  ;;  %v3010_v4 = vpack.c.bf16 %v1020_v59, %v1016_v57  ;;  %v1062_v59 = vld [vmem:[#allocation7 + $0x178] sm:$0xff] }
 0x230   :  { %v511_v63 = vadd.f32 1.0, %v2557_v61  ;;  %v2559_v2 = vpop.eup %2558  ;;  %v1022_v61 = vld [vmem:[#allocation7 + $0x38] sm:$0xff] }
 0x231   :  { %2562 = vrcp.f32 %v505_v22  ;;  %v2561_v3 = vpop.eup %2560  ;;  %v518_v12 = vadd.f32 1.0, %v2559_v2  ;;  %v1015_v22 = vld [vmem:[#allocation7] sm:$0xff]  ;;  %v3012_v2 = vpack.c.bf16 %v1022_v61, %v1018_v60  ;;  %v1057_v60 = vld [vmem:[#allocation7 + $0x150] sm:$0xff] }
 0x232   :  { %2564 = vrcp.f32 %v511_v63  ;;  %v1019_v63 = vld [vmem:[#allocation7 + $0x20] sm:$0xff]  ;;  %v1061_v61 = vld [vmem:[#allocation7 + $0x170] sm:$0xff] }
 0x233   :  { %2566 = vrcp.f32 %v518_v12  ;;  %v1024_v12 = vld [vmem:[#allocation7 + $0x48] sm:$0xff] }
 0x23b   :  { %v2563_v5 = vpop.eup %2562 }
 0x23c   :  { %v2565_v6 = vpop.eup %2564  ;;  %v522_v11 = vmul.f32 %v2563_v5, %v2561_v3  ;;  %v3014_v3 = vpack.c.bf16 %v1019_v63, %v1015_v22  ;;  %v1017_v5 = vld [vmem:[#allocation7 + $0x10] sm:$0xff]  ;;  %v3070_v63 = vpack.c.bf16 %v1061_v61, %v1057_v60 }
 0x23d   :  { %v521_v13 = vmul.f32 %v2565_v6, %v2921_v35  ;;  %v2567_v19 = vpop.eup %2566  ;;  %v1021_v6 = vld [vmem:[#allocation7 + $0x30] sm:$0xff] }
 0x23f   :  { %v2959_v16 = vadd.f32 %v522_v11, %v521_v13  ;;  %v3017_v11 = vpack.c.bf16 %v1021_v6, %v1017_v5  ;;  %v1028_v13 = vld [vmem:[#allocation7 + $0x68] sm:$0xff] }
 0x240   :  { %v1064_v5 = vld [vmem:[#allocation7 + $0x188] sm:$0xff] }
 0x241   :  { %2568 = vtanh.f32 %v2959_v16  ;;  %v1068_v6 = vld [vmem:[#allocation7 + $0x1a8] sm:$0xff] }
 0x24b   :  { %v2569_v20 = vpop.eup %2568 }
 0x24c   :  { %v525_v21 = vmul.f32 %v2569_v20, %v2567_v19  ;;  %v3022_v19 = vpack.c.bf16 %v1028_v13, %v1024_v12  ;;  %v1030_v20 = vld [vmem:[#allocation7 + $0x78] sm:$0xff]  ;;  %v3073_v13 = vpack.c.bf16 %v1068_v6, %v1064_v5 }
 0x24d   :  { %v1066_v12 = vld [vmem:[#allocation7 + $0x198] sm:$0xff] }
 0x24e   :  { %527 = vst [vmem:[#allocation9 + $0x8] sm:$0xff] %v525_v21  ;;  %662 = vmatmul.mubr.f32.vlgmr.msra.gmra.mrb[4].mxu0 %v525_v21  ;;  %733 = vmatmul.mubr.f32.vlgmr.msra.gmra.mrb[4].mxu1 %v525_v21  ;;  %v1023_v21 = vld [vmem:[#allocation7 + $0x40] sm:$0xff] }
 0x24f   :  { %2213 = vmatpush1.bf16.msra.mxu0 %v2789_v8  ;;  %2245 = vmatpush1.bf16.msra.mxu1 %v2802_v25  ;;  %v798_v8 = vld [vmem:[#allocation7 + $0xc0] sm:$0xff] }
 0x250   :  { %2215 = vmatprep.subr.bf16.mxu0 %v2791_v9  ;;  %2247 = vmatprep.subr.bf16.mxu1 %v2812_v33  ;;  %v802_v9 = vld [vmem:[#allocation7 + $0xe0] sm:$0xff] }
 0x251   :  { %902 = vmatprep.mubr.f32.mxu0 %v2742_v0  ;;  %973 = vmatprep.mubr.f32.mxu1 %v2742_v0  ;;  %v810_v25 = vld [vmem:[#allocation7 + $0x120] sm:$0xff] }
 0x252   :  { %v818_v33 = vld [vmem:[#allocation7 + $0x160] sm:$0xff] }
 0x253   :  { %2217 = vmatpush1.bf16.msra.mxu0 %v2795_v14  ;;  %2249 = vmatpush1.bf16.msra.mxu1 %v2814_v37  ;;  %v2985_v14 = vpack.c.bf16 %v802_v9, %v798_v8  ;;  %v1027_v8 = vld [vmem:[#allocation7 + $0x60] sm:$0xff] }
 0x254   :  { %2219 = vmatprep.subr.bf16.mxu0 %v2798_v17  ;;  %2251 = vmatprep.subr.bf16.mxu1 %v2820_v45  ;;  %v806_v17 = vld [vmem:[#allocation7 + $0x100] sm:$0xff] }
 0x255   :  { %v822_v45 = vld [vmem:[#allocation7 + $0x180] sm:$0xff] }
 0x257   :  { %2221 = vmatpush1.bf16.msra.mxu0 %v2805_v26  ;;  %2253 = vmatpush1.bf16.msra.mxu1 %v2826_v48  ;;  %v2989_v26 = vpack.c.bf16 %v810_v25, %v806_v17  ;;  %v826_v48 = vld [vmem:[#allocation7 + $0x1a0] sm:$0xff]  ;;  %v3026_v17 = vpack.c.bf16 %v1027_v8, %v1023_v21  ;;  %v1025_v25 = vld [vmem:[#allocation7 + $0x50] sm:$0xff] }
 0x258   :  { %2223 = vmatprep.subr.bf16.mxu0 %v2809_v30  ;;  %2255 = vmatprep.subr.bf16.mxu1 %v2829_v52  ;;  %v814_v30 = vld [vmem:[#allocation7 + $0x140] sm:$0xff]  ;;  %v2996_v52 = vpack.c.bf16 %v826_v48, %v822_v45  ;;  %v1032_v45 = vld [vmem:[#allocation7 + $0x88] sm:$0xff]  ;;  %v1069_v21 = vld [vmem:[#allocation7 + $0x1b0] sm:$0xff] }
 0x259   :  { %v2992_v37 = vpack.c.bf16 %v818_v33, %v814_v30  ;;  %v1029_v30 = vld [vmem:[#allocation7 + $0x70] sm:$0xff]  ;;  %v1036_v48 = vld [vmem:[#allocation7 + $0xa8] sm:$0xff] }
 0x25a   :  { %v3029_v33 = vpack.c.bf16 %v1029_v30, %v1025_v25  ;;  %v1072_v25 = vld [vmem:[#allocation7 + $0x1c8] sm:$0xff] }
 0x25b   :  { %2257 = vmatpush1.bf16.msra.mxu1 %v2838_v62  ;;  %2225 = vmatpush1.bf16.msra.mxu0 %v2985_v14  ;;  %v834_v62 = vld [vmem:[#allocation7 + $0x1e0] sm:$0xff]  ;;  %v1076_v30 = vld [vmem:[#allocation7 + $0x1e8] sm:$0xff] }
 0x25c   :  { %2259 = vmatprep.subr.bf16.mxu1 %v2841_v1  ;;  %2227 = vmatprep.subr.bf16.mxu0 %v2823_v46  ;;  %v830_v46 = vld [vmem:[#allocation7 + $0x1c0] sm:$0xff] }
 0x25d   :  { %v3000_v1 = vpack.c.bf16 %v834_v62, %v830_v46  ;;  %v1034_v46 = vld [vmem:[#allocation7 + $0x98] sm:$0xff]  ;;  %v3034_v62 = vpack.c.bf16 %v1036_v48, %v1032_v45 }
 0x25e   :  { %v1074_v45 = vld [vmem:[#allocation7 + $0x1d8] sm:$0xff] }
 0x25f   :  { %2261 = vmatpush1.bf16.msra.mxu1 %v2850_v15  ;;  %2229 = vmatpush1.bf16.msra.mxu0 %v2989_v26  ;;  %v529_v15 = vld [vmem:[#allocation4 + $0x40] sm:$0xff]  ;;  %v1078_v48 = vld [vmem:[#allocation7 + $0x1f8] sm:$0xff] }
 0x260   :  { %2263 = vmatprep.subr.bf16.mxu1 %v2853_v18  ;;  %2231 = vmatprep.subr.bf16.mxu0 %v2835_v58  ;;  %v530_v58 = vld [vmem:[#allocation4 + $0x48] sm:$0xff] }
 0x263   :  { %2265 = vmatpush1.bf16.msra.mxu1 %v2862_v31  ;;  %2233 = vmatpush1.bf16.msra.mxu0 %v2992_v37 }
 0x264   :  { %2267 = vmatprep.subr.bf16.mxu1 %v2865_v32  ;;  %2235 = vmatprep.subr.bf16.mxu0 %v2847_v10 }
 0x267   :  { %2269 = vmatpush1.bf16.msra.mxu1 %v2872_v40  ;;  %2237 = vmatpush1.bf16.msra.mxu0 %v2996_v52 }
 0x268   :  { %2271 = vmatprep.subr.bf16.mxu1 %v2875_v41  ;;  %2239 = vmatprep.subr.bf16.mxu0 %v2859_v27 }
 0x26b   :  { %2273 = vmatpush1.bf16.msra.mxu1 %v2879_v47  ;;  %2241 = vmatpush1.bf16.msra.mxu0 %v3000_v1 }
 0x26c   :  { %2275 = vmatprep.subr.bf16.mxu0 %v3010_v4  ;;  %2307 = vmatprep.subr.bf16.mxu1 %v3012_v2 }
 0x321   :  { %v663_v18 = vpop.f32.mrb[4].mxu0  ;;  %v734_v31 = vpop.f32.mrb[4].mxu1 }
 0x322   :  { %v739_v32 = vadd.f32 %v663_v18, %v529_v15  ;;  %v665_v40 = vpop.f32.mrb[5].mxu0  ;;  %v736_v41 = vpop.f32.mrb[5].mxu1  ;;  %v741_v36 = vadd.f32 %v734_v31, %v531_v34  ;;  %v1038_v15 = vld [vmem:[#allocation7 + $0xb8] sm:$0xff]  ;;  %v1035_v18 = vld [vmem:[#allocation7 + $0xa0] sm:$0xff] }
 0x323   :  { %v740_v47 = vadd.f32 %v665_v40, %v530_v58  ;;  %v742_v29 = vadd.f32 %v736_v41, %v532_v28  ;;  %v1031_v58 = vld [vmem:[#allocation7 + $0x80] sm:$0xff]  ;;  %v3036_v31 = vpack.c.bf16 %v1038_v15, %v1034_v46  ;;  %v1033_v40 = vld [vmem:[#allocation7 + $0x90] sm:$0xff]  ;;  %v1042_v28 = vld [vmem:[#allocation7 + $0xd8] sm:$0xff]  ;;  %v3083_v15 = vpack.c.bf16 %v1076_v30, %v1072_v25 }
 0x324   :  { %v2000_v23 = vmul.f32 -1.442695, %v739_v32  ;;  %v3038_v32 = vpack.c.bf16 %v1035_v18, %v1031_v58  ;;  %v1037_v41 = vld [vmem:[#allocation7 + $0xb0] sm:$0xff]  ;;  %v1046_v34 = vld [vmem:[#allocation7 + $0xf8] sm:$0xff]  ;;  %v3086_v58 = vpack.c.bf16 %v1078_v48, %v1074_v45 }
 0x325   :  { %v2001_v10 = vmul.f32 -1.442695, %v740_v47  ;;  %v2002_v35 = vmul.f32 -1.442695, %v742_v29  ;;  %v3041_v47 = vpack.c.bf16 %v1037_v41, %v1033_v40  ;;  %v1073_v18 = vld [vmem:[#allocation7 + $0x1d0] sm:$0xff] }
 0x326   :  { %2570 = vpow2.f32 %v2000_v23  ;;  %v1040_v23 = vld [vmem:[#allocation7 + $0xc8] sm:$0xff]  ;;  %v1077_v40 = vld [vmem:[#allocation7 + $0x1f0] sm:$0xff] }
 0x327   :  { %2572 = vpow2.f32 %v2001_v10  ;;  %v1044_v10 = vld [vmem:[#allocation7 + $0xe8] sm:$0xff]  ;;  %v3091_v41 = vpack.c.bf16 %v1077_v40, %v1073_v18 }
 0x328   :  { %2574 = vpow2.f32 %v2002_v35  ;;  %v3046_v29 = vpack.c.bf16 %v1044_v10, %v1040_v23  ;;  %v1041_v35 = vld [vmem:[#allocation7 + $0xd0] sm:$0xff]  ;;  %v770_v23 = vld [vmem:[#allocation4 + $0x60] sm:$0xff]  ;;  %v771_v10 = vld [vmem:[#allocation4 + $0x68] sm:$0xff] }
 0x329   :  { %2576 = vtanh.f32 %v741_v36  ;;  %v1045_v36 = vld [vmem:[#allocation7 + $0xf0] sm:$0xff] }
 0x330   :  { %v2571_v27 = vpop.eup %2570 }
 0x331   :  { %v2573_v38 = vpop.eup %2572  ;;  %v746_v43 = vadd.f32 1.0, %v2571_v27  ;;  %v3048_v27 = vpack.c.bf16 %v1046_v34, %v1042_v28 }
 0x332   :  { %v752_v42 = vadd.f32 1.0, %v2573_v38  ;;  %v2575_v55 = vpop.eup %2574  ;;  %v3050_v38 = vpack.c.bf16 %v1045_v36, %v1041_v35 }
 0x333   :  { %2578 = vrcp.f32 %v746_v43  ;;  %v2577_v7 = vpop.eup %2576  ;;  %v759_v50 = vadd.f32 1.0, %v2575_v55  ;;  %v1048_v43 = vld [vmem:[#allocation7 + $0x108] sm:$0xff]  ;;  %v1050_v55 = vld [vmem:[#allocation7 + $0x118] sm:$0xff] }
 0x334   :  { %2580 = vrcp.f32 %v752_v42  ;;  %v1052_v42 = vld [vmem:[#allocation7 + $0x128] sm:$0xff] }
 0x335   :  { %2582 = vrcp.f32 %v759_v50 }
 0x33d   :  { %v2579_v44 = vpop.eup %2578 }
 0x33e   :  { %v2581_v49 = vpop.eup %2580  ;;  %v763_v24 = vmul.f32 %v2579_v44, %v2577_v7  ;;  %v3056_v7 = vpack.c.bf16 %v1052_v42, %v1048_v43  ;;  %v1054_v44 = vld [vmem:[#allocation7 + $0x138] sm:$0xff] }
 0x33f   :  { %v762_v51 = vmul.f32 %v2581_v49, %v2959_v16  ;;  %v2583_v54 = vpop.eup %2582  ;;  %v1026_v16 = vld [vmem:[#allocation7 + $0x58] sm:$0xff]  ;;  %v1049_v49 = vld [vmem:[#allocation7 + $0x110] sm:$0xff]  ;;  %v3058_v50 = vpack.c.bf16 %v1054_v44, %v1050_v55 }
 0x340   :  { %v3024_v9 = vpack.c.bf16 %v1030_v20, %v1026_v16  ;;  %v1070_v16 = vld [vmem:[#allocation7 + $0x1b8] sm:$0xff]  ;;  %v1065_v20 = vld [vmem:[#allocation7 + $0x190] sm:$0xff] }
 0x341   :  { %v3005_v53 = vadd.f32 %v763_v24, %v762_v51  ;;  %v1053_v24 = vld [vmem:[#allocation7 + $0x130] sm:$0xff]  ;;  %v3076_v8 = vpack.c.bf16 %v1070_v16, %v1066_v12  ;;  %v3081_v46 = vpack.c.bf16 %v1069_v21, %v1065_v20 }
 0x342   :  { %v3060_v51 = vpack.c.bf16 %v1053_v24, %v1049_v49  ;;  %v773_v49 = vld [vmem:[#allocation4 + $0x78] sm:$0xff] }
 0x343   :  { %2584 = vtanh.f32 %v3005_v53 }
 0x34d   :  { %v2585_v56 = vpop.eup %2584 }
 0x34e   :  { %v766_v39 = vmul.f32 %v2585_v56, %v2583_v54  ;;  %v1056_v54 = vld [vmem:[#allocation7 + $0x148] sm:$0xff] }
 0x34f   :  { %v1060_v56 = vld [vmem:[#allocation7 + $0x168] sm:$0xff] }
 0x350   :  { %768 = vst [vmem:[#allocation9 + $0x10] sm:$0xff] %v766_v39  ;;  %903 = vmatmul.mubr.f32.vlgmr.msra.gmra.mrb[6].mxu0 %v766_v39  ;;  %974 = vmatmul.mubr.f32.vlgmr.msra.gmra.mrb[6].mxu1 %v766_v39  ;;  %v1058_v39 = vld [vmem:[#allocation7 + $0x158] sm:$0xff]  ;;  %v3065_v57 = vpack.c.bf16 %v1060_v56, %v1056_v54  ;;  %v772_v54 = vld [vmem:[#allocation4 + $0x70] sm:$0xff] }
 0x351   :  { %1143 = vmatprep.mubr.f32.mxu0 %v2742_v0  ;;  %1214 = vmatprep.mubr.f32.mxu1 %v2742_v0  ;;  %v3068_v22 = vpack.c.bf16 %v1062_v59, %v1058_v39 }
 0x352   :  { %2277 = vmatpush1.bf16.msra.mxu0 %v3014_v3  ;;  %2309 = vmatpush1.bf16.msra.mxu1 %v3017_v11 }
 0x353   :  { %2279 = vmatprep.subr.bf16.mxu0 %v3022_v19  ;;  %2311 = vmatprep.subr.bf16.mxu1 %v3024_v9 }
 0x356   :  { %2281 = vmatpush1.bf16.msra.mxu0 %v3026_v17  ;;  %2313 = vmatpush1.bf16.msra.mxu1 %v3029_v33 }
 0x357   :  { %2283 = vmatprep.subr.bf16.mxu0 %v3034_v62  ;;  %2315 = vmatprep.subr.bf16.mxu1 %v3036_v31 }
 0x35a   :  { %2285 = vmatpush1.bf16.msra.mxu0 %v3038_v32  ;;  %2317 = vmatpush1.bf16.msra.mxu1 %v3041_v47 }
 0x35b   :  { %2287 = vmatprep.subr.bf16.mxu0 %v3046_v29  ;;  %2319 = vmatprep.subr.bf16.mxu1 %v3048_v27 }
 0x35e   :  { %2289 = vmatpush1.bf16.msra.mxu0 %v2985_v14  ;;  %2321 = vmatpush1.bf16.msra.mxu1 %v3050_v38 }
 0x35f   :  { %2291 = vmatprep.subr.bf16.mxu0 %v3056_v7  ;;  %2323 = vmatprep.subr.bf16.mxu1 %v3058_v50 }
 0x362   :  { %2293 = vmatpush1.bf16.msra.mxu0 %v2989_v26  ;;  %2325 = vmatpush1.bf16.msra.mxu1 %v3060_v51 }
 0x363   :  { %2295 = vmatprep.subr.bf16.mxu0 %v3065_v57  ;;  %2327 = vmatprep.subr.bf16.mxu1 %v3068_v22 }
 0x366   :  { %2297 = vmatpush1.bf16.msra.mxu0 %v2992_v37  ;;  %2329 = vmatpush1.bf16.msra.mxu1 %v3070_v63 }
 0x367   :  { %2299 = vmatprep.subr.bf16.mxu0 %v3073_v13  ;;  %2331 = vmatprep.subr.bf16.mxu1 %v3076_v8 }
 0x36a   :  { %2301 = vmatpush1.bf16.msra.mxu0 %v2996_v52  ;;  %2333 = vmatpush1.bf16.msra.mxu1 %v3081_v46 }
 0x36b   :  { %2303 = vmatprep.subr.bf16.mxu0 %v3083_v15  ;;  %2335 = vmatprep.subr.bf16.mxu1 %v3086_v58 }
 0x36e   :  { %2305 = vmatpush1.bf16.msra.mxu0 %v3000_v1  ;;  %2337 = vmatpush1.bf16.msra.mxu1 %v3091_v41 }
 0x36f   :  { %2339 = vmatprep.subr.bf16.mxu0 %v3010_v4  ;;  %2371 = vmatprep.subr.bf16.mxu1 %v3012_v2 }
 0x423   :  { %v904_v28 = vpop.f32.mrb[6].mxu0  ;;  %v975_v34 = vpop.f32.mrb[6].mxu1 }
 0x424   :  { %v980_v35 = vadd.f32 %v904_v28, %v770_v23  ;;  %v906_v36 = vpop.f32.mrb[7].mxu0  ;;  %v977_v43 = vpop.f32.mrb[7].mxu1  ;;  %v982_v39 = vadd.f32 %v975_v34, %v772_v54  ;;  %v1012_v23 = vld [vmem:[#allocation4 + $0x88] sm:$0xff] }
 0x425   :  { %v981_v42 = vadd.f32 %v906_v36, %v771_v10  ;;  %v983_v24 = vadd.f32 %v977_v43, %v773_v49 }
 0x426   :  { %v2003_v55 = vmul.f32 -1.442695, %v980_v35 }
 0x427   :  { %v2004_v44 = vmul.f32 -1.442695, %v981_v42  ;;  %v2005_v56 = vmul.f32 -1.442695, %v983_v24  ;;  %v1013_v24 = vld [vmem:[#allocation4 + $0x90] sm:$0xff] }
 0x428   :  { %2586 = vpow2.f32 %v2003_v55 }
 0x429   :  { %2588 = vpow2.f32 %v2004_v44  ;;  %v1014_v44 = vld [vmem:[#allocation4 + $0x98] sm:$0xff] }
 0x42a   :  { %2590 = vpow2.f32 %v2005_v56 }
 0x42b   :  { %2592 = vtanh.f32 %v982_v39 }
 0x432   :  { %v2587_v59 = vpop.eup %2586 }
 0x433   :  { %v2589_v60 = vpop.eup %2588  ;;  %v987_v61 = vadd.f32 1.0, %v2587_v59 }
 0x434   :  { %v993_v5 = vadd.f32 1.0, %v2589_v60  ;;  %v2591_v6 = vpop.eup %2590 }
 0x435   :  { %2594 = vrcp.f32 %v987_v61  ;;  %v2593_v12 = vpop.eup %2592  ;;  %v1000_v25 = vadd.f32 1.0, %v2591_v6 }
 0x436   :  { %2596 = vrcp.f32 %v993_v5 }
 0x437   :  { %2598 = vrcp.f32 %v1000_v25 }
 0x43f   :  { %v2595_v16 = vpop.eup %2594 }
 0x440   :  { %v2597_v20 = vpop.eup %2596  ;;  %v1004_v21 = vmul.f32 %v2595_v16, %v2593_v12 }
 0x441   :  { %v1003_v30 = vmul.f32 %v2597_v20, %v3005_v53  ;;  %v2599_v48 = vpop.eup %2598  ;;  %v1011_v53 = vld [vmem:[#allocation4 + $0x80] sm:$0xff] }
 0x443   :  { %v3099_v45 = vadd.f32 %v1004_v21, %v1003_v30 }
 0x445   :  { %2600 = vtanh.f32 %v3099_v45 }
 0x44f   :  { %v2601_v18 = vpop.eup %2600 }
 0x450   :  { %v1007_v40 = vmul.f32 %v2601_v18, %v2599_v48 }
 0x452   :  { %1009 = vst [vmem:[#allocation9 + $0x18] sm:$0xff] %v1007_v40  ;;  %1144 = vmatmul.mubr.f32.vlgmr.msra.gmra.mrb[8].mxu0 %v1007_v40  ;;  %1215 = vmatmul.mubr.f32.vlgmr.msra.gmra.mrb[8].mxu1 %v1007_v40 }
 0x453   :  { %2341 = vmatpush1.bf16.msra.mxu0 %v3014_v3  ;;  %2373 = vmatpush1.bf16.msra.mxu1 %v3017_v11 }
 0x454   :  { %2343 = vmatprep.subr.bf16.mxu0 %v3022_v19  ;;  %2375 = vmatprep.subr.bf16.mxu1 %v3024_v9 }
 0x455   :  { %1384 = vmatprep.mubr.f32.mxu0 %v2742_v0  ;;  %1455 = vmatprep.mubr.f32.mxu1 %v2742_v0 }
 0x457   :  { %2345 = vmatpush1.bf16.msra.mxu0 %v3026_v17  ;;  %2377 = vmatpush1.bf16.msra.mxu1 %v3029_v33 }
 0x458   :  { %2347 = vmatprep.subr.bf16.mxu0 %v3034_v62  ;;  %2379 = vmatprep.subr.bf16.mxu1 %v3036_v31 }
 0x45b   :  { %2349 = vmatpush1.bf16.msra.mxu0 %v3038_v32  ;;  %2381 = vmatpush1.bf16.msra.mxu1 %v3041_v47 }
 0x45c   :  { %2351 = vmatprep.subr.bf16.mxu0 %v3046_v29  ;;  %2383 = vmatprep.subr.bf16.mxu1 %v3048_v27 }
 0x45f   :  { %2353 = vmatpush1.bf16.msra.mxu0 %v2985_v14  ;;  %2385 = vmatpush1.bf16.msra.mxu1 %v3050_v38 }
 0x460   :  { %2355 = vmatprep.subr.bf16.mxu0 %v3056_v7  ;;  %2387 = vmatprep.subr.bf16.mxu1 %v3058_v50 }
 0x463   :  { %2357 = vmatpush1.bf16.msra.mxu0 %v2989_v26  ;;  %2389 = vmatpush1.bf16.msra.mxu1 %v3060_v51 }
 0x464   :  { %2359 = vmatprep.subr.bf16.mxu0 %v3065_v57  ;;  %2391 = vmatprep.subr.bf16.mxu1 %v3068_v22 }
 0x467   :  { %2361 = vmatpush1.bf16.msra.mxu0 %v2992_v37  ;;  %2393 = vmatpush1.bf16.msra.mxu1 %v3070_v63 }
 0x468   :  { %2363 = vmatprep.subr.bf16.mxu0 %v3073_v13  ;;  %2395 = vmatprep.subr.bf16.mxu1 %v3076_v8 }
 0x46b   :  { %2365 = vmatpush1.bf16.msra.mxu0 %v2996_v52  ;;  %2397 = vmatpush1.bf16.msra.mxu1 %v3081_v46 }
 0x46c   :  { %2367 = vmatprep.subr.bf16.mxu0 %v3083_v15  ;;  %2399 = vmatprep.subr.bf16.mxu1 %v3086_v58 }
 0x46f   :  { %2369 = vmatpush1.bf16.msra.mxu0 %v3000_v1  ;;  %2401 = vmatpush1.bf16.msra.mxu1 %v3091_v41 }
 0x470   :  { %2403 = vmatprep.subr.bf16.mxu0 %v3010_v4  ;;  %2435 = vmatprep.subr.bf16.mxu1 %v3012_v2 }
 0x525   :  { %v1145_v10 = vpop.f32.mrb[8].mxu0  ;;  %v1216_v28 = vpop.f32.mrb[8].mxu1 }
 0x526   :  { %v1221_v34 = vadd.f32 %v1145_v10, %v1011_v53  ;;  %v1147_v35 = vpop.f32.mrb[9].mxu0  ;;  %v1218_v36 = vpop.f32.mrb[9].mxu1  ;;  %v1223_v56 = vadd.f32 %v1216_v28, %v1013_v24 }
 0x527   :  { %v1222_v43 = vadd.f32 %v1147_v35, %v1012_v23  ;;  %v1224_v49 = vadd.f32 %v1218_v36, %v1014_v44  ;;  %v1255_v35 = vld [vmem:[#allocation4 + $0xb8] sm:$0xff]  ;;  %v1254_v36 = vld [vmem:[#allocation4 + $0xb0] sm:$0xff] }
 0x528   :  { %v2006_v42 = vmul.f32 -1.442695, %v1221_v34 }
 0x529   :  { %v2007_v55 = vmul.f32 -1.442695, %v1222_v43  ;;  %v2008_v54 = vmul.f32 -1.442695, %v1224_v49 }
 0x52a   :  { %2602 = vpow2.f32 %v2006_v42 }
 0x52b   :  { %2604 = vpow2.f32 %v2007_v55 }
 0x52c   :  { %2606 = vpow2.f32 %v2008_v54 }
 0x52d   :  { %2608 = vtanh.f32 %v1223_v56 }
 0x534   :  { %v2603_v39 = vpop.eup %2602 }
 0x535   :  { %v2605_v59 = vpop.eup %2604  ;;  %v1228_v60 = vadd.f32 1.0, %v2603_v39 }
 0x536   :  { %v1234_v61 = vadd.f32 1.0, %v2605_v59  ;;  %v2607_v5 = vpop.eup %2606 }
 0x537   :  { %2610 = vrcp.f32 %v1228_v60  ;;  %v2609_v6 = vpop.eup %2608  ;;  %v1241_v21 = vadd.f32 1.0, %v2607_v5 }
 0x538   :  { %2612 = vrcp.f32 %v1234_v61 }
 0x539   :  { %2614 = vrcp.f32 %v1241_v21  ;;  %v1495_v21 = vld [vmem:[#allocation4 + $0xd0] sm:$0xff] }
 0x541   :  { %v2611_v12 = vpop.eup %2610 }
 0x542   :  { %v2613_v16 = vpop.eup %2612  ;;  %v1245_v20 = vmul.f32 %v2611_v12, %v2609_v6 }
 0x543   :  { %v1244_v25 = vmul.f32 %v2613_v16, %v3099_v45  ;;  %v2615_v48 = vpop.eup %2614 }
 0x545   :  { %v3137_v30 = vadd.f32 %v1245_v20, %v1244_v25  ;;  %v1496_v20 = vld [vmem:[#allocation4 + $0xd8] sm:$0xff] }
 0x547   :  { %2616 = vtanh.f32 %v3137_v30 }
 0x551   :  { %v2617_v18 = vpop.eup %2616 }
 0x552   :  { %v1248_v40 = vmul.f32 %v2617_v18, %v2615_v48 }
 0x554   :  { %1250 = vst [vmem:[#allocation9 + $0x20] sm:$0xff] %v1248_v40  ;;  %1385 = vmatmul.mubr.f32.vlgmr.msra.gmra.mrb[10].mxu0 %v1248_v40  ;;  %1456 = vmatmul.mubr.f32.vlgmr.msra.gmra.mrb[10].mxu1 %v1248_v40 }
 0x555   :  { %2405 = vmatpush1.bf16.msra.mxu0 %v3014_v3  ;;  %2437 = vmatpush1.bf16.msra.mxu1 %v3017_v11 }
 0x556   :  { %2407 = vmatprep.subr.bf16.mxu0 %v3022_v19  ;;  %2439 = vmatprep.subr.bf16.mxu1 %v3024_v9 }
 0x557   :  { %1625 = vmatprep.mubr.f32.mxu0 %v2742_v0  ;;  %1696 = vmatprep.mubr.f32.mxu1 %v2742_v0 }
 0x559   :  { %2409 = vmatpush1.bf16.msra.mxu0 %v3026_v17  ;;  %2441 = vmatpush1.bf16.msra.mxu1 %v3029_v33 }
 0x55a   :  { %2411 = vmatprep.subr.bf16.mxu0 %v3034_v62  ;;  %2443 = vmatprep.subr.bf16.mxu1 %v3036_v31 }
 0x55d   :  { %2413 = vmatpush1.bf16.msra.mxu0 %v3038_v32  ;;  %2445 = vmatpush1.bf16.msra.mxu1 %v3041_v47 }
 0x55e   :  { %2415 = vmatprep.subr.bf16.mxu0 %v3046_v29  ;;  %2447 = vmatprep.subr.bf16.mxu1 %v3048_v27 }
 0x561   :  { %2417 = vmatpush1.bf16.msra.mxu0 %v2985_v14  ;;  %2449 = vmatpush1.bf16.msra.mxu1 %v3050_v38  ;;  %v1252_v14 = vld [vmem:[#allocation4 + $0xa0] sm:$0xff] }
 0x562   :  { %2419 = vmatprep.subr.bf16.mxu0 %v3056_v7  ;;  %2451 = vmatprep.subr.bf16.mxu1 %v3058_v50 }
 0x565   :  { %2421 = vmatpush1.bf16.msra.mxu0 %v2989_v26  ;;  %2453 = vmatpush1.bf16.msra.mxu1 %v3060_v51  ;;  %v1253_v26 = vld [vmem:[#allocation4 + $0xa8] sm:$0xff] }
 0x566   :  { %2423 = vmatprep.subr.bf16.mxu0 %v3065_v57  ;;  %2455 = vmatprep.subr.bf16.mxu1 %v3068_v22 }
 0x569   :  { %2425 = vmatpush1.bf16.msra.mxu0 %v2992_v37  ;;  %2457 = vmatpush1.bf16.msra.mxu1 %v3070_v63 }
 0x56a   :  { %2427 = vmatprep.subr.bf16.mxu0 %v3073_v13  ;;  %2459 = vmatprep.subr.bf16.mxu1 %v3076_v8 }
 0x56d   :  { %2429 = vmatpush1.bf16.msra.mxu0 %v2996_v52  ;;  %2461 = vmatpush1.bf16.msra.mxu1 %v3081_v46 }
 0x56e   :  { %2431 = vmatprep.subr.bf16.mxu0 %v3083_v15  ;;  %2463 = vmatprep.subr.bf16.mxu1 %v3086_v58 }
 0x571   :  { %2433 = vmatpush1.bf16.msra.mxu0 %v3000_v1  ;;  %2465 = vmatpush1.bf16.msra.mxu1 %v3091_v41 }
 0x572   :  { %2467 = vmatprep.subr.bf16.mxu0 %v3010_v4  ;;  %2499 = vmatprep.subr.bf16.mxu1 %v3012_v2 }
 0x627   :  { %v1386_v37 = vpop.f32.mrb[10].mxu0  ;;  %v1457_v45 = vpop.f32.mrb[10].mxu1 }
 0x628   :  { %v1462_v53 = vadd.f32 %v1386_v37, %v1252_v14  ;;  %v1388_v52 = vpop.f32.mrb[11].mxu0  ;;  %v1459_v23 = vpop.f32.mrb[11].mxu1  ;;  %v1464_v42 = vadd.f32 %v1457_v45, %v1254_v36  ;;  %v1735_v36 = vld [vmem:[#allocation4 + $0xe8] sm:$0xff] }
 0x629   :  { %v1463_v10 = vadd.f32 %v1388_v52, %v1253_v26  ;;  %v1465_v1 = vadd.f32 %v1459_v23, %v1255_v35 }
 0x62a   :  { %v2009_v28 = vmul.f32 -1.442695, %v1462_v53 }
 0x62b   :  { %v2010_v34 = vmul.f32 -1.442695, %v1463_v10  ;;  %v2011_v43 = vmul.f32 -1.442695, %v1465_v1  ;;  %v1734_v1 = vld [vmem:[#allocation4 + $0xe0] sm:$0xff] }
 0x62c   :  { %2618 = vpow2.f32 %v2009_v28 }
 0x62d   :  { %2620 = vpow2.f32 %v2010_v34 }
 0x62e   :  { %2622 = vpow2.f32 %v2011_v43 }
 0x62f   :  { %2624 = vtanh.f32 %v1464_v42 }
 0x636   :  { %v2619_v4 = vpop.eup %2618 }
 0x637   :  { %v2621_v55 = vpop.eup %2620  ;;  %v1469_v2 = vadd.f32 1.0, %v2619_v4 }
 0x638   :  { %v1475_v44 = vadd.f32 1.0, %v2621_v55  ;;  %v2623_v49 = vpop.eup %2622 }
 0x639   :  { %2626 = vrcp.f32 %v1469_v2  ;;  %v2625_v24 = vpop.eup %2624  ;;  %v1482_v59 = vadd.f32 1.0, %v2623_v49 }
 0x63a   :  { %2628 = vrcp.f32 %v1475_v44 }
 0x63b   :  { %2630 = vrcp.f32 %v1482_v59 }
 0x643   :  { %v2627_v54 = vpop.eup %2626 }
 0x644   :  { %v2629_v56 = vpop.eup %2628  ;;  %v1486_v39 = vmul.f32 %v2627_v54, %v2625_v24  ;;  %v1737_v54 = vld [vmem:[#allocation4 + $0xf8] sm:$0xff] }
 0x645   :  { %v1485_v60 = vmul.f32 %v2629_v56, %v3137_v30  ;;  %v2631_v5 = vpop.eup %2630 }
 0x647   :  { %v3175_v61 = vadd.f32 %v1486_v39, %v1485_v60  ;;  %v1736_v39 = vld [vmem:[#allocation4 + $0xf0] sm:$0xff] }
 0x649   :  { %2632 = vtanh.f32 %v3175_v61 }
 0x653   :  { %v2633_v6 = vpop.eup %2632 }
 0x654   :  { %v1489_v12 = vmul.f32 %v2633_v6, %v2631_v5 }
 0x656   :  { %1491 = vst [vmem:[#allocation9 + $0x28] sm:$0xff] %v1489_v12  ;;  %1626 = vmatmul.mubr.f32.vlgmr.msra.gmra.mrb[12].mxu0 %v1489_v12  ;;  %1697 = vmatmul.mubr.f32.vlgmr.msra.gmra.mrb[12].mxu1 %v1489_v12 }
 0x657   :  { %2469 = vmatpush1.bf16.msra.mxu0 %v3014_v3  ;;  %2501 = vmatpush1.bf16.msra.mxu1 %v3017_v11  ;;  %v1766_v3 = vld [vmem:[#allocation7 + $0xe0] sm:$0xff] }
 0x658   :  { %2471 = vmatprep.subr.bf16.mxu0 %v3022_v19  ;;  %2503 = vmatprep.subr.bf16.mxu1 %v3024_v9  ;;  %v1770_v19 = vld [vmem:[#allocation7 + $0x100] sm:$0xff] }
 0x659   :  { %1866 = vmatprep.mubr.f32.mxu0 %v2742_v0  ;;  %1937 = vmatprep.mubr.f32.mxu1 %v2742_v0  ;;  %v1762_v0 = vld [vmem:[#allocation7 + $0xc0] sm:$0xff] }
 0x65a   :  { %v2480_v11 = vpack.c.bf16 %v1766_v3, %v1762_v0  ;;  %v1774_v9 = vld [vmem:[#allocation7 + $0x120] sm:$0xff] }
 0x65b   :  { %2473 = vmatpush1.bf16.msra.mxu0 %v3026_v17  ;;  %2505 = vmatpush1.bf16.msra.mxu1 %v3029_v33  ;;  %v2484_v17 = vpack.c.bf16 %v1774_v9, %v1770_v19  ;;  %v1778_v33 = vld [vmem:[#allocation7 + $0x140] sm:$0xff] }
 0x65c   :  { %2475 = vmatprep.subr.bf16.mxu0 %v3034_v62  ;;  %2507 = vmatprep.subr.bf16.mxu1 %v3036_v31  ;;  %v1782_v62 = vld [vmem:[#allocation7 + $0x160] sm:$0xff] }
 0x65d   :  { %v2488_v31 = vpack.c.bf16 %v1782_v62, %v1778_v33 }
 0x65f   :  { %2477 = vmatpush1.bf16.msra.mxu0 %v3038_v32  ;;  %2509 = vmatpush1.bf16.msra.mxu1 %v3041_v47  ;;  %v1786_v32 = vld [vmem:[#allocation7 + $0x180] sm:$0xff] }
 0x660   :  { %2479 = vmatprep.subr.bf16.mxu0 %v3046_v29  ;;  %2511 = vmatprep.subr.bf16.mxu1 %v3048_v27  ;;  %v1790_v47 = vld [vmem:[#allocation7 + $0x1a0] sm:$0xff] }
 0x661   :  { %v2492_v29 = vpack.c.bf16 %v1790_v47, %v1786_v32  ;;  %v1794_v27 = vld [vmem:[#allocation7 + $0x1c0] sm:$0xff] }
 0x663   :  { %2513 = vmatpush1.bf16.msra.mxu1 %v3050_v38  ;;  %2481 = vmatpush1.bf16.msra.mxu0 %v2480_v11  ;;  %v1798_v38 = vld [vmem:[#allocation7 + $0x1e0] sm:$0xff] }
 0x664   :  { %2515 = vmatprep.subr.bf16.mxu1 %v3058_v50  ;;  %2483 = vmatprep.subr.bf16.mxu0 %v3056_v7  ;;  %v2496_v50 = vpack.c.bf16 %v1798_v38, %v1794_v27  ;;  %v1493_v7 = vld [vmem:[#allocation4 + $0xc0] sm:$0xff] }
 0x667   :  { %2517 = vmatpush1.bf16.msra.mxu1 %v3060_v51  ;;  %2485 = vmatpush1.bf16.msra.mxu0 %v2484_v17  ;;  %v1494_v51 = vld [vmem:[#allocation4 + $0xc8] sm:$0xff] }
 0x668   :  { %2519 = vmatprep.subr.bf16.mxu1 %v3068_v22  ;;  %2487 = vmatprep.subr.bf16.mxu0 %v3065_v57 }
 0x66b   :  { %2521 = vmatpush1.bf16.msra.mxu1 %v3070_v63  ;;  %2489 = vmatpush1.bf16.msra.mxu0 %v2488_v31 }
 0x66c   :  { %2523 = vmatprep.subr.bf16.mxu1 %v3076_v8  ;;  %2491 = vmatprep.subr.bf16.mxu0 %v3073_v13 }
 0x66f   :  { %2525 = vmatpush1.bf16.msra.mxu1 %v3081_v46  ;;  %2493 = vmatpush1.bf16.msra.mxu0 %v2492_v29 }
 0x670   :  { %2527 = vmatprep.subr.bf16.mxu1 %v3086_v58  ;;  %2495 = vmatprep.subr.bf16.mxu0 %v3083_v15 }
 0x673   :  { %2529 = vmatpush1.bf16.msra.mxu1 %v3091_v41  ;;  %2497 = vmatpush1.bf16.msra.mxu0 %v2496_v50 }
 0x729   :  { %v1627_v22 = vpop.f32.mrb[12].mxu0  ;;  %v1698_v63 = vpop.f32.mrb[12].mxu1 }
 0x72a   :  { %v1703_v8 = vadd.f32 %v1627_v22, %v1493_v7  ;;  %v1629_v46 = vpop.f32.mrb[13].mxu0  ;;  %v1700_v57 = vpop.f32.mrb[13].mxu1  ;;  %v1705_v30 = vadd.f32 %v1698_v63, %v1495_v21 }
 0x72b   :  { %v1704_v58 = vadd.f32 %v1629_v46, %v1494_v51  ;;  %v1706_v13 = vadd.f32 %v1700_v57, %v1496_v20 }
 0x72c   :  { %v2012_v41 = vmul.f32 -1.442695, %v1703_v8 }
 0x72d   :  { %v2013_v16 = vmul.f32 -1.442695, %v1704_v58  ;;  %v2014_v25 = vmul.f32 -1.442695, %v1706_v13 }
 0x72e   :  { %2634 = vpow2.f32 %v2012_v41 }
 0x72f   :  { %2636 = vpow2.f32 %v2013_v16 }
 0x730   :  { %2638 = vpow2.f32 %v2014_v25 }
 0x731   :  { %2640 = vtanh.f32 %v1705_v30 }
 0x738   :  { %v2635_v48 = vpop.eup %2634 }
 0x739   :  { %v2637_v15 = vpop.eup %2636  ;;  %v1710_v18 = vadd.f32 1.0, %v2635_v48 }
 0x73a   :  { %v1716_v40 = vadd.f32 1.0, %v2637_v15  ;;  %v2639_v14 = vpop.eup %2638 }
 0x73b   :  { %2642 = vrcp.f32 %v1710_v18  ;;  %v2641_v26 = vpop.eup %2640  ;;  %v1723_v52 = vadd.f32 1.0, %v2639_v14 }
 0x73c   :  { %2644 = vrcp.f32 %v1716_v40 }
 0x73d   :  { %2646 = vrcp.f32 %v1723_v52 }
 0x745   :  { %v2643_v37 = vpop.eup %2642 }
 0x746   :  { %v2645_v45 = vpop.eup %2644  ;;  %v1727_v53 = vmul.f32 %v2643_v37, %v2641_v26 }
 0x747   :  { %v1726_v23 = vmul.f32 %v2645_v45, %v3175_v61  ;;  %v2647_v28 = vpop.eup %2646 }
 0x749   :  { %v1728_v10 = vadd.f32 %v1727_v53, %v1726_v23 }
 0x74b   :  { %2648 = vtanh.f32 %v1728_v10 }
 0x755   :  { %v2649_v34 = vpop.eup %2648 }
 0x756   :  { %v1730_v35 = vmul.f32 %v2649_v34, %v2647_v28 }
 0x758   :  { %1732 = vst [vmem:[#allocation9 + $0x30] sm:$0xff] %v1730_v35  ;;  %1867 = vmatmul.mubr.f32.vlgmr.msra.gmra.mrb[14].mxu0 %v1730_v35  ;;  %1938 = vmatmul.mubr.f32.vlgmr.msra.gmra.mrb[14].mxu1 %v1730_v35 }
 0x82b   :  { %v1868_v43 = vpop.f32.mrb[14].mxu0  ;;  %v1939_v42 = vpop.f32.mrb[14].mxu1 }
 0x82c   :  { %v1944_v4 = vadd.f32 %v1868_v43, %v1734_v1  ;;  %v1870_v55 = vpop.f32.mrb[15].mxu0  ;;  %v1941_v2 = vpop.f32.mrb[15].mxu1  ;;  %v1946_v60 = vadd.f32 %v1939_v42, %v1736_v39 }
 0x82d   :  { %v1945_v44 = vadd.f32 %v1870_v55, %v1735_v36  ;;  %v1947_v56 = vadd.f32 %v1941_v2, %v1737_v54 }
 0x82e   :  { %v2015_v49 = vmul.f32 -1.442695, %v1944_v4 }
 0x82f   :  { %v2016_v24 = vmul.f32 -1.442695, %v1945_v44  ;;  %v2017_v59 = vmul.f32 -1.442695, %v1947_v56 }
 0x830   :  { %2650 = vpow2.f32 %v2015_v49 }
 0x831   :  { %2652 = vpow2.f32 %v2016_v24 }
 0x832   :  { %2654 = vpow2.f32 %v2017_v59 }
 0x833   :  { %2656 = vtanh.f32 %v1946_v60 }
 0x83a   :  { %v2651_v61 = vpop.eup %2650 }
 0x83b   :  { %v2653_v5 = vpop.eup %2652  ;;  %v1951_v6 = vadd.f32 1.0, %v2651_v61 }
 0x83c   :  { %v1957_v12 = vadd.f32 1.0, %v2653_v5  ;;  %v2655_v0 = vpop.eup %2654 }
 0x83d   :  { %2658 = vrcp.f32 %v1951_v6  ;;  %v2657_v3 = vpop.eup %2656  ;;  %v1964_v17 = vadd.f32 1.0, %v2655_v0 }
 0x83e   :  { %2660 = vrcp.f32 %v1957_v12 }
 0x83f   :  { %2662 = vrcp.f32 %v1964_v17 }
 0x847   :  { %v2659_v11 = vpop.eup %2658 }
 0x848   :  { %v2661_v19 = vpop.eup %2660  ;;  %v1968_v9 = vmul.f32 %v2659_v11, %v2657_v3 }
 0x849   :  { %v1967_v33 = vmul.f32 %v2661_v19, %v1728_v10  ;;  %v2663_v31 = vpop.eup %2662 }
 0x84b   :  { %v1969_v62 = vadd.f32 %v1968_v9, %v1967_v33 }
 0x84d   :  { %2664 = vtanh.f32 %v1969_v62 }
 0x857   :  { %v2665_v32 = vpop.eup %2664 }
 0x858   :  { %v1971_v47 = vmul.f32 %v2665_v32, %v2663_v31 }
 0x85a   :  { %1973 = vst [vmem:[#allocation9 + $0x38] sm:$0xff] %v1971_v47 }
 0x85b   :  { %2721 = shalt.err (!%p2718_p6)
}
 0x85c   :  { %s2722_s10 = scalar_lea.hbm %s3220_s2, 1024 }
 0x85d   :  { %p2723_p7 = scmp.ne.s32.totalorder %s3220_s2, %s2722_s10  ;;  %p2726_p8 = scmp.lt.u32.totalorder %s2722_s10, %s3220_s2 }
 0x85f   :  { %p2728_p9 = pnand %p2726_p8, %p2723_p7 }
 0x861   :  { %2731 = shalt.err (!%p2728_p9)
}
 0x862   :  { %s2744_s15 = smov 128   ;;  %s2745_s16 = smov 8  }
 0x863   :  { %1987 = dma.vmem_to_hbm [thread:$0]  %s1982_s6, 1024, %s3220_s2, [#allocation6], %s2744_s15, %s2744_s15, %s2745_s16  }
 0x864   :  { %2736 = dma.done.wait [#allocation6], 1024  }
 0x865   :  { %2737 = vsyncadd [#allocation6], 4294966272 }
 0x866   :  { %1991 = vsyncpa [#allocation5], 1 }
 0x867   :  { %1992 = vsyncpa [#allocation8], 1 }
 0x868   :  { %1993 = vsyncpa [#allocation6], 1 }

</bundles_post_ra>
